<compile_context>
chip_gen: v5e
topology: v5e:2x2
jax: 0.10.0
libtpu: 0.0.40
codegen_flags: <defaults>
</compile_context>

<pallas_src>
import functools

import jax
import jax.numpy as jnp
from jax import lax
from jax.experimental import pallas as pl
from jax.experimental.pallas import tpu as pltpu


# MXU-native operand dtype on v5e/v6e/v7x; accumulation stays in float32.
MATMUL_DTYPE = jnp.bfloat16
LANE = 128


# --------------------------- fused encoder + GRU kernel --------------------------- #
def rnn_fused_kernel(len_ref, p_ref, cw_ref, cb_ref, m_ref, wi0_ref, wbig_ref,
                     bi0_ref, bg_ref, out_ref, gi0_ref, *, seq_len, batch, hidden):
    # len_ref:  (B,)          SMEM  sequence lengths (scalar prefetch)
    # p_ref:    (T*B*L, 128)  bf16  time-major im2col patches (K zero-padded to 128 lanes)
    # cw_ref:   (128, C)      bf16  conv weight (rows >= K are zero)
    # cb_ref:   (1, C)        f32   conv bias
    # m_ref:    (T*B, T*B*L)  bf16  block-diagonal temporal-mean matrix (entries 1/L)
    # wi0_ref:  (E, 3H)       bf16  layer-0 input->hidden weights, gates packed (r, z, n)
    # wbig_ref: (2H, 9H)      bf16  block-diag [[Wh0 | Wi1 | 0], [0 | 0 | Wh1]]
    # bi0_ref:  (1, 3H)       f32   layer-0 input bias
    # bg_ref:   (1, 9H)       f32   packed [bh0 | bi1 | bh1]
    # out_ref:  (T, B, H)     f32   GRU outputs, padded steps zeroed (time-major)
    # gi0_ref:  (T*B, 3H)     f32   VMEM scratch: hoisted layer-0 input projections
    T, B, H = seq_len, batch, hidden

    # ------------- Encoder: conv-as-matmul + ReLU + temporal mean (MXU only) -------------
    acts = jnp.dot(p_ref[...], cw_ref[...], preferred_element_type=jnp.float32)
    acts = jnp.maximum(acts + cb_ref[...], 0.0)                        # (T*B*L, C)
    enc = jnp.dot(m_ref[...], acts.astype(MATMUL_DTYPE),
                  preferred_element_type=jnp.float32)                  # (T*B, C), time-major

    # layer-0 input projections for ALL timesteps in one matmul (hoisted out of the loop)
    gi0_ref[...] = jnp.dot(enc.astype(MATMUL_DTYPE), wi0_ref[...],
                           preferred_element_type=jnp.float32) + bi0_ref[...]

    # recurrence-resident values, broadcast once outside the loop
    wbig = wbig_ref[...]                                               # (2H, 9H) bf16
    bg = jnp.broadcast_to(bg_ref[...], (B, 9 * H))                     # (B, 9H)  f32

    # lengths (SMEM scalars) -> (B, 1) column used for per-step output masking
    len_col = jnp.concatenate(
        [jnp.zeros((1, 1), jnp.int32) + len_ref[b] for b in range(B)], axis=0)

    def cell(gi, gh, h_prev):
        # fused (r, z, n) gates from packed (B, 3H) pre-activations.
        # NOTE: H=32 gate slices are 32-lane sub-slices of a 96-lane value; the resulting
        #       lane selects are hidden under the per-step MXU latency (review: accept).
        r = jax.nn.sigmoid(gi[:, 0:H] + gh[:, 0:H])
        z = jax.nn.sigmoid(gi[:, H:2 * H] + gh[:, H:2 * H])
        n = jnp.tanh(gi[:, 2 * H:3 * H] + r * gh[:, 2 * H:3 * H])
        return (1.0 - z) * n + z * h_prev

    def store_out(t, h1_new):
        # pack_padded/pad_packed semantics folded into the per-step store
        mask = (t < len_col).astype(jnp.float32)                       # (B, 1)
        out_ref[t] = (h1_new * mask).astype(out_ref.dtype)

    def fused_matmul(h0_cur, h1_prev):
        # ONE matmul per stage: [h0_{s-1} | h1_{s-2}] @ [[Wh0 | Wi1 | 0], [0 | 0 | Wh1]]
        cat = jnp.concatenate([h0_cur, h1_prev], axis=1).astype(MATMUL_DTYPE)   # (B, 2H)
        return jnp.dot(cat, wbig, preferred_element_type=jnp.float32) + bg      # (B, 9H)

    zeros_bh = jnp.zeros((B, H), jnp.float32)

    # ---- prologue (stage 0): layer-0 step 0;  h0_{-1} = 0  =>  gh0 = bh0 broadcast ----
    h0 = cell(gi0_ref[pl.ds(0, B), :], bg[:, 0:3 * H], zeros_bh)       # h0_0
    h1 = zeros_bh                                                      # h1_{-1}

    # ---- steady state (stages 1..T-1): layer-0 step s and layer-1 step s-1 ----
    def stage(s, carry):
        h0_cur, h1_prev = carry                                        # h0_{s-1}, h1_{s-2}
        g = fused_matmul(h0_cur, h1_prev)
        gh0 = g[:, 0:3 * H]
        gi1 = g[:, 3 * H:6 * H]
        gh1 = g[:, 6 * H:9 * H]
        h1_new = cell(gi1, gh1, h1_prev)                               # h1_{s-1}
        store_out(s - 1, h1_new)
        h0_new = cell(gi0_ref[pl.ds(s * B, B), :], gh0, h0_cur)        # h0_s
        return h0_new, h1_new

    h0, h1 = lax.fori_loop(1, T, stage, (h0, h1),
                           unroll=min(max(T - 1, 1), 8))

    # ---- epilogue (stage T): layer-1 step T-1 only ----
    g = fused_matmul(h0, h1)
    h1_last = cell(g[:, 3 * H:6 * H], g[:, 6 * H:9 * H], h1)
    store_out(T - 1, h1_last)


# ----------------------------------- wrapper ----------------------------------- #
def rnn_forward(x, lengths, conv_w, conv_b, gru_params, init_kernel, init_stride,
                enc_code_size):
    """x: (B, T, audio_feat_samples) f32; lengths: sorted-descending python ints."""
    B, T, S = x.shape
    K, stride = init_kernel, init_stride
    C = enc_code_size
    H = gru_params["wh0"].shape[0]
    L = (S - K) // stride + 1

    # time-major im2col (wrapper glue, plain XLA) with K zero-padded to a full 128-lane
    # stripe so the kernel's patch loads are lane-dense.
    idx = jnp.arange(L)[:, None] * stride + jnp.arange(K)[None, :]     # (L, K)
    patches = jnp.transpose(x, (1, 0, 2))[:, :, idx]                   # (T, B, L, K)
    patches = patches.reshape(T * B * L, K)
    patches = jnp.pad(patches, ((0, 0), (0, LANE - K))).astype(MATMUL_DTYPE)

    conv_w_p = jnp.pad(conv_w, ((0, LANE - K), (0, 0))).astype(MATMUL_DTYPE)   # (128, C)
    conv_b2 = conv_b.astype(jnp.float32).reshape(1, C)

    # per-frame temporal mean as a block-diagonal matmul (no in-kernel reshapes)
    mean_mat = (jnp.repeat(jnp.eye(T * B, dtype=jnp.float32), L, axis=1) / float(L)
                ).astype(MATMUL_DTYPE)                                 # (T*B, T*B*L)

    # GRU weights: gates packed (r, z, n); recurrence weights packed block-diagonally so
    # each stage of the skewed recurrence is ONE (B, 2H) @ (2H, 9H) matmul.
    wi0 = gru_params["wi0"].astype(MATMUL_DTYPE)                       # (E, 3H)
    z_h3h = jnp.zeros((H, 3 * H), jnp.float32)
    w_big = jnp.concatenate(
        [jnp.concatenate([gru_params["wh0"], gru_params["wi1"], z_h3h], axis=1),
         jnp.concatenate([z_h3h, z_h3h, gru_params["wh1"]], axis=1)],
        axis=0).astype(MATMUL_DTYPE)                                   # (2H, 9H)
    bi0 = gru_params["bi0"].astype(jnp.float32)                        # (1, 3H)
    b_big = jnp.concatenate(
        [gru_params["bh0"], gru_params["bi1"], gru_params["bh1"]],
        axis=1).astype(jnp.float32)                                    # (1, 9H)

    lengths_arr = jnp.asarray(lengths, dtype=jnp.int32)                # (B,) -> SMEM

    kernel = functools.partial(rnn_fused_kernel, seq_len=T, batch=B, hidden=H)
    full2 = lambda i, lens: (0, 0)
    out_tbh = pl.pallas_call(
        kernel,
        out_shape=jax.ShapeDtypeStruct((T, B, H), jnp.float32),
        grid_spec=pltpu.PrefetchScalarGridSpec(
            num_scalar_prefetch=1,
            # whole forward is one fused in-kernel pass.
            # TODO(synk): at production batch sizes add a leading 'parallel' grid axis
            #             over batch chunks so v7x's second TensorCore shares the work.
            grid=(1,),
            in_specs=[
                pl.BlockSpec((T * B * L, LANE), full2),
                pl.BlockSpec((LANE, C), full2),
                pl.BlockSpec((1, C), full2),
                pl.BlockSpec((T * B, T * B * L), full2),
                pl.BlockSpec((C, 3 * H), full2),
                pl.BlockSpec((2 * H, 9 * H), full2),
                pl.BlockSpec((1, 3 * H), full2),
                pl.BlockSpec((1, 9 * H), full2),
            ],
            out_specs=pl.BlockSpec((T, B, H), lambda i, lens: (0, 0, 0)),
            # TODO(synk): at production T*B store this scratch in bf16 and tile T via an
            #             'arbitrary' grid axis to stay inside v7x's 64 MiB VMEM.
            scratch_shapes=[pltpu.VMEM((T * B, 3 * H), jnp.float32)],
        ),
        compiler_params=pltpu.CompilerParams(dimension_semantics=("arbitrary",)),
    )(lengths_arr, patches, conv_w_p, conv_b2, mean_mat, wi0, w_big, bi0, b_big)

    # pad_packed_sequence(batch_first=True) -> (B, max(lengths), H); the tiny final
    # transpose/slice is plain XLA glue on a 2 KiB tensor.
    out = jnp.transpose(out_tbh, (1, 0, 2))                            # (B, T, H)
    t_max = int(max(lengths))   # requires concrete lengths, as pack_padded_sequence does
    return out[:, :t_max, :]


# ------------------------------------ demo ------------------------------------- #
if __name__ == "__main__":
    # module hyper-params (small but consistent with the forward pass)
    rate = 16
    feat_length = 16.0
    audio_feat_samples = int(rate * feat_length)   # 256
    enc_code_size = 32
    rnn_code_size = 32
    init_kernel = 16
    init_stride = 8
    batch, seq = 2, 8
    lengths = [8, 5]                               # sorted descending (pack_padded requirement)

    key = jax.random.PRNGKey(0)
    keys = jax.random.split(key, 12)
    x = jax.random.normal(keys[0], (batch, seq, audio_feat_samples), jnp.float32)

    # deterministic parameter init (uniform(-1/sqrt(fan), 1/sqrt(fan)), like torch)
    kc = 1.0 / (1 * init_kernel) ** 0.5
    conv_w = jax.random.uniform(keys[1], (init_kernel, enc_code_size), jnp.float32, -kc, kc)
    conv_b = jax.random.uniform(keys[2], (1, enc_code_size), jnp.float32, -kc, kc)

    kg = 1.0 / rnn_code_size ** 0.5
    u = lambda k, s: jax.random.uniform(k, s, jnp.float32, -kg, kg)
    H3 = 3 * rnn_code_size
    gru_params = {
        # gates packed along the last axis in torch's (r, z, n) order
        "wi0": u(keys[3], (enc_code_size, H3)),
        "wh0": u(keys[4], (rnn_code_size, H3)),
        "bi0": u(keys[5], (1, H3)),
        "bh0": u(keys[6], (1, H3)),
        "wi1": u(keys[7], (rnn_code_size, H3)),
        "wh1": u(keys[8], (rnn_code_size, H3)),
        "bi1": u(keys[9], (1, H3)),
        "bh1": u(keys[10], (1, H3)),
    }

    out = rnn_forward(x, lengths, conv_w, conv_b, gru_params,
                      init_kernel, init_stride, enc_code_size)
    jax.block_until_ready(out)
    assert out.shape == (batch, max(lengths), rnn_code_size)
    print("KERNEL_OK")
</pallas_src>

<mosaic_0001>
module attributes {stable_mosaic.version = 11 : i64} {
  func.func @rnn_fused_kernel(%arg0: i32, %arg1: memref<2xi32, #tpu.memory_space<smem>>, %arg2: memref<496x128xbf16, #tpu.memory_space<vmem>>, %arg3: memref<128x32xbf16, #tpu.memory_space<vmem>>, %arg4: memref<1x32xf32, #tpu.memory_space<vmem>>, %arg5: memref<16x496xbf16, #tpu.memory_space<vmem>>, %arg6: memref<32x96xbf16, #tpu.memory_space<vmem>>, %arg7: memref<64x288xbf16, #tpu.memory_space<vmem>>, %arg8: memref<1x96xf32, #tpu.memory_space<vmem>>, %arg9: memref<1x288xf32, #tpu.memory_space<vmem>>, %arg10: memref<8x2x32xf32, #tpu.memory_space<vmem>>, %arg11: memref<16x96xf32, #tpu.memory_space<vmem>>) attributes {dimension_semantics = [#tpu.dimension_semantics<arbitrary>], iteration_bounds = array<i64: 1>, scalar_prefetch = 1 : i64, scratch_operands = 1 : i64, tpu.core_type = #tpu.core_type<tc>, window_params = [{pipeline_mode = #tpu.pipeline_mode<synchronous>, transform_indices = @transform_0, window_bounds = array<i64: 496, 128>}, {pipeline_mode = #tpu.pipeline_mode<synchronous>, transform_indices = @transform_1, window_bounds = array<i64: 128, 32>}, {pipeline_mode = #tpu.pipeline_mode<synchronous>, transform_indices = @transform_2, window_bounds = array<i64: 1, 32>}, {pipeline_mode = #tpu.pipeline_mode<synchronous>, transform_indices = @transform_3, window_bounds = array<i64: 16, 496>}, {pipeline_mode = #tpu.pipeline_mode<synchronous>, transform_indices = @transform_4, window_bounds = array<i64: 32, 96>}, {pipeline_mode = #tpu.pipeline_mode<synchronous>, transform_indices = @transform_5, window_bounds = array<i64: 64, 288>}, {pipeline_mode = #tpu.pipeline_mode<synchronous>, transform_indices = @transform_6, window_bounds = array<i64: 1, 96>}, {pipeline_mode = #tpu.pipeline_mode<synchronous>, transform_indices = @transform_7, window_bounds = array<i64: 1, 288>}, {pipeline_mode = #tpu.pipeline_mode<synchronous>, transform_indices = @transform_8, window_bounds = array<i64: 8, 2, 32>}]} {
    %c0 = arith.constant 0 : index
    %c0_0 = arith.constant 0 : index
    %0 = vector.load %arg2[%c0, %c0_0] : memref<496x128xbf16, #tpu.memory_space<vmem>>, vector<496x128xbf16>
    %c0_1 = arith.constant 0 : index
    %c0_2 = arith.constant 0 : index
    %1 = vector.load %arg3[%c0_1, %c0_2] : memref<128x32xbf16, #tpu.memory_space<vmem>>, vector<128x32xbf16>
    %cst = arith.constant dense<0.000000e+00> : vector<496x32xf32>
    %2 = tpu.matmul %0, %1, %cst {dimension_numbers = #tpu.dot_dimension_numbers<[1], [0], [0], [1], [0, 0, 1, 1], [], []>} : vector<496x128xbf16>, vector<128x32xbf16>, vector<496x32xf32> -> vector<496x32xf32>
    %c0_3 = arith.constant 0 : index
    %c0_4 = arith.constant 0 : index
    %3 = vector.load %arg4[%c0_3, %c0_4] : memref<1x32xf32, #tpu.memory_space<vmem>>, vector<1x32xf32>
    %4 = vector.broadcast %3 : vector<1x32xf32> to vector<496x32xf32>
    %5 = arith.addf %2, %4 : vector<496x32xf32>
    %cst_5 = arith.constant 0.000000e+00 : f32
    %6 = vector.broadcast %cst_5 : f32 to vector<496x32xf32>
    %7 = arith.maximumf %5, %6 : vector<496x32xf32>
    %c0_6 = arith.constant 0 : index
    %c0_7 = arith.constant 0 : index
    %8 = vector.load %arg5[%c0_6, %c0_7] : memref<16x496xbf16, #tpu.memory_space<vmem>>, vector<16x496xbf16>
    %9 = arith.truncf %7 : vector<496x32xf32> to vector<496x32xbf16>
    %cst_8 = arith.constant dense<0.000000e+00> : vector<16x32xf32>
    %10 = tpu.matmul %8, %9, %cst_8 {dimension_numbers = #tpu.dot_dimension_numbers<[1], [0], [0], [1], [0, 0, 1, 1], [], []>} : vector<16x496xbf16>, vector<496x32xbf16>, vector<16x32xf32> -> vector<16x32xf32>
    %11 = arith.truncf %10 : vector<16x32xf32> to vector<16x32xbf16>
    %c0_9 = arith.constant 0 : index
    %c0_10 = arith.constant 0 : index
    %12 = vector.load %arg6[%c0_9, %c0_10] : memref<32x96xbf16, #tpu.memory_space<vmem>>, vector<32x96xbf16>
    %cst_11 = arith.constant dense<0.000000e+00> : vector<16x96xf32>
    %13 = tpu.matmul %11, %12, %cst_11 {dimension_numbers = #tpu.dot_dimension_numbers<[1], [0], [0], [1], [0, 0, 1, 1], [], []>} : vector<16x32xbf16>, vector<32x96xbf16>, vector<16x96xf32> -> vector<16x96xf32>
    %c0_12 = arith.constant 0 : index
    %c0_13 = arith.constant 0 : index
    %14 = vector.load %arg8[%c0_12, %c0_13] : memref<1x96xf32, #tpu.memory_space<vmem>>, vector<1x96xf32>
    %15 = vector.broadcast %14 : vector<1x96xf32> to vector<16x96xf32>
    %16 = arith.addf %13, %15 : vector<16x96xf32>
    %c0_14 = arith.constant 0 : index
    %c0_15 = arith.constant 0 : index
    %17 = vector.load %arg11[%c0_14, %c0_15] : memref<16x96xf32, #tpu.memory_space<vmem>>, vector<16x96xf32>
    tpu.vector_store %arg11[%c0_14, %c0_15], %16 {strides = array<i32>} : memref<16x96xf32, #tpu.memory_space<vmem>>, vector<16x96xf32>,
    %c0_16 = arith.constant 0 : index
    %c0_17 = arith.constant 0 : index
    %18 = vector.load %arg7[%c0_16, %c0_17] : memref<64x288xbf16, #tpu.memory_space<vmem>>, vector<64x288xbf16>
    %c0_18 = arith.constant 0 : index
    %c0_19 = arith.constant 0 : index
    %19 = vector.load %arg9[%c0_18, %c0_19] : memref<1x288xf32, #tpu.memory_space<vmem>>, vector<1x288xf32>
    %20 = vector.shape_cast %19 : vector<1x288xf32> to vector<1x288xf32>
    %21 = vector.broadcast %20 : vector<1x288xf32> to vector<2x288xf32>
    %c0_i32 = arith.constant 0 : i32
    %22 = vector.broadcast %c0_i32 : i32 to vector<1x1xi32>
    %c0_20 = arith.constant 0 : index
    %23 = memref.load %arg1[%c0_20] : memref<2xi32, #tpu.memory_space<smem>>
    %24 = vector.broadcast %23 : i32 to vector<1x1xi32>
    %25 = arith.addi %22, %24 : vector<1x1xi32>
    %c0_i32_21 = arith.constant 0 : i32
    %26 = vector.broadcast %c0_i32_21 : i32 to vector<1x1xi32>
    %c1 = arith.constant 1 : index
    %27 = memref.load %arg1[%c1] : memref<2xi32, #tpu.memory_space<smem>>
    %28 = vector.broadcast %27 : i32 to vector<1x1xi32>
    %29 = arith.addi %26, %28 : vector<1x1xi32>
    %30 = tpu.concatenate %25, %29 in 0 : vector<1x1xi32>, vector<1x1xi32> -> vector<2x1xi32>
    %cst_22 = arith.constant 0.000000e+00 : f32
    %31 = vector.broadcast %cst_22 : f32 to vector<2x32xf32>
    %c0_23 = arith.constant 0 : index
    %c0_24 = arith.constant 0 : index
    %32 = vector.load %arg11[%c0_23, %c0_24] : memref<16x96xf32, #tpu.memory_space<vmem>>, vector<2x96xf32>
    %33 = vector.extract_strided_slice %21 {offsets = [0, 0], sizes = [2, 96], strides = [1, 1]} : vector<2x288xf32> to vector<2x96xf32>
    %34 = vector.extract_strided_slice %32 {offsets = [0, 0], sizes = [2, 32], strides = [1, 1]} : vector<2x96xf32> to vector<2x32xf32>
    %35 = vector.extract_strided_slice %33 {offsets = [0, 0], sizes = [2, 32], strides = [1, 1]} : vector<2x96xf32> to vector<2x32xf32>
    %36 = arith.addf %34, %35 : vector<2x32xf32>
    %37 = arith.negf %36 : vector<2x32xf32>
    %38 = math.exp %37 : vector<2x32xf32>
    %cst_25 = arith.constant 1.000000e+00 : f32
    %39 = vector.broadcast %cst_25 : f32 to vector<2x32xf32>
    %40 = arith.addf %39, %38 : vector<2x32xf32>
    %41 = arith.divf %39, %40 : vector<2x32xf32>
    %42 = vector.extract_strided_slice %32 {offsets = [0, 32], sizes = [2, 32], strides = [1, 1]} : vector<2x96xf32> to vector<2x32xf32>
    %43 = vector.extract_strided_slice %33 {offsets = [0, 32], sizes = [2, 32], strides = [1, 1]} : vector<2x96xf32> to vector<2x32xf32>
    %44 = arith.addf %42, %43 : vector<2x32xf32>
    %45 = arith.negf %44 : vector<2x32xf32>
    %46 = math.exp %45 : vector<2x32xf32>
    %cst_26 = arith.constant 1.000000e+00 : f32
    %47 = vector.broadcast %cst_26 : f32 to vector<2x32xf32>
    %48 = arith.addf %47, %46 : vector<2x32xf32>
    %49 = arith.divf %47, %48 : vector<2x32xf32>
    %50 = vector.extract_strided_slice %32 {offsets = [0, 64], sizes = [2, 32], strides = [1, 1]} : vector<2x96xf32> to vector<2x32xf32>
    %51 = vector.extract_strided_slice %33 {offsets = [0, 64], sizes = [2, 32], strides = [1, 1]} : vector<2x96xf32> to vector<2x32xf32>
    %52 = arith.mulf %41, %51 : vector<2x32xf32>
    %53 = arith.addf %50, %52 : vector<2x32xf32>
    %54 = math.tanh %53 : vector<2x32xf32>
    %cst_27 = arith.constant 1.000000e+00 : f32
    %55 = vector.broadcast %cst_27 : f32 to vector<2x32xf32>
    %56 = arith.subf %55, %49 : vector<2x32xf32>
    %57 = arith.mulf %56, %54 : vector<2x32xf32>
    %58 = arith.mulf %49, %31 : vector<2x32xf32>
    %59 = arith.addf %57, %58 : vector<2x32xf32>
    %c1_i32 = arith.constant 1 : i32
    %60 = tpu.concatenate %59, %31 in 1 : vector<2x32xf32>, vector<2x32xf32> -> vector<2x64xf32>
    %61 = arith.truncf %60 : vector<2x64xf32> to vector<2x64xbf16>
    %cst_28 = arith.constant dense<0.000000e+00> : vector<2x288xf32>
    %62 = tpu.matmul %61, %18, %cst_28 {dimension_numbers = #tpu.dot_dimension_numbers<[1], [0], [0], [1], [0, 0, 1, 1], [], []>} : vector<2x64xbf16>, vector<64x288xbf16>, vector<2x288xf32> -> vector<2x288xf32>
    %63 = arith.addf %62, %21 : vector<2x288xf32>
    %64 = vector.extract_strided_slice %63 {offsets = [0, 0], sizes = [2, 96], strides = [1, 1]} : vector<2x288xf32> to vector<2x96xf32>
    %65 = vector.extract_strided_slice %63 {offsets = [0, 96], sizes = [2, 96], strides = [1, 1]} : vector<2x288xf32> to vector<2x96xf32>
    %66 = vector.extract_strided_slice %63 {offsets = [0, 192], sizes = [2, 96], strides = [1, 1]} : vector<2x288xf32> to vector<2x96xf32>
    %67 = vector.extract_strided_slice %65 {offsets = [0, 0], sizes = [2, 32], strides = [1, 1]} : vector<2x96xf32> to vector<2x32xf32>
    %68 = vector.extract_strided_slice %66 {offsets = [0, 0], sizes = [2, 32], strides = [1, 1]} : vector<2x96xf32> to vector<2x32xf32>
    %69 = arith.addf %67, %68 : vector<2x32xf32>
    %70 = arith.negf %69 : vector<2x32xf32>
    %71 = math.exp %70 : vector<2x32xf32>
    %cst_29 = arith.constant 1.000000e+00 : f32
    %72 = vector.broadcast %cst_29 : f32 to vector<2x32xf32>
    %73 = arith.addf %72, %71 : vector<2x32xf32>
    %74 = arith.divf %72, %73 : vector<2x32xf32>
    %75 = vector.extract_strided_slice %65 {offsets = [0, 32], sizes = [2, 32], strides = [1, 1]} : vector<2x96xf32> to vector<2x32xf32>
    %76 = vector.extract_strided_slice %66 {offsets = [0, 32], sizes = [2, 32], strides = [1, 1]} : vector<2x96xf32> to vector<2x32xf32>
    %77 = arith.addf %75, %76 : vector<2x32xf32>
    %78 = arith.negf %77 : vector<2x32xf32>
    %79 = math.exp %78 : vector<2x32xf32>
    %cst_30 = arith.constant 1.000000e+00 : f32
    %80 = vector.broadcast %cst_30 : f32 to vector<2x32xf32>
    %81 = arith.addf %80, %79 : vector<2x32xf32>
    %82 = arith.divf %80, %81 : vector<2x32xf32>
    %83 = vector.extract_strided_slice %65 {offsets = [0, 64], sizes = [2, 32], strides = [1, 1]} : vector<2x96xf32> to vector<2x32xf32>
    %84 = vector.extract_strided_slice %66 {offsets = [0, 64], sizes = [2, 32], strides = [1, 1]} : vector<2x96xf32> to vector<2x32xf32>
    %85 = arith.mulf %74, %84 : vector<2x32xf32>
    %86 = arith.addf %83, %85 : vector<2x32xf32>
    %87 = math.tanh %86 : vector<2x32xf32>
    %cst_31 = arith.constant 1.000000e+00 : f32
    %88 = vector.broadcast %cst_31 : f32 to vector<2x32xf32>
    %89 = arith.subf %88, %82 : vector<2x32xf32>
    %90 = arith.mulf %89, %87 : vector<2x32xf32>
    %91 = arith.mulf %82, %31 : vector<2x32xf32>
    %92 = arith.addf %90, %91 : vector<2x32xf32>
    %c1_i32_32 = arith.constant 1 : i32
    %93 = arith.subi %c1_i32, %c1_i32_32 : i32
    %94 = vector.broadcast %93 : i32 to vector<2x1xi32>
    %95 = arith.cmpi slt, %94, %30 : vector<2x1xi32>
    %96 = arith.extui %95 : vector<2x1xi1> to vector<2x1xi32>
    %97 = arith.sitofp %96 : vector<2x1xi32> to vector<2x1xf32>
    %98 = vector.broadcast %97 : vector<2x1xf32> to vector<2x32xf32>
    %99 = arith.mulf %92, %98 : vector<2x32xf32>
    %100 = arith.index_cast %93 : i32 to index
    %c0_33 = arith.constant 0 : index
    %c0_34 = arith.constant 0 : index
    %101 = vector.load %arg10[%100, %c0_33, %c0_34] : memref<8x2x32xf32, #tpu.memory_space<vmem>>, vector<1x2x32xf32>
    %102 = vector.shape_cast %101 : vector<1x2x32xf32> to vector<2x32xf32>
    %103 = vector.shape_cast %99 : vector<2x32xf32> to vector<1x2x32xf32>
    tpu.vector_store %arg10[%100, %c0_33, %c0_34], %103 {strides = array<i32>} : memref<8x2x32xf32, #tpu.memory_space<vmem>>, vector<1x2x32xf32>,
    %c2_i32 = arith.constant 2 : i32
    %104 = arith.muli %c1_i32, %c2_i32 : i32
    %105 = arith.index_cast %104 : i32 to index
    %c0_35 = arith.constant 0 : index
    %106 = vector.load %arg11[%105, %c0_35] : memref<16x96xf32, #tpu.memory_space<vmem>>, vector<2x96xf32>
    %107 = vector.extract_strided_slice %106 {offsets = [0, 0], sizes = [2, 32], strides = [1, 1]} : vector<2x96xf32> to vector<2x32xf32>
    %108 = vector.extract_strided_slice %64 {offsets = [0, 0], sizes = [2, 32], strides = [1, 1]} : vector<2x96xf32> to vector<2x32xf32>
    %109 = arith.addf %107, %108 : vector<2x32xf32>
    %110 = arith.negf %109 : vector<2x32xf32>
    %111 = math.exp %110 : vector<2x32xf32>
    %cst_36 = arith.constant 1.000000e+00 : f32
    %112 = vector.broadcast %cst_36 : f32 to vector<2x32xf32>
    %113 = arith.addf %112, %111 : vector<2x32xf32>
    %114 = arith.divf %112, %113 : vector<2x32xf32>
    %115 = vector.extract_strided_slice %106 {offsets = [0, 32], sizes = [2, 32], strides = [1, 1]} : vector<2x96xf32> to vector<2x32xf32>
    %116 = vector.extract_strided_slice %64 {offsets = [0, 32], sizes = [2, 32], strides = [1, 1]} : vector<2x96xf32> to vector<2x32xf32>
    %117 = arith.addf %115, %116 : vector<2x32xf32>
    %118 = arith.negf %117 : vector<2x32xf32>
    %119 = math.exp %118 : vector<2x32xf32>
    %cst_37 = arith.constant 1.000000e+00 : f32
    %120 = vector.broadcast %cst_37 : f32 to vector<2x32xf32>
    %121 = arith.addf %120, %119 : vector<2x32xf32>
    %122 = arith.divf %120, %121 : vector<2x32xf32>
    %123 = vector.extract_strided_slice %106 {offsets = [0, 64], sizes = [2, 32], strides = [1, 1]} : vector<2x96xf32> to vector<2x32xf32>
    %124 = vector.extract_strided_slice %64 {offsets = [0, 64], sizes = [2, 32], strides = [1, 1]} : vector<2x96xf32> to vector<2x32xf32>
    %125 = arith.mulf %114, %124 : vector<2x32xf32>
    %126 = arith.addf %123, %125 : vector<2x32xf32>
    %127 = math.tanh %126 : vector<2x32xf32>
    %cst_38 = arith.constant 1.000000e+00 : f32
    %128 = vector.broadcast %cst_38 : f32 to vector<2x32xf32>
    %129 = arith.subf %128, %122 : vector<2x32xf32>
    %130 = arith.mulf %129, %127 : vector<2x32xf32>
    %131 = arith.mulf %122, %59 : vector<2x32xf32>
    %132 = arith.addf %130, %131 : vector<2x32xf32>
    %c2_i32_39 = arith.constant 2 : i32
    %133 = tpu.concatenate %132, %92 in 1 : vector<2x32xf32>, vector<2x32xf32> -> vector<2x64xf32>
    %134 = arith.truncf %133 : vector<2x64xf32> to vector<2x64xbf16>
    %cst_40 = arith.constant dense<0.000000e+00> : vector<2x288xf32>
    %135 = tpu.matmul %134, %18, %cst_40 {dimension_numbers = #tpu.dot_dimension_numbers<[1], [0], [0], [1], [0, 0, 1, 1], [], []>} : vector<2x64xbf16>, vector<64x288xbf16>, vector<2x288xf32> -> vector<2x288xf32>
    %136 = arith.addf %135, %21 : vector<2x288xf32>
    %137 = vector.extract_strided_slice %136 {offsets = [0, 0], sizes = [2, 96], strides = [1, 1]} : vector<2x288xf32> to vector<2x96xf32>
    %138 = vector.extract_strided_slice %136 {offsets = [0, 96], sizes = [2, 96], strides = [1, 1]} : vector<2x288xf32> to vector<2x96xf32>
    %139 = vector.extract_strided_slice %136 {offsets = [0, 192], sizes = [2, 96], strides = [1, 1]} : vector<2x288xf32> to vector<2x96xf32>
    %140 = vector.extract_strided_slice %138 {offsets = [0, 0], sizes = [2, 32], strides = [1, 1]} : vector<2x96xf32> to vector<2x32xf32>
    %141 = vector.extract_strided_slice %139 {offsets = [0, 0], sizes = [2, 32], strides = [1, 1]} : vector<2x96xf32> to vector<2x32xf32>
    %142 = arith.addf %140, %141 : vector<2x32xf32>
    %143 = arith.negf %142 : vector<2x32xf32>
    %144 = math.exp %143 : vector<2x32xf32>
    %cst_41 = arith.constant 1.000000e+00 : f32
    %145 = vector.broadcast %cst_41 : f32 to vector<2x32xf32>
    %146 = arith.addf %145, %144 : vector<2x32xf32>
    %147 = arith.divf %145, %146 : vector<2x32xf32>
    %148 = vector.extract_strided_slice %138 {offsets = [0, 32], sizes = [2, 32], strides = [1, 1]} : vector<2x96xf32> to vector<2x32xf32>
    %149 = vector.extract_strided_slice %139 {offsets = [0, 32], sizes = [2, 32], strides = [1, 1]} : vector<2x96xf32> to vector<2x32xf32>
    %150 = arith.addf %148, %149 : vector<2x32xf32>
    %151 = arith.negf %150 : vector<2x32xf32>
    %152 = math.exp %151 : vector<2x32xf32>
    %cst_42 = arith.constant 1.000000e+00 : f32
    %153 = vector.broadcast %cst_42 : f32 to vector<2x32xf32>
    %154 = arith.addf %153, %152 : vector<2x32xf32>
    %155 = arith.divf %153, %154 : vector<2x32xf32>
    %156 = vector.extract_strided_slice %138 {offsets = [0, 64], sizes = [2, 32], strides = [1, 1]} : vector<2x96xf32> to vector<2x32xf32>
    %157 = vector.extract_strided_slice %139 {offsets = [0, 64], sizes = [2, 32], strides = [1, 1]} : vector<2x96xf32> to vector<2x32xf32>
    %158 = arith.mulf %147, %157 : vector<2x32xf32>
    %159 = arith.addf %156, %158 : vector<2x32xf32>
    %160 = math.tanh %159 : vector<2x32xf32>
    %cst_43 = arith.constant 1.000000e+00 : f32
    %161 = vector.broadcast %cst_43 : f32 to vector<2x32xf32>
    %162 = arith.subf %161, %155 : vector<2x32xf32>
    %163 = arith.mulf %162, %160 : vector<2x32xf32>
    %164 = arith.mulf %155, %92 : vector<2x32xf32>
    %165 = arith.addf %163, %164 : vector<2x32xf32>
    %c1_i32_44 = arith.constant 1 : i32
    %166 = arith.subi %c2_i32_39, %c1_i32_44 : i32
    %167 = vector.broadcast %166 : i32 to vector<2x1xi32>
    %168 = arith.cmpi slt, %167, %30 : vector<2x1xi32>
    %169 = arith.extui %168 : vector<2x1xi1> to vector<2x1xi32>
    %170 = arith.sitofp %169 : vector<2x1xi32> to vector<2x1xf32>
    %171 = vector.broadcast %170 : vector<2x1xf32> to vector<2x32xf32>
    %172 = arith.mulf %165, %171 : vector<2x32xf32>
    %173 = arith.index_cast %166 : i32 to index
    %c0_45 = arith.constant 0 : index
    %c0_46 = arith.constant 0 : index
    %174 = vector.load %arg10[%173, %c0_45, %c0_46] : memref<8x2x32xf32, #tpu.memory_space<vmem>>, vector<1x2x32xf32>
    %175 = vector.shape_cast %174 : vector<1x2x32xf32> to vector<2x32xf32>
    %176 = vector.shape_cast %172 : vector<2x32xf32> to vector<1x2x32xf32>
    tpu.vector_store %arg10[%173, %c0_45, %c0_46], %176 {strides = array<i32>} : memref<8x2x32xf32, #tpu.memory_space<vmem>>, vector<1x2x32xf32>,
    %c2_i32_47 = arith.constant 2 : i32
    %177 = arith.muli %c2_i32_39, %c2_i32_47 : i32
    %178 = arith.index_cast %177 : i32 to index
    %c0_48 = arith.constant 0 : index
    %179 = vector.load %arg11[%178, %c0_48] : memref<16x96xf32, #tpu.memory_space<vmem>>, vector<2x96xf32>
    %180 = vector.extract_strided_slice %179 {offsets = [0, 0], sizes = [2, 32], strides = [1, 1]} : vector<2x96xf32> to vector<2x32xf32>
    %181 = vector.extract_strided_slice %137 {offsets = [0, 0], sizes = [2, 32], strides = [1, 1]} : vector<2x96xf32> to vector<2x32xf32>
    %182 = arith.addf %180, %181 : vector<2x32xf32>
    %183 = arith.negf %182 : vector<2x32xf32>
    %184 = math.exp %183 : vector<2x32xf32>
    %cst_49 = arith.constant 1.000000e+00 : f32
    %185 = vector.broadcast %cst_49 : f32 to vector<2x32xf32>
    %186 = arith.addf %185, %184 : vector<2x32xf32>
    %187 = arith.divf %185, %186 : vector<2x32xf32>
    %188 = vector.extract_strided_slice %179 {offsets = [0, 32], sizes = [2, 32], strides = [1, 1]} : vector<2x96xf32> to vector<2x32xf32>
    %189 = vector.extract_strided_slice %137 {offsets = [0, 32], sizes = [2, 32], strides = [1, 1]} : vector<2x96xf32> to vector<2x32xf32>
    %190 = arith.addf %188, %189 : vector<2x32xf32>
    %191 = arith.negf %190 : vector<2x32xf32>
    %192 = math.exp %191 : vector<2x32xf32>
    %cst_50 = arith.constant 1.000000e+00 : f32
    %193 = vector.broadcast %cst_50 : f32 to vector<2x32xf32>
    %194 = arith.addf %193, %192 : vector<2x32xf32>
    %195 = arith.divf %193, %194 : vector<2x32xf32>
    %196 = vector.extract_strided_slice %179 {offsets = [0, 64], sizes = [2, 32], strides = [1, 1]} : vector<2x96xf32> to vector<2x32xf32>
    %197 = vector.extract_strided_slice %137 {offsets = [0, 64], sizes = [2, 32], strides = [1, 1]} : vector<2x96xf32> to vector<2x32xf32>
    %198 = arith.mulf %187, %197 : vector<2x32xf32>
    %199 = arith.addf %196, %198 : vector<2x32xf32>
    %200 = math.tanh %199 : vector<2x32xf32>
    %cst_51 = arith.constant 1.000000e+00 : f32
    %201 = vector.broadcast %cst_51 : f32 to vector<2x32xf32>
    %202 = arith.subf %201, %195 : vector<2x32xf32>
    %203 = arith.mulf %202, %200 : vector<2x32xf32>
    %204 = arith.mulf %195, %132 : vector<2x32xf32>
    %205 = arith.addf %203, %204 : vector<2x32xf32>
    %c3_i32 = arith.constant 3 : i32
    %206 = tpu.concatenate %205, %165 in 1 : vector<2x32xf32>, vector<2x32xf32> -> vector<2x64xf32>
    %207 = arith.truncf %206 : vector<2x64xf32> to vector<2x64xbf16>
    %cst_52 = arith.constant dense<0.000000e+00> : vector<2x288xf32>
    %208 = tpu.matmul %207, %18, %cst_52 {dimension_numbers = #tpu.dot_dimension_numbers<[1], [0], [0], [1], [0, 0, 1, 1], [], []>} : vector<2x64xbf16>, vector<64x288xbf16>, vector<2x288xf32> -> vector<2x288xf32>
    %209 = arith.addf %208, %21 : vector<2x288xf32>
    %210 = vector.extract_strided_slice %209 {offsets = [0, 0], sizes = [2, 96], strides = [1, 1]} : vector<2x288xf32> to vector<2x96xf32>
    %211 = vector.extract_strided_slice %209 {offsets = [0, 96], sizes = [2, 96], strides = [1, 1]} : vector<2x288xf32> to vector<2x96xf32>
    %212 = vector.extract_strided_slice %209 {offsets = [0, 192], sizes = [2, 96], strides = [1, 1]} : vector<2x288xf32> to vector<2x96xf32>
    %213 = vector.extract_strided_slice %211 {offsets = [0, 0], sizes = [2, 32], strides = [1, 1]} : vector<2x96xf32> to vector<2x32xf32>
    %214 = vector.extract_strided_slice %212 {offsets = [0, 0], sizes = [2, 32], strides = [1, 1]} : vector<2x96xf32> to vector<2x32xf32>
    %215 = arith.addf %213, %214 : vector<2x32xf32>
    %216 = arith.negf %215 : vector<2x32xf32>
    %217 = math.exp %216 : vector<2x32xf32>
    %cst_53 = arith.constant 1.000000e+00 : f32
    %218 = vector.broadcast %cst_53 : f32 to vector<2x32xf32>
    %219 = arith.addf %218, %217 : vector<2x32xf32>
    %220 = arith.divf %218, %219 : vector<2x32xf32>
    %221 = vector.extract_strided_slice %211 {offsets = [0, 32], sizes = [2, 32], strides = [1, 1]} : vector<2x96xf32> to vector<2x32xf32>
    %222 = vector.extract_strided_slice %212 {offsets = [0, 32], sizes = [2, 32], strides = [1, 1]} : vector<2x96xf32> to vector<2x32xf32>
    %223 = arith.addf %221, %222 : vector<2x32xf32>
    %224 = arith.negf %223 : vector<2x32xf32>
    %225 = math.exp %224 : vector<2x32xf32>
    %cst_54 = arith.constant 1.000000e+00 : f32
    %226 = vector.broadcast %cst_54 : f32 to vector<2x32xf32>
    %227 = arith.addf %226, %225 : vector<2x32xf32>
    %228 = arith.divf %226, %227 : vector<2x32xf32>
    %229 = vector.extract_strided_slice %211 {offsets = [0, 64], sizes = [2, 32], strides = [1, 1]} : vector<2x96xf32> to vector<2x32xf32>
    %230 = vector.extract_strided_slice %212 {offsets = [0, 64], sizes = [2, 32], strides = [1, 1]} : vector<2x96xf32> to vector<2x32xf32>
    %231 = arith.mulf %220, %230 : vector<2x32xf32>
    %232 = arith.addf %229, %231 : vector<2x32xf32>
    %233 = math.tanh %232 : vector<2x32xf32>
    %cst_55 = arith.constant 1.000000e+00 : f32
    %234 = vector.broadcast %cst_55 : f32 to vector<2x32xf32>
    %235 = arith.subf %234, %228 : vector<2x32xf32>
    %236 = arith.mulf %235, %233 : vector<2x32xf32>
    %237 = arith.mulf %228, %165 : vector<2x32xf32>
    %238 = arith.addf %236, %237 : vector<2x32xf32>
    %c1_i32_56 = arith.constant 1 : i32
    %239 = arith.subi %c3_i32, %c1_i32_56 : i32
    %240 = vector.broadcast %239 : i32 to vector<2x1xi32>
    %241 = arith.cmpi slt, %240, %30 : vector<2x1xi32>
    %242 = arith.extui %241 : vector<2x1xi1> to vector<2x1xi32>
    %243 = arith.sitofp %242 : vector<2x1xi32> to vector<2x1xf32>
    %244 = vector.broadcast %243 : vector<2x1xf32> to vector<2x32xf32>
    %245 = arith.mulf %238, %244 : vector<2x32xf32>
    %246 = arith.index_cast %239 : i32 to index
    %c0_57 = arith.constant 0 : index
    %c0_58 = arith.constant 0 : index
    %247 = vector.load %arg10[%246, %c0_57, %c0_58] : memref<8x2x32xf32, #tpu.memory_space<vmem>>, vector<1x2x32xf32>
    %248 = vector.shape_cast %247 : vector<1x2x32xf32> to vector<2x32xf32>
    %249 = vector.shape_cast %245 : vector<2x32xf32> to vector<1x2x32xf32>
    tpu.vector_store %arg10[%246, %c0_57, %c0_58], %249 {strides = array<i32>} : memref<8x2x32xf32, #tpu.memory_space<vmem>>, vector<1x2x32xf32>,
    %c2_i32_59 = arith.constant 2 : i32
    %250 = arith.muli %c3_i32, %c2_i32_59 : i32
    %251 = arith.index_cast %250 : i32 to index
    %c0_60 = arith.constant 0 : index
    %252 = vector.load %arg11[%251, %c0_60] : memref<16x96xf32, #tpu.memory_space<vmem>>, vector<2x96xf32>
    %253 = vector.extract_strided_slice %252 {offsets = [0, 0], sizes = [2, 32], strides = [1, 1]} : vector<2x96xf32> to vector<2x32xf32>
    %254 = vector.extract_strided_slice %210 {offsets = [0, 0], sizes = [2, 32], strides = [1, 1]} : vector<2x96xf32> to vector<2x32xf32>
    %255 = arith.addf %253, %254 : vector<2x32xf32>
    %256 = arith.negf %255 : vector<2x32xf32>
    %257 = math.exp %256 : vector<2x32xf32>
    %cst_61 = arith.constant 1.000000e+00 : f32
    %258 = vector.broadcast %cst_61 : f32 to vector<2x32xf32>
    %259 = arith.addf %258, %257 : vector<2x32xf32>
    %260 = arith.divf %258, %259 : vector<2x32xf32>
    %261 = vector.extract_strided_slice %252 {offsets = [0, 32], sizes = [2, 32], strides = [1, 1]} : vector<2x96xf32> to vector<2x32xf32>
    %262 = vector.extract_strided_slice %210 {offsets = [0, 32], sizes = [2, 32], strides = [1, 1]} : vector<2x96xf32> to vector<2x32xf32>
    %263 = arith.addf %261, %262 : vector<2x32xf32>
    %264 = arith.negf %263 : vector<2x32xf32>
    %265 = math.exp %264 : vector<2x32xf32>
    %cst_62 = arith.constant 1.000000e+00 : f32
    %266 = vector.broadcast %cst_62 : f32 to vector<2x32xf32>
    %267 = arith.addf %266, %265 : vector<2x32xf32>
    %268 = arith.divf %266, %267 : vector<2x32xf32>
    %269 = vector.extract_strided_slice %252 {offsets = [0, 64], sizes = [2, 32], strides = [1, 1]} : vector<2x96xf32> to vector<2x32xf32>
    %270 = vector.extract_strided_slice %210 {offsets = [0, 64], sizes = [2, 32], strides = [1, 1]} : vector<2x96xf32> to vector<2x32xf32>
    %271 = arith.mulf %260, %270 : vector<2x32xf32>
    %272 = arith.addf %269, %271 : vector<2x32xf32>
    %273 = math.tanh %272 : vector<2x32xf32>
    %cst_63 = arith.constant 1.000000e+00 : f32
    %274 = vector.broadcast %cst_63 : f32 to vector<2x32xf32>
    %275 = arith.subf %274, %268 : vector<2x32xf32>
    %276 = arith.mulf %275, %273 : vector<2x32xf32>
    %277 = arith.mulf %268, %205 : vector<2x32xf32>
    %278 = arith.addf %276, %277 : vector<2x32xf32>
    %c4_i32 = arith.constant 4 : i32
    %279 = tpu.concatenate %278, %238 in 1 : vector<2x32xf32>, vector<2x32xf32> -> vector<2x64xf32>
    %280 = arith.truncf %279 : vector<2x64xf32> to vector<2x64xbf16>
    %cst_64 = arith.constant dense<0.000000e+00> : vector<2x288xf32>
    %281 = tpu.matmul %280, %18, %cst_64 {dimension_numbers = #tpu.dot_dimension_numbers<[1], [0], [0], [1], [0, 0, 1, 1], [], []>} : vector<2x64xbf16>, vector<64x288xbf16>, vector<2x288xf32> -> vector<2x288xf32>
    %282 = arith.addf %281, %21 : vector<2x288xf32>
    %283 = vector.extract_strided_slice %282 {offsets = [0, 0], sizes = [2, 96], strides = [1, 1]} : vector<2x288xf32> to vector<2x96xf32>
    %284 = vector.extract_strided_slice %282 {offsets = [0, 96], sizes = [2, 96], strides = [1, 1]} : vector<2x288xf32> to vector<2x96xf32>
    %285 = vector.extract_strided_slice %282 {offsets = [0, 192], sizes = [2, 96], strides = [1, 1]} : vector<2x288xf32> to vector<2x96xf32>
    %286 = vector.extract_strided_slice %284 {offsets = [0, 0], sizes = [2, 32], strides = [1, 1]} : vector<2x96xf32> to vector<2x32xf32>
    %287 = vector.extract_strided_slice %285 {offsets = [0, 0], sizes = [2, 32], strides = [1, 1]} : vector<2x96xf32> to vector<2x32xf32>
    %288 = arith.addf %286, %287 : vector<2x32xf32>
    %289 = arith.negf %288 : vector<2x32xf32>
    %290 = math.exp %289 : vector<2x32xf32>
    %cst_65 = arith.constant 1.000000e+00 : f32
    %291 = vector.broadcast %cst_65 : f32 to vector<2x32xf32>
    %292 = arith.addf %291, %290 : vector<2x32xf32>
    %293 = arith.divf %291, %292 : vector<2x32xf32>
    %294 = vector.extract_strided_slice %284 {offsets = [0, 32], sizes = [2, 32], strides = [1, 1]} : vector<2x96xf32> to vector<2x32xf32>
    %295 = vector.extract_strided_slice %285 {offsets = [0, 32], sizes = [2, 32], strides = [1, 1]} : vector<2x96xf32> to vector<2x32xf32>
    %296 = arith.addf %294, %295 : vector<2x32xf32>
    %297 = arith.negf %296 : vector<2x32xf32>
    %298 = math.exp %297 : vector<2x32xf32>
    %cst_66 = arith.constant 1.000000e+00 : f32
    %299 = vector.broadcast %cst_66 : f32 to vector<2x32xf32>
    %300 = arith.addf %299, %298 : vector<2x32xf32>
    %301 = arith.divf %299, %300 : vector<2x32xf32>
    %302 = vector.extract_strided_slice %284 {offsets = [0, 64], sizes = [2, 32], strides = [1, 1]} : vector<2x96xf32> to vector<2x32xf32>
    %303 = vector.extract_strided_slice %285 {offsets = [0, 64], sizes = [2, 32], strides = [1, 1]} : vector<2x96xf32> to vector<2x32xf32>
    %304 = arith.mulf %293, %303 : vector<2x32xf32>
    %305 = arith.addf %302, %304 : vector<2x32xf32>
    %306 = math.tanh %305 : vector<2x32xf32>
    %cst_67 = arith.constant 1.000000e+00 : f32
    %307 = vector.broadcast %cst_67 : f32 to vector<2x32xf32>
    %308 = arith.subf %307, %301 : vector<2x32xf32>
    %309 = arith.mulf %308, %306 : vector<2x32xf32>
    %310 = arith.mulf %301, %238 : vector<2x32xf32>
    %311 = arith.addf %309, %310 : vector<2x32xf32>
    %c1_i32_68 = arith.constant 1 : i32
    %312 = arith.subi %c4_i32, %c1_i32_68 : i32
    %313 = vector.broadcast %312 : i32 to vector<2x1xi32>
    %314 = arith.cmpi slt, %313, %30 : vector<2x1xi32>
    %315 = arith.extui %314 : vector<2x1xi1> to vector<2x1xi32>
    %316 = arith.sitofp %315 : vector<2x1xi32> to vector<2x1xf32>
    %317 = vector.broadcast %316 : vector<2x1xf32> to vector<2x32xf32>
    %318 = arith.mulf %311, %317 : vector<2x32xf32>
    %319 = arith.index_cast %312 : i32 to index
    %c0_69 = arith.constant 0 : index
    %c0_70 = arith.constant 0 : index
    %320 = vector.load %arg10[%319, %c0_69, %c0_70] : memref<8x2x32xf32, #tpu.memory_space<vmem>>, vector<1x2x32xf32>
    %321 = vector.shape_cast %320 : vector<1x2x32xf32> to vector<2x32xf32>
    %322 = vector.shape_cast %318 : vector<2x32xf32> to vector<1x2x32xf32>
    tpu.vector_store %arg10[%319, %c0_69, %c0_70], %322 {strides = array<i32>} : memref<8x2x32xf32, #tpu.memory_space<vmem>>, vector<1x2x32xf32>,
    %c2_i32_71 = arith.constant 2 : i32
    %323 = arith.muli %c4_i32, %c2_i32_71 : i32
    %324 = arith.index_cast %323 : i32 to index
    %c0_72 = arith.constant 0 : index
    %325 = vector.load %arg11[%324, %c0_72] : memref<16x96xf32, #tpu.memory_space<vmem>>, vector<2x96xf32>
    %326 = vector.extract_strided_slice %325 {offsets = [0, 0], sizes = [2, 32], strides = [1, 1]} : vector<2x96xf32> to vector<2x32xf32>
    %327 = vector.extract_strided_slice %283 {offsets = [0, 0], sizes = [2, 32], strides = [1, 1]} : vector<2x96xf32> to vector<2x32xf32>
    %328 = arith.addf %326, %327 : vector<2x32xf32>
    %329 = arith.negf %328 : vector<2x32xf32>
    %330 = math.exp %329 : vector<2x32xf32>
    %cst_73 = arith.constant 1.000000e+00 : f32
    %331 = vector.broadcast %cst_73 : f32 to vector<2x32xf32>
    %332 = arith.addf %331, %330 : vector<2x32xf32>
    %333 = arith.divf %331, %332 : vector<2x32xf32>
    %334 = vector.extract_strided_slice %325 {offsets = [0, 32], sizes = [2, 32], strides = [1, 1]} : vector<2x96xf32> to vector<2x32xf32>
    %335 = vector.extract_strided_slice %283 {offsets = [0, 32], sizes = [2, 32], strides = [1, 1]} : vector<2x96xf32> to vector<2x32xf32>
    %336 = arith.addf %334, %335 : vector<2x32xf32>
    %337 = arith.negf %336 : vector<2x32xf32>
    %338 = math.exp %337 : vector<2x32xf32>
    %cst_74 = arith.constant 1.000000e+00 : f32
    %339 = vector.broadcast %cst_74 : f32 to vector<2x32xf32>
    %340 = arith.addf %339, %338 : vector<2x32xf32>
    %341 = arith.divf %339, %340 : vector<2x32xf32>
    %342 = vector.extract_strided_slice %325 {offsets = [0, 64], sizes = [2, 32], strides = [1, 1]} : vector<2x96xf32> to vector<2x32xf32>
    %343 = vector.extract_strided_slice %283 {offsets = [0, 64], sizes = [2, 32], strides = [1, 1]} : vector<2x96xf32> to vector<2x32xf32>
    %344 = arith.mulf %333, %343 : vector<2x32xf32>
    %345 = arith.addf %342, %344 : vector<2x32xf32>
    %346 = math.tanh %345 : vector<2x32xf32>
    %cst_75 = arith.constant 1.000000e+00 : f32
    %347 = vector.broadcast %cst_75 : f32 to vector<2x32xf32>
    %348 = arith.subf %347, %341 : vector<2x32xf32>
    %349 = arith.mulf %348, %346 : vector<2x32xf32>
    %350 = arith.mulf %341, %278 : vector<2x32xf32>
    %351 = arith.addf %349, %350 : vector<2x32xf32>
    %c5_i32 = arith.constant 5 : i32
    %352 = tpu.concatenate %351, %311 in 1 : vector<2x32xf32>, vector<2x32xf32> -> vector<2x64xf32>
    %353 = arith.truncf %352 : vector<2x64xf32> to vector<2x64xbf16>
    %cst_76 = arith.constant dense<0.000000e+00> : vector<2x288xf32>
    %354 = tpu.matmul %353, %18, %cst_76 {dimension_numbers = #tpu.dot_dimension_numbers<[1], [0], [0], [1], [0, 0, 1, 1], [], []>} : vector<2x64xbf16>, vector<64x288xbf16>, vector<2x288xf32> -> vector<2x288xf32>
    %355 = arith.addf %354, %21 : vector<2x288xf32>
    %356 = vector.extract_strided_slice %355 {offsets = [0, 0], sizes = [2, 96], strides = [1, 1]} : vector<2x288xf32> to vector<2x96xf32>
    %357 = vector.extract_strided_slice %355 {offsets = [0, 96], sizes = [2, 96], strides = [1, 1]} : vector<2x288xf32> to vector<2x96xf32>
    %358 = vector.extract_strided_slice %355 {offsets = [0, 192], sizes = [2, 96], strides = [1, 1]} : vector<2x288xf32> to vector<2x96xf32>
    %359 = vector.extract_strided_slice %357 {offsets = [0, 0], sizes = [2, 32], strides = [1, 1]} : vector<2x96xf32> to vector<2x32xf32>
    %360 = vector.extract_strided_slice %358 {offsets = [0, 0], sizes = [2, 32], strides = [1, 1]} : vector<2x96xf32> to vector<2x32xf32>
    %361 = arith.addf %359, %360 : vector<2x32xf32>
    %362 = arith.negf %361 : vector<2x32xf32>
    %363 = math.exp %362 : vector<2x32xf32>
    %cst_77 = arith.constant 1.000000e+00 : f32
    %364 = vector.broadcast %cst_77 : f32 to vector<2x32xf32>
    %365 = arith.addf %364, %363 : vector<2x32xf32>
    %366 = arith.divf %364, %365 : vector<2x32xf32>
    %367 = vector.extract_strided_slice %357 {offsets = [0, 32], sizes = [2, 32], strides = [1, 1]} : vector<2x96xf32> to vector<2x32xf32>
    %368 = vector.extract_strided_slice %358 {offsets = [0, 32], sizes = [2, 32], strides = [1, 1]} : vector<2x96xf32> to vector<2x32xf32>
    %369 = arith.addf %367, %368 : vector<2x32xf32>
    %370 = arith.negf %369 : vector<2x32xf32>
    %371 = math.exp %370 : vector<2x32xf32>
    %cst_78 = arith.constant 1.000000e+00 : f32
    %372 = vector.broadcast %cst_78 : f32 to vector<2x32xf32>
    %373 = arith.addf %372, %371 : vector<2x32xf32>
    %374 = arith.divf %372, %373 : vector<2x32xf32>
    %375 = vector.extract_strided_slice %357 {offsets = [0, 64], sizes = [2, 32], strides = [1, 1]} : vector<2x96xf32> to vector<2x32xf32>
    %376 = vector.extract_strided_slice %358 {offsets = [0, 64], sizes = [2, 32], strides = [1, 1]} : vector<2x96xf32> to vector<2x32xf32>
    %377 = arith.mulf %366, %376 : vector<2x32xf32>
    %378 = arith.addf %375, %377 : vector<2x32xf32>
    %379 = math.tanh %378 : vector<2x32xf32>
    %cst_79 = arith.constant 1.000000e+00 : f32
    %380 = vector.broadcast %cst_79 : f32 to vector<2x32xf32>
    %381 = arith.subf %380, %374 : vector<2x32xf32>
    %382 = arith.mulf %381, %379 : vector<2x32xf32>
    %383 = arith.mulf %374, %311 : vector<2x32xf32>
    %384 = arith.addf %382, %383 : vector<2x32xf32>
    %c1_i32_80 = arith.constant 1 : i32
    %385 = arith.subi %c5_i32, %c1_i32_80 : i32
    %386 = vector.broadcast %385 : i32 to vector<2x1xi32>
    %387 = arith.cmpi slt, %386, %30 : vector<2x1xi32>
    %388 = arith.extui %387 : vector<2x1xi1> to vector<2x1xi32>
    %389 = arith.sitofp %388 : vector<2x1xi32> to vector<2x1xf32>
    %390 = vector.broadcast %389 : vector<2x1xf32> to vector<2x32xf32>
    %391 = arith.mulf %384, %390 : vector<2x32xf32>
    %392 = arith.index_cast %385 : i32 to index
    %c0_81 = arith.constant 0 : index
    %c0_82 = arith.constant 0 : index
    %393 = vector.load %arg10[%392, %c0_81, %c0_82] : memref<8x2x32xf32, #tpu.memory_space<vmem>>, vector<1x2x32xf32>
    %394 = vector.shape_cast %393 : vector<1x2x32xf32> to vector<2x32xf32>
    %395 = vector.shape_cast %391 : vector<2x32xf32> to vector<1x2x32xf32>
    tpu.vector_store %arg10[%392, %c0_81, %c0_82], %395 {strides = array<i32>} : memref<8x2x32xf32, #tpu.memory_space<vmem>>, vector<1x2x32xf32>,
    %c2_i32_83 = arith.constant 2 : i32
    %396 = arith.muli %c5_i32, %c2_i32_83 : i32
    %397 = arith.index_cast %396 : i32 to index
    %c0_84 = arith.constant 0 : index
    %398 = vector.load %arg11[%397, %c0_84] : memref<16x96xf32, #tpu.memory_space<vmem>>, vector<2x96xf32>
    %399 = vector.extract_strided_slice %398 {offsets = [0, 0], sizes = [2, 32], strides = [1, 1]} : vector<2x96xf32> to vector<2x32xf32>
    %400 = vector.extract_strided_slice %356 {offsets = [0, 0], sizes = [2, 32], strides = [1, 1]} : vector<2x96xf32> to vector<2x32xf32>
    %401 = arith.addf %399, %400 : vector<2x32xf32>
    %402 = arith.negf %401 : vector<2x32xf32>
    %403 = math.exp %402 : vector<2x32xf32>
    %cst_85 = arith.constant 1.000000e+00 : f32
    %404 = vector.broadcast %cst_85 : f32 to vector<2x32xf32>
    %405 = arith.addf %404, %403 : vector<2x32xf32>
    %406 = arith.divf %404, %405 : vector<2x32xf32>
    %407 = vector.extract_strided_slice %398 {offsets = [0, 32], sizes = [2, 32], strides = [1, 1]} : vector<2x96xf32> to vector<2x32xf32>
    %408 = vector.extract_strided_slice %356 {offsets = [0, 32], sizes = [2, 32], strides = [1, 1]} : vector<2x96xf32> to vector<2x32xf32>
    %409 = arith.addf %407, %408 : vector<2x32xf32>
    %410 = arith.negf %409 : vector<2x32xf32>
    %411 = math.exp %410 : vector<2x32xf32>
    %cst_86 = arith.constant 1.000000e+00 : f32
    %412 = vector.broadcast %cst_86 : f32 to vector<2x32xf32>
    %413 = arith.addf %412, %411 : vector<2x32xf32>
    %414 = arith.divf %412, %413 : vector<2x32xf32>
    %415 = vector.extract_strided_slice %398 {offsets = [0, 64], sizes = [2, 32], strides = [1, 1]} : vector<2x96xf32> to vector<2x32xf32>
    %416 = vector.extract_strided_slice %356 {offsets = [0, 64], sizes = [2, 32], strides = [1, 1]} : vector<2x96xf32> to vector<2x32xf32>
    %417 = arith.mulf %406, %416 : vector<2x32xf32>
    %418 = arith.addf %415, %417 : vector<2x32xf32>
    %419 = math.tanh %418 : vector<2x32xf32>
    %cst_87 = arith.constant 1.000000e+00 : f32
    %420 = vector.broadcast %cst_87 : f32 to vector<2x32xf32>
    %421 = arith.subf %420, %414 : vector<2x32xf32>
    %422 = arith.mulf %421, %419 : vector<2x32xf32>
    %423 = arith.mulf %414, %351 : vector<2x32xf32>
    %424 = arith.addf %422, %423 : vector<2x32xf32>
    %c6_i32 = arith.constant 6 : i32
    %425 = tpu.concatenate %424, %384 in 1 : vector<2x32xf32>, vector<2x32xf32> -> vector<2x64xf32>
    %426 = arith.truncf %425 : vector<2x64xf32> to vector<2x64xbf16>
    %cst_88 = arith.constant dense<0.000000e+00> : vector<2x288xf32>
    %427 = tpu.matmul %426, %18, %cst_88 {dimension_numbers = #tpu.dot_dimension_numbers<[1], [0], [0], [1], [0, 0, 1, 1], [], []>} : vector<2x64xbf16>, vector<64x288xbf16>, vector<2x288xf32> -> vector<2x288xf32>
    %428 = arith.addf %427, %21 : vector<2x288xf32>
    %429 = vector.extract_strided_slice %428 {offsets = [0, 0], sizes = [2, 96], strides = [1, 1]} : vector<2x288xf32> to vector<2x96xf32>
    %430 = vector.extract_strided_slice %428 {offsets = [0, 96], sizes = [2, 96], strides = [1, 1]} : vector<2x288xf32> to vector<2x96xf32>
    %431 = vector.extract_strided_slice %428 {offsets = [0, 192], sizes = [2, 96], strides = [1, 1]} : vector<2x288xf32> to vector<2x96xf32>
    %432 = vector.extract_strided_slice %430 {offsets = [0, 0], sizes = [2, 32], strides = [1, 1]} : vector<2x96xf32> to vector<2x32xf32>
    %433 = vector.extract_strided_slice %431 {offsets = [0, 0], sizes = [2, 32], strides = [1, 1]} : vector<2x96xf32> to vector<2x32xf32>
    %434 = arith.addf %432, %433 : vector<2x32xf32>
    %435 = arith.negf %434 : vector<2x32xf32>
    %436 = math.exp %435 : vector<2x32xf32>
    %cst_89 = arith.constant 1.000000e+00 : f32
    %437 = vector.broadcast %cst_89 : f32 to vector<2x32xf32>
    %438 = arith.addf %437, %436 : vector<2x32xf32>
    %439 = arith.divf %437, %438 : vector<2x32xf32>
    %440 = vector.extract_strided_slice %430 {offsets = [0, 32], sizes = [2, 32], strides = [1, 1]} : vector<2x96xf32> to vector<2x32xf32>
    %441 = vector.extract_strided_slice %431 {offsets = [0, 32], sizes = [2, 32], strides = [1, 1]} : vector<2x96xf32> to vector<2x32xf32>
    %442 = arith.addf %440, %441 : vector<2x32xf32>
    %443 = arith.negf %442 : vector<2x32xf32>
    %444 = math.exp %443 : vector<2x32xf32>
    %cst_90 = arith.constant 1.000000e+00 : f32
    %445 = vector.broadcast %cst_90 : f32 to vector<2x32xf32>
    %446 = arith.addf %445, %444 : vector<2x32xf32>
    %447 = arith.divf %445, %446 : vector<2x32xf32>
    %448 = vector.extract_strided_slice %430 {offsets = [0, 64], sizes = [2, 32], strides = [1, 1]} : vector<2x96xf32> to vector<2x32xf32>
    %449 = vector.extract_strided_slice %431 {offsets = [0, 64], sizes = [2, 32], strides = [1, 1]} : vector<2x96xf32> to vector<2x32xf32>
    %450 = arith.mulf %439, %449 : vector<2x32xf32>
    %451 = arith.addf %448, %450 : vector<2x32xf32>
    %452 = math.tanh %451 : vector<2x32xf32>
    %cst_91 = arith.constant 1.000000e+00 : f32
    %453 = vector.broadcast %cst_91 : f32 to vector<2x32xf32>
    %454 = arith.subf %453, %447 : vector<2x32xf32>
    %455 = arith.mulf %454, %452 : vector<2x32xf32>
    %456 = arith.mulf %447, %384 : vector<2x32xf32>
    %457 = arith.addf %455, %456 : vector<2x32xf32>
    %c1_i32_92 = arith.constant 1 : i32
    %458 = arith.subi %c6_i32, %c1_i32_92 : i32
    %459 = vector.broadcast %458 : i32 to vector<2x1xi32>
    %460 = arith.cmpi slt, %459, %30 : vector<2x1xi32>
    %461 = arith.extui %460 : vector<2x1xi1> to vector<2x1xi32>
    %462 = arith.sitofp %461 : vector<2x1xi32> to vector<2x1xf32>
    %463 = vector.broadcast %462 : vector<2x1xf32> to vector<2x32xf32>
    %464 = arith.mulf %457, %463 : vector<2x32xf32>
    %465 = arith.index_cast %458 : i32 to index
    %c0_93 = arith.constant 0 : index
    %c0_94 = arith.constant 0 : index
    %466 = vector.load %arg10[%465, %c0_93, %c0_94] : memref<8x2x32xf32, #tpu.memory_space<vmem>>, vector<1x2x32xf32>
    %467 = vector.shape_cast %466 : vector<1x2x32xf32> to vector<2x32xf32>
    %468 = vector.shape_cast %464 : vector<2x32xf32> to vector<1x2x32xf32>
    tpu.vector_store %arg10[%465, %c0_93, %c0_94], %468 {strides = array<i32>} : memref<8x2x32xf32, #tpu.memory_space<vmem>>, vector<1x2x32xf32>,
    %c2_i32_95 = arith.constant 2 : i32
    %469 = arith.muli %c6_i32, %c2_i32_95 : i32
    %470 = arith.index_cast %469 : i32 to index
    %c0_96 = arith.constant 0 : index
    %471 = vector.load %arg11[%470, %c0_96] : memref<16x96xf32, #tpu.memory_space<vmem>>, vector<2x96xf32>
    %472 = vector.extract_strided_slice %471 {offsets = [0, 0], sizes = [2, 32], strides = [1, 1]} : vector<2x96xf32> to vector<2x32xf32>
    %473 = vector.extract_strided_slice %429 {offsets = [0, 0], sizes = [2, 32], strides = [1, 1]} : vector<2x96xf32> to vector<2x32xf32>
    %474 = arith.addf %472, %473 : vector<2x32xf32>
    %475 = arith.negf %474 : vector<2x32xf32>
    %476 = math.exp %475 : vector<2x32xf32>
    %cst_97 = arith.constant 1.000000e+00 : f32
    %477 = vector.broadcast %cst_97 : f32 to vector<2x32xf32>
    %478 = arith.addf %477, %476 : vector<2x32xf32>
    %479 = arith.divf %477, %478 : vector<2x32xf32>
    %480 = vector.extract_strided_slice %471 {offsets = [0, 32], sizes = [2, 32], strides = [1, 1]} : vector<2x96xf32> to vector<2x32xf32>
    %481 = vector.extract_strided_slice %429 {offsets = [0, 32], sizes = [2, 32], strides = [1, 1]} : vector<2x96xf32> to vector<2x32xf32>
    %482 = arith.addf %480, %481 : vector<2x32xf32>
    %483 = arith.negf %482 : vector<2x32xf32>
    %484 = math.exp %483 : vector<2x32xf32>
    %cst_98 = arith.constant 1.000000e+00 : f32
    %485 = vector.broadcast %cst_98 : f32 to vector<2x32xf32>
    %486 = arith.addf %485, %484 : vector<2x32xf32>
    %487 = arith.divf %485, %486 : vector<2x32xf32>
    %488 = vector.extract_strided_slice %471 {offsets = [0, 64], sizes = [2, 32], strides = [1, 1]} : vector<2x96xf32> to vector<2x32xf32>
    %489 = vector.extract_strided_slice %429 {offsets = [0, 64], sizes = [2, 32], strides = [1, 1]} : vector<2x96xf32> to vector<2x32xf32>
    %490 = arith.mulf %479, %489 : vector<2x32xf32>
    %491 = arith.addf %488, %490 : vector<2x32xf32>
    %492 = math.tanh %491 : vector<2x32xf32>
    %cst_99 = arith.constant 1.000000e+00 : f32
    %493 = vector.broadcast %cst_99 : f32 to vector<2x32xf32>
    %494 = arith.subf %493, %487 : vector<2x32xf32>
    %495 = arith.mulf %494, %492 : vector<2x32xf32>
    %496 = arith.mulf %487, %424 : vector<2x32xf32>
    %497 = arith.addf %495, %496 : vector<2x32xf32>
    %c7_i32 = arith.constant 7 : i32
    %498 = tpu.concatenate %497, %457 in 1 : vector<2x32xf32>, vector<2x32xf32> -> vector<2x64xf32>
    %499 = arith.truncf %498 : vector<2x64xf32> to vector<2x64xbf16>
    %cst_100 = arith.constant dense<0.000000e+00> : vector<2x288xf32>
    %500 = tpu.matmul %499, %18, %cst_100 {dimension_numbers = #tpu.dot_dimension_numbers<[1], [0], [0], [1], [0, 0, 1, 1], [], []>} : vector<2x64xbf16>, vector<64x288xbf16>, vector<2x288xf32> -> vector<2x288xf32>
    %501 = arith.addf %500, %21 : vector<2x288xf32>
    %502 = vector.extract_strided_slice %501 {offsets = [0, 0], sizes = [2, 96], strides = [1, 1]} : vector<2x288xf32> to vector<2x96xf32>
    %503 = vector.extract_strided_slice %501 {offsets = [0, 96], sizes = [2, 96], strides = [1, 1]} : vector<2x288xf32> to vector<2x96xf32>
    %504 = vector.extract_strided_slice %501 {offsets = [0, 192], sizes = [2, 96], strides = [1, 1]} : vector<2x288xf32> to vector<2x96xf32>
    %505 = vector.extract_strided_slice %503 {offsets = [0, 0], sizes = [2, 32], strides = [1, 1]} : vector<2x96xf32> to vector<2x32xf32>
    %506 = vector.extract_strided_slice %504 {offsets = [0, 0], sizes = [2, 32], strides = [1, 1]} : vector<2x96xf32> to vector<2x32xf32>
    %507 = arith.addf %505, %506 : vector<2x32xf32>
    %508 = arith.negf %507 : vector<2x32xf32>
    %509 = math.exp %508 : vector<2x32xf32>
    %cst_101 = arith.constant 1.000000e+00 : f32
    %510 = vector.broadcast %cst_101 : f32 to vector<2x32xf32>
    %511 = arith.addf %510, %509 : vector<2x32xf32>
    %512 = arith.divf %510, %511 : vector<2x32xf32>
    %513 = vector.extract_strided_slice %503 {offsets = [0, 32], sizes = [2, 32], strides = [1, 1]} : vector<2x96xf32> to vector<2x32xf32>
    %514 = vector.extract_strided_slice %504 {offsets = [0, 32], sizes = [2, 32], strides = [1, 1]} : vector<2x96xf32> to vector<2x32xf32>
    %515 = arith.addf %513, %514 : vector<2x32xf32>
    %516 = arith.negf %515 : vector<2x32xf32>
    %517 = math.exp %516 : vector<2x32xf32>
    %cst_102 = arith.constant 1.000000e+00 : f32
    %518 = vector.broadcast %cst_102 : f32 to vector<2x32xf32>
    %519 = arith.addf %518, %517 : vector<2x32xf32>
    %520 = arith.divf %518, %519 : vector<2x32xf32>
    %521 = vector.extract_strided_slice %503 {offsets = [0, 64], sizes = [2, 32], strides = [1, 1]} : vector<2x96xf32> to vector<2x32xf32>
    %522 = vector.extract_strided_slice %504 {offsets = [0, 64], sizes = [2, 32], strides = [1, 1]} : vector<2x96xf32> to vector<2x32xf32>
    %523 = arith.mulf %512, %522 : vector<2x32xf32>
    %524 = arith.addf %521, %523 : vector<2x32xf32>
    %525 = math.tanh %524 : vector<2x32xf32>
    %cst_103 = arith.constant 1.000000e+00 : f32
    %526 = vector.broadcast %cst_103 : f32 to vector<2x32xf32>
    %527 = arith.subf %526, %520 : vector<2x32xf32>
    %528 = arith.mulf %527, %525 : vector<2x32xf32>
    %529 = arith.mulf %520, %457 : vector<2x32xf32>
    %530 = arith.addf %528, %529 : vector<2x32xf32>
    %c1_i32_104 = arith.constant 1 : i32
    %531 = arith.subi %c7_i32, %c1_i32_104 : i32
    %532 = vector.broadcast %531 : i32 to vector<2x1xi32>
    %533 = arith.cmpi slt, %532, %30 : vector<2x1xi32>
    %534 = arith.extui %533 : vector<2x1xi1> to vector<2x1xi32>
    %535 = arith.sitofp %534 : vector<2x1xi32> to vector<2x1xf32>
    %536 = vector.broadcast %535 : vector<2x1xf32> to vector<2x32xf32>
    %537 = arith.mulf %530, %536 : vector<2x32xf32>
    %538 = arith.index_cast %531 : i32 to index
    %c0_105 = arith.constant 0 : index
    %c0_106 = arith.constant 0 : index
    %539 = vector.load %arg10[%538, %c0_105, %c0_106] : memref<8x2x32xf32, #tpu.memory_space<vmem>>, vector<1x2x32xf32>
    %540 = vector.shape_cast %539 : vector<1x2x32xf32> to vector<2x32xf32>
    %541 = vector.shape_cast %537 : vector<2x32xf32> to vector<1x2x32xf32>
    tpu.vector_store %arg10[%538, %c0_105, %c0_106], %541 {strides = array<i32>} : memref<8x2x32xf32, #tpu.memory_space<vmem>>, vector<1x2x32xf32>,
    %c2_i32_107 = arith.constant 2 : i32
    %542 = arith.muli %c7_i32, %c2_i32_107 : i32
    %543 = arith.index_cast %542 : i32 to index
    %c0_108 = arith.constant 0 : index
    %544 = vector.load %arg11[%543, %c0_108] : memref<16x96xf32, #tpu.memory_space<vmem>>, vector<2x96xf32>
    %545 = vector.extract_strided_slice %544 {offsets = [0, 0], sizes = [2, 32], strides = [1, 1]} : vector<2x96xf32> to vector<2x32xf32>
    %546 = vector.extract_strided_slice %502 {offsets = [0, 0], sizes = [2, 32], strides = [1, 1]} : vector<2x96xf32> to vector<2x32xf32>
    %547 = arith.addf %545, %546 : vector<2x32xf32>
    %548 = arith.negf %547 : vector<2x32xf32>
    %549 = math.exp %548 : vector<2x32xf32>
    %cst_109 = arith.constant 1.000000e+00 : f32
    %550 = vector.broadcast %cst_109 : f32 to vector<2x32xf32>
    %551 = arith.addf %550, %549 : vector<2x32xf32>
    %552 = arith.divf %550, %551 : vector<2x32xf32>
    %553 = vector.extract_strided_slice %544 {offsets = [0, 32], sizes = [2, 32], strides = [1, 1]} : vector<2x96xf32> to vector<2x32xf32>
    %554 = vector.extract_strided_slice %502 {offsets = [0, 32], sizes = [2, 32], strides = [1, 1]} : vector<2x96xf32> to vector<2x32xf32>
    %555 = arith.addf %553, %554 : vector<2x32xf32>
    %556 = arith.negf %555 : vector<2x32xf32>
    %557 = math.exp %556 : vector<2x32xf32>
    %cst_110 = arith.constant 1.000000e+00 : f32
    %558 = vector.broadcast %cst_110 : f32 to vector<2x32xf32>
    %559 = arith.addf %558, %557 : vector<2x32xf32>
    %560 = arith.divf %558, %559 : vector<2x32xf32>
    %561 = vector.extract_strided_slice %544 {offsets = [0, 64], sizes = [2, 32], strides = [1, 1]} : vector<2x96xf32> to vector<2x32xf32>
    %562 = vector.extract_strided_slice %502 {offsets = [0, 64], sizes = [2, 32], strides = [1, 1]} : vector<2x96xf32> to vector<2x32xf32>
    %563 = arith.mulf %552, %562 : vector<2x32xf32>
    %564 = arith.addf %561, %563 : vector<2x32xf32>
    %565 = math.tanh %564 : vector<2x32xf32>
    %cst_111 = arith.constant 1.000000e+00 : f32
    %566 = vector.broadcast %cst_111 : f32 to vector<2x32xf32>
    %567 = arith.subf %566, %560 : vector<2x32xf32>
    %568 = arith.mulf %567, %565 : vector<2x32xf32>
    %569 = arith.mulf %560, %497 : vector<2x32xf32>
    %570 = arith.addf %568, %569 : vector<2x32xf32>
    %c7_i32_112 = arith.constant 7 : i32
    %571 = tpu.concatenate %570, %530 in 1 : vector<2x32xf32>, vector<2x32xf32> -> vector<2x64xf32>
    %572 = arith.truncf %571 : vector<2x64xf32> to vector<2x64xbf16>
    %cst_113 = arith.constant dense<0.000000e+00> : vector<2x288xf32>
    %573 = tpu.matmul %572, %18, %cst_113 {dimension_numbers = #tpu.dot_dimension_numbers<[1], [0], [0], [1], [0, 0, 1, 1], [], []>} : vector<2x64xbf16>, vector<64x288xbf16>, vector<2x288xf32> -> vector<2x288xf32>
    %574 = arith.addf %573, %21 : vector<2x288xf32>
    %575 = vector.extract_strided_slice %574 {offsets = [0, 96], sizes = [2, 96], strides = [1, 1]} : vector<2x288xf32> to vector<2x96xf32>
    %576 = vector.extract_strided_slice %574 {offsets = [0, 192], sizes = [2, 96], strides = [1, 1]} : vector<2x288xf32> to vector<2x96xf32>
    %577 = vector.extract_strided_slice %575 {offsets = [0, 0], sizes = [2, 32], strides = [1, 1]} : vector<2x96xf32> to vector<2x32xf32>
    %578 = vector.extract_strided_slice %576 {offsets = [0, 0], sizes = [2, 32], strides = [1, 1]} : vector<2x96xf32> to vector<2x32xf32>
    %579 = arith.addf %577, %578 : vector<2x32xf32>
    %580 = arith.negf %579 : vector<2x32xf32>
    %581 = math.exp %580 : vector<2x32xf32>
    %cst_114 = arith.constant 1.000000e+00 : f32
    %582 = vector.broadcast %cst_114 : f32 to vector<2x32xf32>
    %583 = arith.addf %582, %581 : vector<2x32xf32>
    %584 = arith.divf %582, %583 : vector<2x32xf32>
    %585 = vector.extract_strided_slice %575 {offsets = [0, 32], sizes = [2, 32], strides = [1, 1]} : vector<2x96xf32> to vector<2x32xf32>
    %586 = vector.extract_strided_slice %576 {offsets = [0, 32], sizes = [2, 32], strides = [1, 1]} : vector<2x96xf32> to vector<2x32xf32>
    %587 = arith.addf %585, %586 : vector<2x32xf32>
    %588 = arith.negf %587 : vector<2x32xf32>
    %589 = math.exp %588 : vector<2x32xf32>
    %cst_115 = arith.constant 1.000000e+00 : f32
    %590 = vector.broadcast %cst_115 : f32 to vector<2x32xf32>
    %591 = arith.addf %590, %589 : vector<2x32xf32>
    %592 = arith.divf %590, %591 : vector<2x32xf32>
    %593 = vector.extract_strided_slice %575 {offsets = [0, 64], sizes = [2, 32], strides = [1, 1]} : vector<2x96xf32> to vector<2x32xf32>
    %594 = vector.extract_strided_slice %576 {offsets = [0, 64], sizes = [2, 32], strides = [1, 1]} : vector<2x96xf32> to vector<2x32xf32>
    %595 = arith.mulf %584, %594 : vector<2x32xf32>
    %596 = arith.addf %593, %595 : vector<2x32xf32>
    %597 = math.tanh %596 : vector<2x32xf32>
    %cst_116 = arith.constant 1.000000e+00 : f32
    %598 = vector.broadcast %cst_116 : f32 to vector<2x32xf32>
    %599 = arith.subf %598, %592 : vector<2x32xf32>
    %600 = arith.mulf %599, %597 : vector<2x32xf32>
    %601 = arith.mulf %592, %530 : vector<2x32xf32>
    %602 = arith.addf %600, %601 : vector<2x32xf32>
    %c7_i32_117 = arith.constant 7 : i32
    %603 = vector.broadcast %c7_i32_117 : i32 to vector<2x1xi32>
    %604 = arith.cmpi sgt, %30, %603 : vector<2x1xi32>
    %605 = arith.extui %604 : vector<2x1xi1> to vector<2x1xi32>
    %606 = arith.sitofp %605 : vector<2x1xi32> to vector<2x1xf32>
    %607 = vector.broadcast %606 : vector<2x1xf32> to vector<2x32xf32>
    %608 = arith.mulf %602, %607 : vector<2x32xf32>
    %c7 = arith.constant 7 : index
    %c0_118 = arith.constant 0 : index
    %c0_119 = arith.constant 0 : index
    %609 = vector.load %arg10[%c7, %c0_118, %c0_119] : memref<8x2x32xf32, #tpu.memory_space<vmem>>, vector<1x2x32xf32>
    %610 = vector.shape_cast %609 : vector<1x2x32xf32> to vector<2x32xf32>
    %611 = vector.shape_cast %608 : vector<2x32xf32> to vector<1x2x32xf32>
    tpu.vector_store %arg10[%c7, %c0_118, %c0_119], %611 {strides = array<i32>} : memref<8x2x32xf32, #tpu.memory_space<vmem>>, vector<1x2x32xf32>,
    return
  }
  func.func @transform_0(%arg0: i32, %arg1: memref<2xi32, #tpu.memory_space<smem>>) -> (i32, i32) {
    %c0_i32 = arith.constant 0 : i32
    %c0_i32_0 = arith.constant 0 : i32
    %c0_i32_1 = arith.constant 0 : i32
    return %c0_i32, %c0_i32_0 : i32, i32
  }
  func.func @transform_1(%arg0: i32, %arg1: memref<2xi32, #tpu.memory_space<smem>>) -> (i32, i32) {
    %c0_i32 = arith.constant 0 : i32
    %c0_i32_0 = arith.constant 0 : i32
    %c0_i32_1 = arith.constant 0 : i32
    return %c0_i32, %c0_i32_0 : i32, i32
  }
  func.func @transform_2(%arg0: i32, %arg1: memref<2xi32, #tpu.memory_space<smem>>) -> (i32, i32) {
    %c0_i32 = arith.constant 0 : i32
    %c0_i32_0 = arith.constant 0 : i32
    %c0_i32_1 = arith.constant 0 : i32
    return %c0_i32, %c0_i32_0 : i32, i32
  }
  func.func @transform_3(%arg0: i32, %arg1: memref<2xi32, #tpu.memory_space<smem>>) -> (i32, i32) {
    %c0_i32 = arith.constant 0 : i32
    %c0_i32_0 = arith.constant 0 : i32
    %c0_i32_1 = arith.constant 0 : i32
    return %c0_i32, %c0_i32_0 : i32, i32
  }
  func.func @transform_4(%arg0: i32, %arg1: memref<2xi32, #tpu.memory_space<smem>>) -> (i32, i32) {
    %c0_i32 = arith.constant 0 : i32
    %c0_i32_0 = arith.constant 0 : i32
    %c0_i32_1 = arith.constant 0 : i32
    return %c0_i32, %c0_i32_0 : i32, i32
  }
  func.func @transform_5(%arg0: i32, %arg1: memref<2xi32, #tpu.memory_space<smem>>) -> (i32, i32) {
    %c0_i32 = arith.constant 0 : i32
    %c0_i32_0 = arith.constant 0 : i32
    %c0_i32_1 = arith.constant 0 : i32
    return %c0_i32, %c0_i32_0 : i32, i32
  }
  func.func @transform_6(%arg0: i32, %arg1: memref<2xi32, #tpu.memory_space<smem>>) -> (i32, i32) {
    %c0_i32 = arith.constant 0 : i32
    %c0_i32_0 = arith.constant 0 : i32
    %c0_i32_1 = arith.constant 0 : i32
    return %c0_i32, %c0_i32_0 : i32, i32
  }
  func.func @transform_7(%arg0: i32, %arg1: memref<2xi32, #tpu.memory_space<smem>>) -> (i32, i32) {
    %c0_i32 = arith.constant 0 : i32
    %c0_i32_0 = arith.constant 0 : i32
    %c0_i32_1 = arith.constant 0 : i32
    return %c0_i32, %c0_i32_0 : i32, i32
  }
  func.func @transform_8(%arg0: i32, %arg1: memref<2xi32, #tpu.memory_space<smem>>) -> (i32, i32, i32) {
    %c0_i32 = arith.constant 0 : i32
    %c0_i32_0 = arith.constant 0 : i32
    %c0_i32_1 = arith.constant 0 : i32
    %c0_i32_2 = arith.constant 0 : i32
    return %c0_i32, %c0_i32_0, %c0_i32_1 : i32, i32, i32
  }
}

</mosaic_0001>

<bundles_post_ra>
// kernel: tpu_custom_call.1
= control target key start
LH: loop header
LB: loop body
LE: loop exit
PB: predicated region body
PF: predicated region fallthrough
CT: control target
= control target key end

     0   :  { %s2834_s12 = smov [#allocation4]   ;;  %s3488_s0 = inlined_call_operand.vmem [shape: s32[2], index: 0, kind: input, shape index: {}]   ;;  %s3489_s1 = inlined_call_operand.hbm [shape: bf16[496,128], index: 1, kind: input, shape index: {}]   ;;  %s3490_s2 = inlined_call_operand.vmem [shape: bf16[128,32], index: 2, kind: input, shape index: {}]   ;;  %s3491_s3 = inlined_call_operand.vmem [shape: f32[1,32], index: 3, kind: input, shape index: {}]   ;;  %s3492_s4 = inlined_call_operand.vmem [shape: bf16[16,496], index: 4, kind: input, shape index: {}]   ;;  %s3493_s5 = inlined_call_operand.vmem [shape: bf16[32,96], index: 5, kind: input, shape index: {}]   ;;  %s3494_s6 = inlined_call_operand.hbm [shape: bf16[64,288], index: 6, kind: input, shape index: {}]   ;;  %s3495_s7 = inlined_call_operand.vmem [shape: f32[1,96], index: 7, kind: input, shape index: {}]   ;;  %s3496_s8 = inlined_call_operand.vmem [shape: f32[1,288], index: 8, kind: input, shape index: {}]   ;;  %s3497_s9 = inlined_call_operand.hbm [shape: f32[8,2,32], index: 9, kind: output, shape index: {}]  }
   0x1   :  { %s15_s11 = sshll.u32 %s3488_s0, 4  ;;  %s16_s11 = int_to_ptr.vmem [resolvable:$true] %s15_s11 }
   0x2   :  { %18 = dma.vmem_to_smem %s16_s11, 16, %s2834_s12, [#allocation3] }
   0x3   :  { %2826 = dma.done.wait [#allocation3], 16 }
   0x4   :  { %2827 = vsyncadd [#allocation3], 4294967280 }
   0x5   :  { %21 = sfence }
   0x6   :  { %22 = vsyncpa [#allocation6], 0 }
   0x7   :  { %23 = vsyncpa [#allocation9], 0 }
   0x8   :  { %24 = vsyncpa [#allocation7], 0  ;;  %s29_s15 = sshll.u32 %s3489_s1, 4  ;;  %s2835_s16 = smov [#allocation5]   ;;  %s30_s15 = int_to_ptr.hbm [resolvable:$true] %s29_s15 }
   0x9   :  { %s31_s17 = sshll.u32 %s2835_s16, 4  ;;  %s50_s0 = sshll.u32 %s3494_s6, 4  ;;  %s32_s17 = int_to_ptr.vmem [resolvable:$true] %s31_s17  ;;  %s51_s0 = int_to_ptr.hbm [resolvable:$true] %s50_s0 }
   0xa   :  { %s2836_s20 = smov 64   ;;  %s2837_s21 = smov 4  }
   0xb   :  { %37 = dma.hbm_to_vmem [thread:$0]  %s30_s15, 3968, %s32_s17, [#allocation6], %s2836_s20, %s2836_s20, %s2837_s21  }
   0xc   :  { %s2838_s22 = smov [#allocation8]   ;;  %s2839_s24 = smov 192  }
   0xd   :  { %s52_s23 = sshll.u32 %s2838_s22, 4  ;;  %s2840_s25 = smov 12   ;;  %s53_s23 = int_to_ptr.vmem [resolvable:$true] %s52_s23 }
   0xe   :  { %58 = dma.hbm_to_vmem [thread:$0]  %s51_s0, 1536, %s53_s23, [#allocation9], %s2839_s24, %s2839_s24, %s2840_s25  }
   0xf   :  { %2828 = dma.done.wait [#allocation6], 3968  }
  0x10   :  { %2829 = vsyncadd [#allocation6], 4294963328 }
  0x11   :  { %2830 = dma.done.wait [#allocation9], 1536  }
  0x12   :  { %2831 = vsyncadd [#allocation9], 4294965760  ;;  %v2533_v0 = vld [vmem:[%s3490_s2 + $0x38] sm:$0xff]  ;;  %v2532_v1 = vld [vmem:[%s3490_s2 + $0x30] sm:$0xff]  ;;  %vm668_vm0 = vcmask 916480   ;;  %vm749_vm1 = vcmask 261120  }
  0x13   :  { %388 = vmatpush.bf16.msra.mxu0 %v2533_v0  ;;  %2552 = vmatpush.bf16.msra.mxu1 %v2533_v0  ;;  %v2531_v2 = vld [vmem:[%s3490_s2 + $0x28] sm:$0xff]  ;;  %v2530_v3 = vld [vmem:[%s3490_s2 + $0x20] sm:$0xff]  ;;  %v2529_v4 = vld [vmem:[%s3490_s2 + $0x18] sm:$0xff]  ;;  %vm767_vm2 = vcmask 785408   ;;  %vm909_vm7 = vcmask 523264   ;;  %s794_s18 = sld [smem:[#allocation4]] }
  0x14   :  { %2553 = vmatpush.bf16.msra.mxu2 %v2533_v0  ;;  %2554 = vmatpush.bf16.msra.mxu3 %v2533_v0  ;;  %v2528_v5 = vld [vmem:[%s3490_s2 + $0x10] sm:$0xff]  ;;  %v2527_v6 = vld [vmem:[%s3490_s2 + $0x8] sm:$0xff]  ;;  %v2526_v7 = vld [vmem:[%s3490_s2] sm:$0xff]  ;;  %s2390_s2 = sld [smem:[#allocation4 + $0x1]]  ;;  %s2194_s21 = sshll.u32 %s3497_s9, 4  ;;  %s2195_s21 = int_to_ptr.hbm [resolvable:$true] %s2194_s21 }
  0x15   :  { %v2495_v8 = vld [vmem:[#allocation5] sm:$0xff]  ;;  %v2496_v9 = vld [vmem:[#allocation5 + $0x8] sm:$0xff]  ;;  %v2497_v10 = vld [vmem:[#allocation5 + $0x10] sm:$0xff]  ;;  %s2846_s22 = smov 2  }
  0x16   :  { %v2511_v11 = vld [vmem:[#allocation5 + $0x80] sm:$0xff]  ;;  %v2498_v12 = vld [vmem:[#allocation5 + $0x18] sm:$0xff]  ;;  %v2512_v13 = vld [vmem:[#allocation5 + $0x88] sm:$0xff] }
  0x17   :  { %389 = vmatpush.bf16.msra.mxu0 %v2532_v1  ;;  %2555 = vmatpush.bf16.msra.mxu1 %v2532_v1  ;;  %v2499_v14 = vld [vmem:[#allocation5 + $0x20] sm:$0xff]  ;;  %v2513_v15 = vld [vmem:[#allocation5 + $0x90] sm:$0xff]  ;;  %v2500_v16 = vld [vmem:[#allocation5 + $0x28] sm:$0xff] }
  0x18   :  { %2556 = vmatpush.bf16.msra.mxu2 %v2532_v1  ;;  %2557 = vmatpush.bf16.msra.mxu3 %v2532_v1  ;;  %v2514_v17 = vld [vmem:[#allocation5 + $0x98] sm:$0xff]  ;;  %v2517_v18 = vld [vmem:[#allocation5 + $0xb0] sm:$0xff]  ;;  %v2515_v20 = vld [vmem:[#allocation5 + $0xa0] sm:$0xff] }
  0x19   :  { %v2501_v19 = vld [vmem:[#allocation5 + $0x30] sm:$0xff]  ;;  %v2518_v21 = vld [vmem:[#allocation5 + $0xb8] sm:$0xff]  ;;  %v2516_v23 = vld [vmem:[#allocation5 + $0xa8] sm:$0xff] }
  0x1a   :  { %v2502_v22 = vld [vmem:[#allocation5 + $0x38] sm:$0xff]  ;;  %v2519_v24 = vld [vmem:[#allocation5 + $0xc0] sm:$0xff]  ;;  %v2520_v28 = vld [vmem:[#allocation5 + $0xc8] sm:$0xff] }
  0x1b   :  { %390 = vmatpush.bf16.msra.mxu0 %v2531_v2  ;;  %2558 = vmatpush.bf16.msra.mxu1 %v2531_v2  ;;  %v2523_v25 = vld [vmem:[#allocation5 + $0xe0] sm:$0xff]  ;;  %v2935_v29 = vld [vmem:[%s3491_s3] ss:$0 sm:$0xff]  ;;  %v2524_v30 = vld [vmem:[#allocation5 + $0xe8] sm:$0xff] }
  0x1c   :  { %2559 = vmatpush.bf16.msra.mxu2 %v2531_v2  ;;  %2560 = vmatpush.bf16.msra.mxu3 %v2531_v2  ;;  %v2503_v26 = vld [vmem:[#allocation5 + $0x40] sm:$0xff]  ;;  %v2504_v37 = vld [vmem:[#allocation5 + $0x48] sm:$0xff]  ;;  %v2521_v39 = vld [vmem:[#allocation5 + $0xd0] sm:$0xff] }
  0x1d   :  { %v2525_v40 = vld [vmem:[#allocation5 + $0xf0] sm:$0xff]  ;;  %v2522_v50 = vld [vmem:[#allocation5 + $0xd8] sm:$0xff] }
  0x1e   :  { %v2505_v48 = vld [vmem:[#allocation5 + $0x50] sm:$0xff]  ;;  %v2506_v59 = vld [vmem:[#allocation5 + $0x58] sm:$0xff] }
  0x1f   :  { %391 = vmatpush.bf16.msra.mxu0 %v2530_v3  ;;  %2561 = vmatpush.bf16.msra.mxu1 %v2530_v3 }
  0x20   :  { %2562 = vmatpush.bf16.msra.mxu2 %v2530_v3  ;;  %2563 = vmatpush.bf16.msra.mxu3 %v2530_v3 }
  0x23   :  { %392 = vmatpush.bf16.msra.mxu0 %v2529_v4  ;;  %2564 = vmatpush.bf16.msra.mxu1 %v2529_v4 }
  0x24   :  { %2565 = vmatpush.bf16.msra.mxu2 %v2529_v4  ;;  %2566 = vmatpush.bf16.msra.mxu3 %v2529_v4 }
  0x27   :  { %393 = vmatpush.bf16.msra.mxu0 %v2528_v5  ;;  %2567 = vmatpush.bf16.msra.mxu1 %v2528_v5 }
  0x28   :  { %2568 = vmatpush.bf16.msra.mxu2 %v2528_v5  ;;  %2569 = vmatpush.bf16.msra.mxu3 %v2528_v5  ;;  %v2507_v5 = vld [vmem:[#allocation5 + $0x60] sm:$0xff] }
  0x2b   :  { %394 = vmatpush.bf16.msra.mxu0 %v2527_v6  ;;  %2570 = vmatpush.bf16.msra.mxu1 %v2527_v6 }
  0x2c   :  { %2571 = vmatpush.bf16.msra.mxu2 %v2527_v6  ;;  %2572 = vmatpush.bf16.msra.mxu3 %v2527_v6 }
  0x2f   :  { %395 = vmatpush.bf16.msra.mxu0 %v2526_v7  ;;  %2573 = vmatpush.bf16.msra.mxu1 %v2526_v7 }
  0x30   :  { %2574 = vmatpush.bf16.msra.mxu2 %v2526_v7  ;;  %2575 = vmatpush.bf16.msra.mxu3 %v2526_v7 }
  0x32   :  { %396 = vmatmul.bf16.vlgmr.msra.gmra.mxu0 %v2495_v8  ;;  %476 = vmatmul.bf16.vlgmr.msra.gmra.mxu1 %v2511_v11 }
  0x33   :  { %506 = vmatmul.bf16.vlgmr.msra.gmra.mxu2 %v2517_v18  ;;  %536 = vmatmul.bf16.vlgmr.msra.gmra.mxu3 %v2523_v25 }
  0x42   :  { %401 = vmatmul.bf16.gmra.mxu0 %v2496_v9  ;;  %481 = vmatmul.bf16.gmra.mxu1 %v2512_v13 }
  0x43   :  { %511 = vmatmul.bf16.gmra.mxu2 %v2518_v21  ;;  %541 = vmatmul.bf16.gmra.mxu3 %v2524_v30 }
  0x52   :  { %406 = vmatmul.bf16.gmra.mxu0 %v2497_v10  ;;  %486 = vmatmul.bf16.gmra.mxu1 %v2513_v15  ;;  %v2508_v10 = vld [vmem:[#allocation5 + $0x68] sm:$0xff] }
  0x53   :  { %516 = vmatmul.bf16.gmra.mxu2 %v2519_v24  ;;  %546 = vmatmul.bf16.gmra.mxu3 %v2525_v40  ;;  %v2510_v24 = vld [vmem:[#allocation5 + $0x78] sm:$0xff] }
  0x62   :  { %411 = vmatmul.bf16.gmra.mxu0 %v2498_v12  ;;  %491 = vmatmul.bf16.gmra.mxu1 %v2514_v17  ;;  %v2509_v17 = vld [vmem:[#allocation5 + $0x70] sm:$0xff] }
  0x63   :  { %521 = vmatmul.bf16.gmra.mxu2 %v2520_v28 }
  0x72   :  { %416 = vmatmul.bf16.gmra.mxu0 %v2499_v14  ;;  %496 = vmatmul.bf16.gmra.mxu1 %v2515_v20 }
  0x73   :  { %526 = vmatmul.bf16.gmra.mxu2 %v2521_v39 }
  0x82   :  { %421 = vmatmul.bf16.gmra.mxu0 %v2500_v16  ;;  %501 = vmatmul.bf16.gmra.mxu1 %v2516_v23 }
  0x83   :  { %531 = vmatmul.bf16.gmra.mxu2 %v2522_v50 }
  0x92   :  { %426 = vmatmul.bf16.gmra.mxu0 %v2501_v19 }
  0xa2   :  { %431 = vmatmul.bf16.gmra.mxu0 %v2502_v22 }
  0xaf   :  { %v397_v27 = vpop.f32.mrf.mxu0  ;;  %v2945_v47 = vpop.f32.mrf.mxu1 }
  0xb0   :  { %v398_v31 = vadd.f32 %v2935_v29, %v397_v27 }
  0xb2   :  { %436 = vmatmul.bf16.gmra.mxu0 %v2503_v26  ;;  %v552_v34 = vmax.f32 %v398_v31, 0.0 }
  0xb6   :  { %v507_v13 = vpop.f32.mrf.mxu2 }
  0xb7   :  { %v399_v32 = vpop.f32.mrf.mxu0  ;;  %v2947_v51 = vpop.f32.mrf.mxu1  ;;  %v508_v31 = vadd.f32 %v2935_v29, %v507_v13 }
  0xb8   :  { %v400_v33 = vadd.f32 %v2935_v29, %v399_v32 }
  0xba   :  { %v553_v35 = vmax.f32 %v400_v33, 0.0 }
  0xbc   :  { %v2939_v36 = vpack.c.bf16 %v553_v35, %v552_v34  ;;  %v596_v34 = vmax.f32 %v508_v31, 0.0 }
  0xbe   :  { %v509_v16 = vpop.f32.mrf.mxu2 }
  0xbf   :  { %v402_v38 = vpop.f32.mrf.mxu0  ;;  %v2953_v58 = vpop.f32.mrf.mxu1  ;;  %v510_v32 = vadd.f32 %v2935_v29, %v509_v16 }
  0xc0   :  { %v403_v41 = vadd.f32 %v2935_v29, %v402_v38 }
  0xc1   :  { %v597_v35 = vmax.f32 %v510_v32, 0.0 }
  0xc2   :  { %441 = vmatmul.bf16.gmra.mxu0 %v2504_v37  ;;  %v554_v44 = vmax.f32 %v403_v41, 0.0 }
  0xc6   :  { %v512_v20 = vpop.f32.mrf.mxu2 }
  0xc7   :  { %v404_v42 = vpop.f32.mrf.mxu0  ;;  %v2955_v61 = vpop.f32.mrf.mxu1  ;;  %v513_v25 = vadd.f32 %v2935_v29, %v512_v20 }
  0xc8   :  { %v405_v43 = vadd.f32 %v2935_v29, %v404_v42  ;;  %v640_v42 = vpack.c.bf16 %v597_v35, %v596_v34 }
  0xc9   :  { %v598_v28 = vmax.f32 %v513_v25, 0.0 }
  0xca   :  { %v555_v45 = vmax.f32 %v405_v43, 0.0 }
  0xcc   :  { %v2943_v46 = vpack.c.bf16 %v555_v45, %v554_v44 }
  0xce   :  { %v514_v23 = vpop.f32.mrf.mxu2 }
  0xcf   :  { %v407_v49 = vpop.f32.mrf.mxu0  ;;  %v487_v4 = vpop.f32.mrf.mxu1  ;;  %v515_v26 = vadd.f32 %v2935_v29, %v514_v23 }
  0xd0   :  { %v408_v52 = vadd.f32 %v2935_v29, %v407_v49 }
  0xd1   :  { %v599_v30 = vmax.f32 %v515_v26, 0.0 }
  0xd2   :  { %446 = vmatmul.bf16.gmra.mxu0 %v2505_v48  ;;  %v556_v55 = vmax.f32 %v408_v52, 0.0  ;;  %v2977_v52 = vpop.f32.mrf.mxu3 }
  0xd3   :  { %v641_v33 = vpack.c.bf16 %v599_v30, %v598_v28  ;;  %v480_v30 = vadd.f32 %v2935_v29, %v2947_v51 }
  0xd5   :  { %700 = vmatpush.bf16.msrb.mxu3 %v641_v33 }
  0xd6   :  { %v2969_v38 = vpop.f32.mrf.mxu2 }
  0xd7   :  { %v409_v53 = vpop.f32.mrf.mxu0  ;;  %v489_v7 = vpop.f32.mrf.mxu1 }
  0xd8   :  { %v410_v54 = vadd.f32 %v2935_v29, %v409_v53 }
  0xd9   :  { %701 = vmatpush.bf16.msrb.mxu3 %v640_v42 }
  0xda   :  { %v557_v56 = vmax.f32 %v410_v54, 0.0 }
  0xdc   :  { %v2951_v57 = vpack.c.bf16 %v557_v56, %v556_v55 }
  0xde   :  { %v2984_v13 = vpop.f32.mrf.mxu2 }
  0xdf   :  { %v412_v60 = vpop.f32.mrf.mxu0  ;;  %v492_v9 = vpop.f32.mrf.mxu1 }
  0xe0   :  { %v413_v62 = vadd.f32 %v2935_v29, %v412_v60  ;;  %v493_v16 = vadd.f32 %v2935_v29, %v492_v9  ;;  %v2995_v9 = vpop.f32.mrf.mxu3 }
  0xe2   :  { %451 = vmatmul.bf16.gmra.mxu0 %v2506_v59  ;;  %v558_v1 = vmax.f32 %v413_v62, 0.0 }
  0xe7   :  { %v414_v63 = vpop.f32.mrf.mxu0  ;;  %v494_v12 = vpop.f32.mrf.mxu1 }
  0xe8   :  { %v415_v0 = vadd.f32 %v2935_v29, %v414_v63 }
  0xea   :  { %v559_v2 = vmax.f32 %v415_v0, 0.0 }
  0xec   :  { %v2959_v3 = vpack.c.bf16 %v559_v2, %v558_v1 }
  0xef   :  { %v2961_v6 = vpop.f32.mrf.mxu0  ;;  %v497_v15 = vpop.f32.mrf.mxu1 }
  0xf0   :  { %v498_v55 = vadd.f32 %v2935_v29, %v497_v15  ;;  %v490_v15 = vadd.f32 %v2935_v29, %v489_v7  ;;  %v483_v7 = vadd.f32 %v2935_v29, %v2953_v58  ;;  %v3003_v58 = vpop.f32.mrf.mxu2 }
  0xf2   :  { %456 = vmatmul.bf16.gmra.mxu0 %v2507_v5  ;;  %v592_v0 = vmax.f32 %v498_v55, 0.0  ;;  %v586_v32 = vmax.f32 %v483_v7, 0.0 }
  0xf7   :  { %v2963_v8 = vpop.f32.mrf.mxu0  ;;  %v499_v19 = vpop.f32.mrf.mxu1 }
  0xf8   :  { %v500_v56 = vadd.f32 %v2935_v29, %v499_v19 }
  0xfa   :  { %v593_v1 = vmax.f32 %v500_v56, 0.0 }
  0xff   :  { %v422_v11 = vpop.f32.mrf.mxu0  ;;  %v502_v22 = vpop.f32.mrf.mxu1 }
 0x100   :  { %v503_v40 = vadd.f32 %v2935_v29, %v502_v22  ;;  %v423_v2 = vadd.f32 %v2935_v29, %v422_v11 }
 0x102   :  { %461 = vmatmul.bf16.gmra.mxu0 %v2508_v10  ;;  %v594_v48 = vmax.f32 %v503_v40, 0.0  ;;  %v488_v10 = vadd.f32 %v2935_v29, %v487_v4  ;;  %v418_v4 = vadd.f32 %v2935_v29, %v2961_v6  ;;  %v562_v23 = vmax.f32 %v423_v2, 0.0  ;;  %v542_v40 = vpop.f32.mrf.mxu3 }
 0x103   :  { %v478_v6 = vadd.f32 %v2935_v29, %v2945_v47  ;;  %v585_v47 = vmax.f32 %v480_v30, 0.0 }
 0x104   :  { %v560_v28 = vmax.f32 %v418_v4, 0.0 }
 0x107   :  { %v424_v14 = vpop.f32.mrf.mxu0  ;;  %v504_v37 = vpop.f32.mrf.mxu1 }
 0x108   :  { %v505_v41 = vadd.f32 %v2935_v29, %v504_v37  ;;  %v425_v59 = vadd.f32 %v2935_v29, %v424_v14  ;;  %v495_v14 = vadd.f32 %v2935_v29, %v494_v12  ;;  %v485_v12 = vadd.f32 %v2935_v29, %v2955_v61 }
 0x10a   :  { %v595_v49 = vmax.f32 %v505_v41, 0.0  ;;  %v563_v20 = vmax.f32 %v425_v59, 0.0  ;;  %v591_v22 = vmax.f32 %v495_v14, 0.0  ;;  %v587_v61 = vmax.f32 %v485_v12, 0.0 }
 0x10c   :  { %v639_v60 = vpack.c.bf16 %v595_v49, %v594_v48  ;;  %v635_v51 = vpack.c.bf16 %v587_v61, %v586_v32  ;;  %v544_v49 = vpop.f32.mrf.mxu3 }
 0x10e   :  { %702 = vmatpush.bf16.msrb.mxu3 %v639_v60 }
 0x10f   :  { %v427_v18 = vpop.f32.mrf.mxu0 }
 0x110   :  { %v428_v50 = vadd.f32 %v2935_v29, %v427_v18  ;;  %v420_v18 = vadd.f32 %v2935_v29, %v2963_v8  ;;  %v588_v8 = vmax.f32 %v488_v10, 0.0 }
 0x112   :  { %466 = vmatmul.bf16.gmra.mxu0 %v2509_v17  ;;  %v564_v5 = vmax.f32 %v428_v50, 0.0  ;;  %v638_v17 = vpack.c.bf16 %v593_v1, %v592_v0  ;;  %v561_v26 = vmax.f32 %v420_v18, 0.0 }
 0x114   :  { %703 = vmatpush.bf16.msrb.mxu3 %v638_v17  ;;  %v622_v37 = vpack.c.bf16 %v561_v26, %v560_v28  ;;  %v547_v56 = vpop.f32.mrf.mxu3 }
 0x117   :  { %v429_v21 = vpop.f32.mrf.mxu0 }
 0x118   :  { %v430_v44 = vadd.f32 %v2935_v29, %v429_v21  ;;  %v590_v21 = vmax.f32 %v493_v16, 0.0  ;;  %v545_v16 = vadd.f32 %v2935_v29, %v544_v49 }
 0x11a   :  { %v565_v62 = vmax.f32 %v430_v44, 0.0  ;;  %v637_v25 = vpack.c.bf16 %v591_v22, %v590_v21  ;;  %v524_v44 = vpop.f32.mrf.mxu2  ;;  %v538_v21 = vadd.f32 %v2935_v29, %v2977_v52  ;;  %v540_v22 = vadd.f32 %v2935_v29, %v2995_v9 }
 0x11c   :  { %v624_v11 = vpack.c.bf16 %v565_v62, %v564_v5  ;;  %704 = vmatpush.bf16.msrb.mxu3 %v637_v25  ;;  %v549_v0 = vpop.f32.mrf.mxu3  ;;  %v609_v7 = vmax.f32 %v540_v22, 0.0 }
 0x11d   :  { %v550_v1 = vadd.f32 %v2935_v29, %v549_v0  ;;  %v2374_v0 = vld [vmem:[%s3492_s4 + $0x8] sm:$0xf] }
 0x11f   :  { %v432_v27 = vpop.f32.mrf.mxu0  ;;  %v613_v5 = vmax.f32 %v550_v1, 0.0 }
 0x120   :  { %v433_v39 = vadd.f32 %v2935_v29, %v432_v27  ;;  %v623_v27 = vpack.c.bf16 %v563_v20, %v562_v23  ;;  %v608_v23 = vmax.f32 %v538_v21, 0.0 }
 0x122   :  { %471 = vmatmul.bf16.gmra.mxu0 %v2510_v24  ;;  %v566_v53 = vmax.f32 %v433_v39, 0.0  ;;  %v589_v24 = vmax.f32 %v490_v15, 0.0  ;;  %v584_v39 = vmax.f32 %v478_v6, 0.0  ;;  %v527_v50 = vpop.f32.mrf.mxu2  ;;  %v543_v15 = vadd.f32 %v2935_v29, %v542_v40 }
 0x123   :  { %v646_v26 = vpack.c.bf16 %v609_v7, %v608_v23  ;;  %v528_v52 = vadd.f32 %v2935_v29, %v527_v50 }
 0x124   :  { %v636_v33 = vpack.c.bf16 %v589_v24, %v588_v8  ;;  %v610_v18 = vmax.f32 %v543_v15, 0.0 }
 0x126   :  { %705 = vmatpush.bf16.msrb.mxu3 %v636_v33  ;;  %v518_v33 = vadd.f32 %v2935_v29, %v2969_v38 }
 0x127   :  { %v434_v43 = vpop.f32.mrf.mxu0 }
 0x128   :  { %v435_v45 = vadd.f32 %v2935_v29, %v434_v43 }
 0x12a   :  { %v567_v54 = vmax.f32 %v435_v45, 0.0  ;;  %706 = vmatpush.bf16.msrb.mxu3 %v635_v51  ;;  %v634_v45 = vpack.c.bf16 %v585_v47, %v584_v39  ;;  %v529_v62 = vpop.f32.mrf.mxu2 }
 0x12b   :  { %v530_v9 = vadd.f32 %v2935_v29, %v529_v62 }
 0x12c   :  { %v625_v63 = vpack.c.bf16 %v567_v54, %v566_v53 }
 0x12d   :  { %v605_v32 = vmax.f32 %v530_v9, 0.0  ;;  %v2539_v9 = vld [vmem:[%s3493_s5 + $0x8] sm:$0xff] }
 0x12e   :  { %672 = vmatpush.bf16.msrb.mxu1 %v625_v63  ;;  %707 = vmatpush.bf16.msrb.mxu3 %v634_v45  ;;  %v600_v45 = vmax.f32 %v518_v33, 0.0 }
 0x12f   :  { %v437_v19 = vpop.f32.mrf.mxu0 }
 0x130   :  { %v438_v31 = vadd.f32 %v2935_v29, %v437_v19  ;;  %v611_v19 = vmax.f32 %v545_v16, 0.0 }
 0x132   :  { %673 = vmatpush.bf16.msrb.mxu1 %v624_v11  ;;  %v568_v41 = vmax.f32 %v438_v31, 0.0  ;;  %v532_v10 = vpop.f32.mrf.mxu2  ;;  %v647_v4 = vpack.c.bf16 %v611_v19, %v610_v18  ;;  %v604_v31 = vmax.f32 %v528_v52, 0.0  ;;  %v2535_v19 = vld [vmem:[%s3492_s4 + $0xc] sm:$0xf] }
 0x133   :  { %v533_v24 = vadd.f32 %v2935_v29, %v532_v10 }
 0x135   :  { %v606_v28 = vmax.f32 %v533_v24, 0.0 }
 0x136   :  { %674 = vmatpush.bf16.msrb.mxu1 %v623_v27 }
 0x137   :  { %v439_v34 = vpop.f32.mrf.mxu0 }
 0x138   :  { %v440_v35 = vadd.f32 %v2935_v29, %v439_v34  ;;  %v523_v34 = vadd.f32 %v2935_v29, %v3003_v58 }
 0x13a   :  { %v569_v42 = vmax.f32 %v440_v35, 0.0  ;;  %675 = vmatpush.bf16.msrb.mxu1 %v622_v37  ;;  %v534_v8 = vpop.f32.mrf.mxu2  ;;  %v525_v35 = vadd.f32 %v2935_v29, %v524_v44  ;;  %v644_v37 = vpack.c.bf16 %v605_v32, %v604_v31  ;;  %v602_v47 = vmax.f32 %v523_v34, 0.0 }
 0x13b   :  { %v535_v25 = vadd.f32 %v2935_v29, %v534_v8 }
 0x13c   :  { %v3007_v43 = vpack.c.bf16 %v569_v42, %v568_v41  ;;  %v603_v41 = vmax.f32 %v525_v35, 0.0 }
 0x13d   :  { %v607_v6 = vmax.f32 %v535_v25, 0.0 }
 0x13e   :  { %676 = vmatpush.bf16.msrb.mxu1 %v2959_v3  ;;  %v643_v49 = vpack.c.bf16 %v603_v41, %v602_v47 }
 0x13f   :  { %v442_v48 = vpop.f32.mrf.mxu0  ;;  %v645_v30 = vpack.c.bf16 %v607_v6, %v606_v28  ;;  %v2534_v6 = vld [vmem:[%s3492_s4 + $0x4] sm:$0xf] }
 0x140   :  { %v443_v53 = vadd.f32 %v2935_v29, %v442_v48  ;;  %v520_v48 = vadd.f32 %v2935_v29, %v2984_v13  ;;  %v2536_v13 = vld [vmem:[%s3492_s4 + $0xc] sm:$0xf0] }
 0x142   :  { %677 = vmatpush.bf16.msrb.mxu1 %v2951_v57  ;;  %v570_v59 = vmax.f32 %v443_v53, 0.0  ;;  %v548_v57 = vadd.f32 %v2935_v29, %v547_v56  ;;  %v601_v38 = vmax.f32 %v520_v48, 0.0  ;;  %v2613_v48 = vld [vmem:[%s3495_s7] ss:$0 sm:$0xff]  ;;  %s2841_s7 = smov 96  }
 0x144   :  { %v612_v2 = vmax.f32 %v548_v57, 0.0  ;;  %v642_v58 = vpack.c.bf16 %v601_v38, %v600_v45  ;;  %v2537_v57 = vld [vmem:[%s3492_s4 + $0x14] sm:$0xf0] }
 0x145   :  { %v2375_v1 = vor.u32 %v2537_v57, %v2374_v0 }
 0x146   :  { %678 = vmatpush.bf16.msrb.mxu1 %v2943_v46  ;;  %v648_v14 = vpack.c.bf16 %v613_v5, %v612_v2 }
 0x147   :  { %v444_v54 = vpop.f32.mrf.mxu0  ;;  %708 = vmatmul.bf16.vlgmr.msrb.gmra.mxu3 %v2375_v1 }
 0x148   :  { %v445_v55 = vadd.f32 %v2935_v29, %v444_v54 }
 0x14a   :  { %v571_v60 = vmax.f32 %v445_v55, 0.0  ;;  %679 = vmatpush.bf16.msrb.mxu1 %v2939_v36 }
 0x14c   :  { %v3015_v3 = vpack.c.bf16 %v571_v60, %v570_v59  ;;  %v2366_v60 = vld [vmem:[%s3492_s4] sm:$0xf] }
 0x14d   :  { %v2367_v62 = vor.u32 %v2536_v13, %v2366_v60 }
 0x14e   :  { %715 = vmatpush.bf16.msra.mxu1 %v648_v14 }
 0x14f   :  { %v447_v63 = vpop.f32.mrf.mxu0  ;;  %680 = vmatmul.bf16.vlgmr.msrb.gmra.mxu1 %v2367_v62 }
 0x150   :  { %v448_v46 = vadd.f32 %v2935_v29, %v447_v63 }
 0x152   :  { %v572_v20 = vmax.f32 %v448_v46, 0.0  ;;  %716 = vmatpush.bf16.msra.mxu1 %v647_v4 }
 0x156   :  { %717 = vmatpush.bf16.msra.mxu1 %v646_v26 }
 0x157   :  { %v449_v36 = vpop.f32.mrf.mxu0 }
 0x158   :  { %v450_v17 = vadd.f32 %v2935_v29, %v449_v36 }
 0x15a   :  { %v573_v11 = vmax.f32 %v450_v17, 0.0  ;;  %718 = vmatpush.bf16.msra.mxu1 %v645_v30  ;;  %v3086_v30 = vld [vmem:[%s3496_s8] sm:$0x7]  ;;  %s2842_s8 = smov 32  }
 0x15b   :  { %v3089_v31 = vperm.slane %v3086_v30, 0 }
 0x15c   :  { %v3027_v12 = vpack.c.bf16 %v573_v11, %v572_v20  ;;  %v2376_v20 = vld [vmem:[%s3492_s4 + $0x18] sm:$0xf0] }
 0x15d   :  { %v2379_v11 = vor.u32 %v2535_v19, %v2376_v20  ;;  %821 = vrot.lane.b32.xlu0 %v3089_v31, %s2836_s20  ;;  %v2432_v20 = vld [vmem:[#allocation8 + $0x54] sm:$0xf0] }
 0x15e   :  { %719 = vmatpush.bf16.msra.mxu1 %v644_v37 }
 0x15f   :  { %v452_v27 = vpop.f32.mrf.mxu0 }
 0x160   :  { %v453_v61 = vadd.f32 %v2935_v29, %v452_v27 }
 0x162   :  { %v574_v42 = vmax.f32 %v453_v61, 0.0  ;;  %720 = vmatpush.bf16.msra.mxu1 %v643_v49 }
 0x166   :  { %721 = vmatpush.bf16.msra.mxu1 %v642_v58 }
 0x167   :  { %v454_v39 = vpop.f32.mrf.mxu0 }
 0x168   :  { %v455_v40 = vadd.f32 %v2935_v29, %v454_v39 }
 0x169   :  { %2380 = vmatmul.msk.bf16.vlgmr.msra.gmra.mxu1 %vm668_vm0, %v2379_v11  ;;  %v2418_v11 = vld [vmem:[#allocation8 + $0x30] sm:$0xf] }
 0x16a   :  { %v575_v51 = vmax.f32 %v455_v40, 0.0 }
 0x16c   :  { %v629_v50 = vpack.c.bf16 %v575_v51, %v574_v42 }
 0x16f   :  { %v457_v53 = vpop.f32.mrf.mxu0 }
 0x170   :  { %v458_v8 = vadd.f32 %v2935_v29, %v457_v53 }
 0x172   :  { %v576_v27 = vmax.f32 %v458_v8, 0.0 }
 0x177   :  { %v459_v44 = vpop.f32.mrf.mxu0 }
 0x178   :  { %v460_v4 = vadd.f32 %v2935_v29, %v459_v44 }
 0x17a   :  { %v577_v25 = vmax.f32 %v460_v4, 0.0  ;;  %v2546_v4 = vld [vmem:[#allocation8 + $0x34] sm:$0xf] }
 0x17c   :  { %v630_v28 = vpack.c.bf16 %v577_v25, %v576_v27  ;;  %v2544_v25 = vld [vmem:[#allocation8 + $0x20] sm:$0xf0]  ;;  %v2408_v27 = vld [vmem:[#allocation8 + $0x24] sm:$0xf0] }
 0x17f   :  { %v462_v54 = vpop.f32.mrf.mxu0 }
 0x180   :  { %v463_v21 = vadd.f32 %v2935_v29, %v462_v54 }
 0x182   :  { %v578_v24 = vmax.f32 %v463_v21, 0.0  ;;  %v2547_v21 = vld [vmem:[#allocation8 + $0x38] sm:$0xf0] }
 0x187   :  { %v464_v55 = vpop.f32.mrf.mxu0 }
 0x188   :  { %v465_v36 = vadd.f32 %v2935_v29, %v464_v55 }
 0x18a   :  { %v579_v23 = vmax.f32 %v465_v36, 0.0  ;;  %v2430_v36 = vld [vmem:[#allocation8 + $0x48] sm:$0xf] }
 0x18c   :  { %v631_v26 = vpack.c.bf16 %v579_v23, %v578_v24  ;;  %v2420_v23 = vld [vmem:[#allocation8 + $0x3c] sm:$0xf0]  ;;  %v2406_v24 = vld [vmem:[#allocation8 + $0x18] sm:$0xf] }
 0x18d   :  { %v3109_v8 = vor.u32 %v2546_v4, %v2420_v23 }
 0x18f   :  { %v467_v56 = vpop.f32.mrf.mxu0 }
 0x190   :  { %v468_v15 = vadd.f32 %v2935_v29, %v467_v56 }
 0x192   :  { %v580_v22 = vmax.f32 %v468_v15, 0.0 }
 0x197   :  { %v469_v59 = vpop.f32.mrf.mxu0 }
 0x198   :  { %v470_v46 = vadd.f32 %v2935_v29, %v469_v59 }
 0x19a   :  { %v581_v17 = vmax.f32 %v470_v46, 0.0 }
 0x19c   :  { %v632_v7 = vpack.c.bf16 %v581_v17, %v580_v22  ;;  %v2550_v17 = vld [vmem:[#allocation8 + $0x50] sm:$0xf0] }
 0x19d   :  { %v3100_v19 = vor.u32 %v2550_v17, %v2430_v36 }
 0x19f   :  { %v472_v63 = vpop.f32.mrf.mxu0  ;;  %917 = vmatpush.bf16.msra.mxu3 %v3100_v19  ;;  %1083 = vmatpush.bf16.msrb.mxu1 %v3100_v19 }
 0x1a0   :  { %v473_v2 = vadd.f32 %v2935_v29, %v472_v63 }
 0x1a2   :  { %v582_v16 = vmax.f32 %v473_v2, 0.0 }
 0x1a7   :  { %v474_v5 = vpop.f32.mrf.mxu0 }
 0x1a8   :  { %v475_v10 = vadd.f32 %v2935_v29, %v474_v5  ;;  %v2368_v29 = vld [vmem:[%s3492_s4 + $0x10] sm:$0xf0] }
 0x1a9   :  { %v2371_v52 = vor.u32 %v2534_v6, %v2368_v29 }
 0x1aa   :  { %v583_v14 = vmax.f32 %v475_v10, 0.0 }
 0x1ac   :  { %v633_v18 = vpack.c.bf16 %v583_v14, %v582_v16 }
 0x1ae   :  { %686 = vmatpush.bf16.msrb.mxu2 %v633_v18  ;;  %v2549_v18 = vld [vmem:[#allocation8 + $0x4c] sm:$0xf] }
 0x1af   :  { %v3102_v22 = vor.u32 %v2549_v18, %v2432_v20 }
 0x1b2   :  { %687 = vmatpush.bf16.msrb.mxu2 %v632_v7  ;;  %v3105_v7 = vor.u32 %v2547_v21, %v2418_v11 }
 0x1b4   :  { %918 = vmatpush.bf16.msra.mxu3 %v3105_v7  ;;  %1084 = vmatpush.bf16.msrb.mxu1 %v3105_v7 }
 0x1b6   :  { %688 = vmatpush.bf16.msrb.mxu2 %v631_v26  ;;  %v2543_v26 = vld [vmem:[#allocation8 + $0x1c] sm:$0xf] }
 0x1b7   :  { %v3116_v6 = vor.u32 %v2543_v26, %v2408_v27 }
 0x1ba   :  { %689 = vmatpush.bf16.msrb.mxu2 %v630_v28  ;;  %v3112_v28 = vor.u32 %v2544_v25, %v2406_v24 }
 0x1bc   :  { %919 = vmatpush.bf16.msra.mxu3 %v3112_v28  ;;  %1085 = vmatpush.bf16.msrb.mxu1 %v3112_v28 }
 0x1be   :  { %690 = vmatpush.bf16.msrb.mxu2 %v629_v50 }
 0x1c2   :  { %691 = vmatpush.bf16.msrb.mxu2 %v3027_v12 }
 0x1c6   :  { %692 = vmatpush.bf16.msrb.mxu2 %v3015_v3  ;;  %v2538_v3 = vld [vmem:[%s3493_s5] sm:$0xff] }
 0x1ca   :  { %693 = vmatpush.bf16.msrb.mxu2 %v3007_v43  ;;  %v709_v61 = vpop.f32.mrf.mxu3 }
 0x1cc   :  { %v681_v12 = vpop.f32.mrf.mxu1 }
 0x1cd   :  { %694 = vmatmul.bf16.vlgmr.msrb.gmra.mxu2 %v2371_v52 }
 0x1ce   :  { %759 = vmatpush.bf16.msra.mxu2 %v2539_v9 }
 0x1cf   :  { %v822_v1 = vpop.permute.xlu0 %821 }
 0x1d2   :  { %760 = vmatpush.bf16.msra.mxu2 %v2538_v3  ;;  %v711_v40 = vpop.f32.mrf.mxu3 }
 0x1d4   :  { %v683_v43 = vpop.f32.mrf.mxu1 }
 0x1d6   :  { %930 = vmatpush.bf16.msrb.mxu2 %v3102_v22 }
 0x1da   :  { %931 = vmatpush.bf16.msrb.mxu2 %v3109_v8 }
 0x1de   :  { %932 = vmatpush.bf16.msrb.mxu2 %v3116_v6 }
 0x1e6   :  { %v723_v33 = vpop.f32.mrf.mxu1 }
 0x1ee   :  { %v725_v41 = vpop.f32.mrf.mxu1 }
 0x250   :  { %v695_v32 = vpop.f32.mrf.mxu2 }
 0x251   :  { %v696_v34 = vadd.f32 %v695_v32, %v681_v12  ;;  %v2541_v32 = vld [vmem:[#allocation8 + $0x8] sm:$0xf0] }
 0x253   :  { %v710_v37 = vadd.f32 %v709_v61, %v696_v34  ;;  %v2540_v61 = vld [vmem:[#allocation8 + $0x4] sm:$0xf]  ;;  %v2396_v34 = vld [vmem:[#allocation8 + $0xc] sm:$0xf0] }
 0x255   :  { %v724_v42 = vadd.f32 %v723_v33, %v710_v37  ;;  %v2438_v37 = vld [vmem:[#allocation8 + $0x50] sm:$0xf] }
 0x258   :  { %v697_v35 = vpop.f32.mrf.mxu2 }
 0x259   :  { %v698_v39 = vadd.f32 %v697_v35, %v683_v43  ;;  %v2394_v43 = vld [vmem:[#allocation8] sm:$0xf]  ;;  %v3127_v35 = vor.u32 %v2540_v61, %v2396_v34 }
 0x25a   :  { %v3125_v33 = vor.u32 %v2541_v32, %v2394_v43 }
 0x25b   :  { %v712_v47 = vadd.f32 %v711_v40, %v698_v39  ;;  %933 = vmatpush.bf16.msrb.mxu2 %v3127_v35  ;;  %v2551_v39 = vld [vmem:[#allocation8 + $0x58] sm:$0xf0] }
 0x25c   :  { %920 = vmatpush.bf16.msra.mxu3 %v3125_v33  ;;  %1086 = vmatpush.bf16.msrb.mxu1 %v3125_v33  ;;  %v3133_v40 = vor.u32 %v2551_v39, %v2438_v37 }
 0x25d   :  { %v726_v51 = vadd.f32 %v725_v41, %v712_v47  ;;  %v2426_v47 = vld [vmem:[#allocation8 + $0x38] sm:$0xf]  ;;  %v2548_v41 = vld [vmem:[#allocation8 + $0x40] sm:$0xf0] }
 0x25f   :  { %v728_v45 = vpack.c.bf16 %v726_v51, %v724_v42  ;;  %v3137_v42 = vor.u32 %v2548_v41, %v2426_v47  ;;  %v2414_v51 = vld [vmem:[#allocation8 + $0x20] sm:$0xf] }
 0x260   :  { %1249 = vmatpush.bf16.msra.mxu1 %v3100_v19  ;;  %943 = vmatpush.bf16.msrb.mxu3 %v3133_v40 }
 0x261   :  { %2389 = vmatmul.msk.bf16.vlgmr.msra.gmra.mxu2 %vm749_vm1, %v728_v45  ;;  %v2545_v45 = vld [vmem:[#allocation8 + $0x28] sm:$0xf0] }
 0x262   :  { %1096 = vmatpush.bf16.msra.mxu2 %v3102_v22 }
 0x264   :  { %1250 = vmatpush.bf16.msra.mxu1 %v3105_v7  ;;  %944 = vmatpush.bf16.msrb.mxu3 %v3137_v42 }
 0x266   :  { %1097 = vmatpush.bf16.msra.mxu2 %v3109_v8 }
 0x268   :  { %1251 = vmatpush.bf16.msra.mxu1 %v3112_v28 }
 0x26a   :  { %1098 = vmatpush.bf16.msra.mxu2 %v3116_v6 }
 0x26c   :  { %1252 = vmatpush.bf16.msra.mxu1 %v3125_v33 }
 0x26e   :  { %1099 = vmatpush.bf16.msra.mxu2 %v3127_v35 }
 0x2e4   :  { %v762_v49 = vpop.f32.mrf.mxu2 }
 0x2e5   :  { %v763_v38 = vadd.f32 %v2613_v48, %v762_v49  ;;  %v2402_v49 = vld [vmem:[#allocation8 + $0x8] sm:$0xf] }
 0x2e7   :  { %768 = vst.msk [vmem:[#allocation2] sm:$0xff] %vm767_vm2, %v763_v38  ;;  %v2542_v38 = vld [vmem:[#allocation8 + $0x10] sm:$0xf0] }
 0x2ec   :  { %v764_v50 = vpop.f32.mrf.mxu2 }
 0x2ed   :  { %v765_v58 = vadd.f32 %v2613_v48, %v764_v50  ;;  %v3142_v48 = vor.u32 %v2545_v45, %v2414_v51  ;;  %v3147_v50 = vor.u32 %v2542_v38, %v2402_v49 }
 0x2ee   :  { %v800_v53 = vld [vmem:[#allocation2] sm:$0x3] }
 0x2ef   :  { %v801_v44 = vadd.f32 %v800_v53, %v3089_v31  ;;  %769 = vst.msk [vmem:[#allocation2 + $0x8] sm:$0xff] %vm767_vm2, %v765_v58  ;;  %945 = vmatpush.bf16.msrb.mxu3 %v3142_v48 }
 0x2f1   :  { %v2391_v54 = vmul.f32 -1.442695, %v801_v44 }
 0x2f3   :  { %2614 = vpow2.f32 %v2391_v54  ;;  %946 = vmatpush.bf16.msrb.mxu3 %v3147_v50  ;;  %v3169_v54 = vperm.slane %v3086_v30, 1 }
 0x2f9   :  { %v2615_v55 = vpop.eup %2614 }
 0x2fa   :  { %v805_v56 = vadd.f32 1.0, %v2615_v55 }
 0x2fc   :  { %2616 = vrcp.f32 %v805_v56  ;;  %v817_v62 = vand.u32 2147483648, %v805_v56  ;;  %v815_v0 = vand.u32 2147483647, %v805_v56  ;;  %vm811_vm4 = vweird.f32 %v805_v56 }
 0x2fe   :  { %v818_v2 = vor.u32 1.1754944e-38, %v817_v62  ;;  %vm816_vm6 = vcmp.eq.f32.partialorder %v815_v0, 8.507059e+37 }
 0x302   :  { %v2617_v59 = vpop.eup %2616 }
 0x303   :  { %v807_v60 = vmul.f32 %v2617_v59, %v805_v56  ;;  %vm812_vm3 = vweird.f32 %v2617_v59 }
 0x304   :  { %vm813_vm5 = vmor %vm811_vm4, %vm812_vm3 }
 0x305   :  { %v808_v13 = vsub.f32 1.0, %v807_v60 }
 0x307   :  { %v809_v63 = vmul.f32 %v2617_v59, %v808_v13 }
 0x309   :  { %v810_v57 = vadd.f32 %v2617_v59, %v809_v63  ;;  %v3179_v63 = vperm.slane %v3086_v30, 2 }
 0x30b   :  { %v814_v5 = vsel %vm813_vm5, %v2617_v59, %v810_v57 }
 0x30c   :  { %v819_v46 = vsel %vm816_vm6, %v818_v2, %v814_v5  ;;  %v1026_v2 = vld [vmem:[#allocation2 + $0x2] sm:$0x3] }
 0x30d   :  { %v824_v10 = vmul.f32 %v822_v1, %v819_v46  ;;  %v831_v29 = vsub.f32 1.0, %v819_v46  ;;  %v837_v9 = vmul.f32 0.0, %v819_v46 }
 0x30f   :  { %826 = vrot.lane.b32.xlu0 %v824_v10, %s2836_s20 }
 0x381   :  { %v827_v15 = vpop.permute.xlu0 %826 }
 0x382   :  { %v829_v16 = vadd.f32 %v827_v15, %v800_v53 }
 0x384   :  { %2618 = vtanh.f32 %v829_v16 }
 0x38a   :  { %v2619_v14 = vpop.eup %2618 }
 0x38b   :  { %833 = vrot.lane.b32.xlu1 %v2619_v14, %s2841_s7 }
 0x3fd   :  { %v834_v52 = vpop.permute.xlu1 %833 }
 0x3fe   :  { %v836_v3 = vmul.f32 %v834_v52, %v831_v29 }
 0x400   :  { %v3121_v12 = vadd.f32 %v837_v9, %v836_v3 }
 0x402   :  { %840 = vrot.lane.b32.xlu1 %v3121_v12, %s2841_s7 }
 0x474   :  { %v841_v58 = vpop.permute.xlu1 %840 }
 0x475   :  { %v843_v53 = vsel %vm749_vm1, %v841_v58, 0.0 }
 0x476   :  { %v844_v44 = vpack.c.bf16 %v843_v53, %v843_v53 }
 0x478   :  { %2440 = vmatmul.msk.bf16.vlgmr.msra.gmra.mxu3 %vm909_vm7, %v844_v44  ;;  %2441 = vmatmul.msk.bf16.vlgmr.msrb.gmra.mxu2 %vm909_vm7, %v844_v44 }
 0x479   :  { %1109 = vmatpush.bf16.msra.mxu3 %v3133_v40  ;;  %1262 = vmatpush.bf16.msrb.mxu2 %v3102_v22 }
 0x47d   :  { %1110 = vmatpush.bf16.msra.mxu3 %v3137_v42  ;;  %1263 = vmatpush.bf16.msrb.mxu2 %v3109_v8 }
 0x481   :  { %1111 = vmatpush.bf16.msra.mxu3 %v3142_v48  ;;  %1264 = vmatpush.bf16.msrb.mxu2 %v3116_v6 }
 0x485   :  { %1112 = vmatpush.bf16.msra.mxu3 %v3147_v50  ;;  %1265 = vmatpush.bf16.msrb.mxu2 %v3127_v35 }
 0x488   :  { %2442 = vmatmul.msk.bf16.vlgmr.msrb.gmra.mxu3 %vm909_vm7, %v844_v44 }
 0x489   :  { %1275 = vmatpush.bf16.msrb.mxu3 %v3133_v40 }
 0x48d   :  { %1276 = vmatpush.bf16.msrb.mxu3 %v3137_v42 }
 0x491   :  { %1277 = vmatpush.bf16.msrb.mxu3 %v3142_v48 }
 0x495   :  { %1278 = vmatpush.bf16.msrb.mxu3 %v3147_v50 }
 0x4fb   :  { %v922_v55 = vpop.f32.mrf.mxu3  ;;  %v935_v56 = vpop.f32.mrf.mxu2 }
 0x4fc   :  { %v923_v59 = vadd.f32 %v922_v55, %v3089_v31  ;;  %v3173_v60 = vadd.f32 %v935_v56, %v3169_v54 }
 0x4fe   :  { %953 = vrot.lane.b32.xlu2 %v3173_v60, %s2842_s8  ;;  %1048 = vrot.lane.b32.xlu0 %v923_v59, %s2836_s20  ;;  %v1027_v5 = vadd.f32 %v1026_v2, %v923_v59 }
 0x500   :  { %v2446_v46 = vmul.f32 -1.442695, %v1027_v5 }
 0x502   :  { %2620 = vpow2.f32 %v2446_v46 }
 0x503   :  { %v924_v13 = vpop.f32.mrf.mxu3  ;;  %v937_v62 = vpop.f32.mrf.mxu2 }
 0x508   :  { %v2621_v10 = vpop.eup %2620 }
 0x509   :  { %v1031_v15 = vadd.f32 1.0, %v2621_v10 }
 0x50b   :  { %v948_v0 = vpop.f32.mrf.mxu3  ;;  %2622 = vrcp.f32 %v1031_v15  ;;  %v1043_v23 = vand.u32 2147483648, %v1031_v15  ;;  %vm1037_vm9 = vweird.f32 %v1031_v15  ;;  %v1041_v24 = vand.u32 2147483647, %v1031_v15 }
 0x50c   :  { %v949_v57 = vadd.f32 %v948_v0, %v3179_v63 }
 0x50d   :  { %v1044_v29 = vor.u32 1.1754944e-38, %v1043_v23  ;;  %vm1042_vm11 = vcmp.eq.f32.partialorder %v1041_v24, 8.507059e+37 }
 0x50e   :  { %997 = vrot.lane.b32.xlu2 %v949_v57, %s2841_s7 }
 0x511   :  { %v2623_v36 = vpop.eup %2622 }
 0x512   :  { %v1033_v30 = vmul.f32 %v2623_v36, %v1031_v15  ;;  %vm1038_vm8 = vweird.f32 %v2623_v36 }
 0x513   :  { %v950_v1 = vpop.f32.mrf.mxu3  ;;  %vm1039_vm10 = vmor %vm1037_vm9, %vm1038_vm8 }
 0x514   :  { %v1034_v18 = vsub.f32 1.0, %v1033_v30 }
 0x516   :  { %v1035_v21 = vmul.f32 %v2623_v36, %v1034_v18 }
 0x518   :  { %v1036_v4 = vadd.f32 %v2623_v36, %v1035_v21 }
 0x51a   :  { %v1040_v27 = vsel %vm1039_vm10, %v2623_v36, %v1036_v4 }
 0x51b   :  { %v1045_v43 = vsel %vm1042_vm11, %v1044_v29, %v1040_v27 }
 0x51c   :  { %v1058_v0 = vsub.f32 1.0, %v1045_v43  ;;  %v1064_v1 = vmul.f32 %v1045_v43, %v3121_v12 }
 0x558   :  { %v954_v16 = vpop.permute.xlu2 %953 }
 0x559   :  { %v956_v14 = vadd.f32 %v954_v16, %v923_v59  ;;  %v976_v56 = vadd.f32 %v954_v16, %v3173_v60 }
 0x55b   :  { %v2443_v17 = vmul.f32 -1.442695, %v956_v14  ;;  %v2444_v59 = vmul.f32 -1.442695, %v976_v56 }
 0x55d   :  { %2624 = vpow2.f32 %v2443_v17 }
 0x563   :  { %v2625_v20 = vpop.eup %2624 }
 0x564   :  { %v960_v11 = vadd.f32 1.0, %v2625_v20 }
 0x566   :  { %2626 = vrcp.f32 %v960_v11  ;;  %v972_v9 = vand.u32 2147483648, %v960_v11  ;;  %v970_v61 = vand.u32 2147483647, %v960_v11  ;;  %vm966_vm13 = vweird.f32 %v960_v11 }
 0x568   :  { %v973_v39 = vor.u32 1.1754944e-38, %v972_v9  ;;  %vm971_vm15 = vcmp.eq.f32.partialorder %v970_v61, 8.507059e+37  ;;  %v998_v41 = vpop.permute.xlu2 %997 }
 0x56c   :  { %v2627_v25 = vpop.eup %2626 }
 0x56d   :  { %v962_v26 = vmul.f32 %v2627_v25, %v960_v11  ;;  %vm967_vm12 = vweird.f32 %v2627_v25 }
 0x56e   :  { %vm968_vm14 = vmor %vm966_vm13, %vm967_vm12 }
 0x56f   :  { %v963_v52 = vsub.f32 1.0, %v962_v26 }
 0x570   :  { %v1049_v3 = vpop.permute.xlu0 %1048 }
 0x571   :  { %v964_v32 = vmul.f32 %v2627_v25, %v963_v52  ;;  %v1051_v34 = vmul.f32 %v1049_v3, %v1045_v43 }
 0x573   :  { %v965_v37 = vadd.f32 %v2627_v25, %v964_v32  ;;  %1053 = vrot.lane.b32.xlu2 %v1051_v34, %s2836_s20 }
 0x575   :  { %v969_v47 = vsel %vm968_vm14, %v2627_v25, %v965_v37  ;;  %v1192_v37 = vld [vmem:[#allocation2 + $0x4] sm:$0x3] }
 0x576   :  { %v974_v51 = vsel %vm971_vm15, %v973_v39, %v969_v47 }
 0x577   :  { %v1000_v45 = vmul.f32 %v998_v41, %v974_v51 }
 0x579   :  { %1002 = vrot.lane.b32.xlu1 %v1000_v45, %s2836_s20 }
 0x5cd   :  { %v1054_v49 = vpop.permute.xlu2 %1053 }
 0x5ce   :  { %v1056_v38 = vadd.f32 %v1054_v49, %v1026_v2 }
 0x5d0   :  { %2628 = vtanh.f32 %v1056_v38 }
 0x5d6   :  { %v2629_v58 = vpop.eup %2628 }
 0x5d7   :  { %1060 = vrot.lane.b32.xlu1 %v2629_v58, %s2841_s7 }
 0x5eb   :  { %v1003_v53 = vpop.permute.xlu1 %1002 }
 0x5ec   :  { %v1005_v44 = vadd.f32 %v1003_v53, %v3173_v60 }
 0x5ee   :  { %2630 = vtanh.f32 %v1005_v44 }
 0x5ef   :  { %2632 = vpow2.f32 %v2444_v59 }
 0x5f4   :  { %v2631_v55 = vpop.eup %2630 }
 0x5f5   :  { %1009 = vrot.lane.b32.xlu0 %v2631_v55, %s2841_s7  ;;  %v2633_v13 = vpop.eup %2632 }
 0x5f6   :  { %v980_v62 = vadd.f32 1.0, %v2633_v13 }
 0x5f8   :  { %2634 = vrcp.f32 %v980_v62  ;;  %v992_v16 = vand.u32 2147483648, %v980_v62  ;;  %vm986_vm2 = vweird.f32 %v980_v62  ;;  %v990_v36 = vand.u32 2147483647, %v980_v62 }
 0x5fa   :  { %v993_v30 = vor.u32 1.1754944e-38, %v992_v16  ;;  %vm991_vm4 = vcmp.eq.f32.partialorder %v990_v36, 8.507059e+37 }
 0x5fe   :  { %v2635_v46 = vpop.eup %2634 }
 0x5ff   :  { %v982_v10 = vmul.f32 %v2635_v46, %v980_v62  ;;  %vm987_vm0 = vweird.f32 %v2635_v46 }
 0x600   :  { %vm988_vm3 = vmor %vm986_vm2, %vm987_vm0 }
 0x601   :  { %v983_v15 = vsub.f32 1.0, %v982_v10 }
 0x603   :  { %v984_v14 = vmul.f32 %v2635_v46, %v983_v15 }
 0x605   :  { %v985_v60 = vadd.f32 %v2635_v46, %v984_v14 }
 0x607   :  { %v989_v17 = vsel %vm988_vm3, %v2635_v46, %v985_v60 }
 0x608   :  { %v994_v12 = vsel %vm991_vm4, %v993_v30, %v989_v17 }
 0x609   :  { %v1007_v18 = vsub.f32 1.0, %v994_v12  ;;  %v1013_v11 = vmul.f32 0.0, %v994_v12 }
 0x649   :  { %v1061_v57 = vpop.permute.xlu1 %1060 }
 0x64a   :  { %v1063_v2 = vmul.f32 %v1061_v57, %v1058_v0 }
 0x64c   :  { %v3190_v5 = vadd.f32 %v1064_v1, %v1063_v2 }
 0x64e   :  { %1067 = vrot.lane.b32.xlu2 %v3190_v5, %s2841_s7 }
 0x667   :  { %v1010_v20 = vpop.permute.xlu0 %1009 }
 0x668   :  { %v1012_v21 = vmul.f32 %v1010_v20, %v1007_v18 }
 0x66a   :  { %v3194_v4 = vadd.f32 %v1013_v11, %v1012_v21 }
 0x66c   :  { %1071 = vrot.lane.b32.xlu0 %v3194_v4, %s2842_s8 }
 0x6a8   :  { %v1068_v23 = vpop.permute.xlu2 %1067 }
 0x6de   :  { %v1072_v24 = vpop.permute.xlu0 %1071 }
 0x6df   :  { %v1074_v25 = vsel %vm749_vm1, %v1068_v23, %v1072_v24 }
 0x6e0   :  { %v1075_v26 = vpack.c.bf16 %v1074_v25, %v1074_v25 }
 0x6e2   :  { %2447 = vmatmul.msk.bf16.vlgmr.msrb.gmra.mxu1 %vm909_vm7, %v1075_v26  ;;  %2448 = vmatmul.msk.bf16.vlgmr.msra.gmra.mxu2 %vm909_vm7, %v1075_v26 }
 0x6e3   :  { %2449 = vmatmul.msk.bf16.vlgmr.msra.gmra.mxu3 %vm909_vm7, %v1075_v26  ;;  %1415 = vmatpush.bf16.msrb.mxu1 %v3100_v19 }
 0x6e4   :  { %1428 = vmatpush.bf16.msra.mxu2 %v3102_v22  ;;  %1441 = vmatpush.bf16.msra.mxu3 %v3133_v40 }
 0x6e7   :  { %1416 = vmatpush.bf16.msrb.mxu1 %v3105_v7 }
 0x6e8   :  { %1429 = vmatpush.bf16.msra.mxu2 %v3109_v8  ;;  %1442 = vmatpush.bf16.msra.mxu3 %v3137_v42 }
 0x6eb   :  { %1417 = vmatpush.bf16.msrb.mxu1 %v3112_v28 }
 0x6ec   :  { %1430 = vmatpush.bf16.msra.mxu2 %v3116_v6  ;;  %1443 = vmatpush.bf16.msra.mxu3 %v3142_v48 }
 0x6ef   :  { %1418 = vmatpush.bf16.msrb.mxu1 %v3125_v33 }
 0x6f0   :  { %1431 = vmatpush.bf16.msra.mxu2 %v3127_v35  ;;  %1444 = vmatpush.bf16.msra.mxu3 %v3147_v50 }
 0x75f   :  { %v1088_v27 = vpop.f32.mrf.mxu1 }
 0x760   :  { %v1089_v29 = vadd.f32 %v1088_v27, %v3089_v31 }
 0x762   :  { %1214 = vrot.lane.b32.xlu0 %v1089_v29, %s2836_s20  ;;  %v1193_v39 = vadd.f32 %v1192_v37, %v1089_v29 }
 0x764   :  { %v2453_v47 = vmul.f32 -1.442695, %v1193_v39 }
 0x765   :  { %v1101_v52 = vpop.f32.mrf.mxu2 }
 0x766   :  { %v3217_v9 = vadd.f32 %v1101_v52, %v3169_v54  ;;  %v1114_v3 = vpop.f32.mrf.mxu3  ;;  %2636 = vpow2.f32 %v2453_v47 }
 0x767   :  { %v1115_v43 = vadd.f32 %v1114_v3, %v3179_v63  ;;  %v1090_v32 = vpop.f32.mrf.mxu1 }
 0x768   :  { %1119 = vrot.lane.b32.xlu1 %v3217_v9, %s2842_s8 }
 0x769   :  { %1163 = vrot.lane.b32.xlu2 %v1115_v43, %s2841_s7 }
 0x76c   :  { %v2637_v41 = vpop.eup %2636 }
 0x76d   :  { %v1103_v61 = vpop.f32.mrf.mxu2  ;;  %v1197_v51 = vadd.f32 1.0, %v2637_v41 }
 0x76e   :  { %v1116_v34 = vpop.f32.mrf.mxu3 }
 0x76f   :  { %2638 = vrcp.f32 %v1197_v51  ;;  %v1209_v44 = vand.u32 2147483648, %v1197_v51  ;;  %vm1203_vm6 = vweird.f32 %v1197_v51  ;;  %v1207_v55 = vand.u32 2147483647, %v1197_v51 }
 0x771   :  { %v1210_v59 = vor.u32 1.1754944e-38, %v1209_v44  ;;  %vm1208_vm9 = vcmp.eq.f32.partialorder %v1207_v55, 8.507059e+37 }
 0x775   :  { %v2639_v45 = vpop.eup %2638 }
 0x776   :  { %v1199_v49 = vmul.f32 %v2639_v45, %v1197_v51  ;;  %vm1204_vm5 = vweird.f32 %v2639_v45 }
 0x777   :  { %vm1205_vm8 = vmor %vm1203_vm6, %vm1204_vm5 }
 0x778   :  { %v1200_v38 = vsub.f32 1.0, %v1199_v49 }
 0x77a   :  { %v1201_v58 = vmul.f32 %v2639_v45, %v1200_v38 }
 0x77c   :  { %v1202_v53 = vadd.f32 %v2639_v45, %v1201_v58 }
 0x77e   :  { %v1206_v56 = vsel %vm1205_vm8, %v2639_v45, %v1202_v53 }
 0x77f   :  { %v1211_v62 = vsel %vm1208_vm9, %v1210_v59, %v1206_v56 }
 0x780   :  { %v1224_v52 = vsub.f32 1.0, %v1211_v62  ;;  %v1230_v43 = vmul.f32 %v1211_v62, %v3190_v5 }
 0x7c3   :  { %v1164_v20 = vpop.permute.xlu2 %1163 }
 0x7d4   :  { %v1215_v13 = vpop.permute.xlu0 %1214 }
 0x7d5   :  { %v1217_v0 = vmul.f32 %v1215_v13, %v1211_v62 }
 0x7d7   :  { %1219 = vrot.lane.b32.xlu2 %v1217_v0, %s2836_s20 }
 0x7da   :  { %v1120_v57 = vpop.permute.xlu1 %1119 }
 0x7db   :  { %v1122_v1 = vadd.f32 %v1120_v57, %v1089_v29  ;;  %v1142_v34 = vadd.f32 %v1120_v57, %v3217_v9 }
 0x7dd   :  { %v2450_v2 = vmul.f32 -1.442695, %v1122_v1 }
 0x7df   :  { %2640 = vpow2.f32 %v2450_v2 }
 0x7e5   :  { %v2641_v46 = vpop.eup %2640 }
 0x7e6   :  { %v1126_v10 = vadd.f32 1.0, %v2641_v46 }
 0x7e8   :  { %2642 = vrcp.f32 %v1126_v10  ;;  %v1138_v16 = vand.u32 2147483648, %v1126_v10  ;;  %v1136_v17 = vand.u32 2147483647, %v1126_v10  ;;  %vm1132_vm11 = vweird.f32 %v1126_v10 }
 0x7ea   :  { %v1139_v12 = vor.u32 1.1754944e-38, %v1138_v16  ;;  %vm1137_vm13 = vcmp.eq.f32.partialorder %v1136_v17, 8.507059e+37 }
 0x7ee   :  { %v2643_v15 = vpop.eup %2642 }
 0x7ef   :  { %v1128_v14 = vmul.f32 %v2643_v15, %v1126_v10  ;;  %vm1133_vm10 = vweird.f32 %v2643_v15 }
 0x7f0   :  { %vm1134_vm12 = vmor %vm1132_vm11, %vm1133_vm10 }
 0x7f1   :  { %v1129_v60 = vsub.f32 1.0, %v1128_v14 }
 0x7f3   :  { %v1130_v36 = vmul.f32 %v2643_v15, %v1129_v60 }
 0x7f5   :  { %v1131_v30 = vadd.f32 %v2643_v15, %v1130_v36 }
 0x7f7   :  { %v1135_v18 = vsel %vm1134_vm12, %v2643_v15, %v1131_v30 }
 0x7f8   :  { %v1140_v11 = vsel %vm1137_vm13, %v1139_v12, %v1135_v18  ;;  %v1358_v12 = vld [vmem:[#allocation2 + $0x6] sm:$0x3] }
 0x7f9   :  { %v1166_v21 = vmul.f32 %v1164_v20, %v1140_v11 }
 0x7fb   :  { %1168 = vrot.lane.b32.xlu1 %v1166_v21, %s2836_s20 }
 0x831   :  { %v1220_v23 = vpop.permute.xlu2 %1219 }
 0x832   :  { %v1222_v24 = vadd.f32 %v1220_v23, %v1192_v37  ;;  %v2451_v37 = vmul.f32 -1.442695, %v1142_v34 }
 0x834   :  { %2644 = vtanh.f32 %v1222_v24 }
 0x83a   :  { %v2645_v25 = vpop.eup %2644 }
 0x83b   :  { %1226 = vrot.lane.b32.xlu1 %v2645_v25, %s2841_s7 }
 0x86d   :  { %v1169_v26 = vpop.permute.xlu1 %1168 }
 0x86e   :  { %v1171_v27 = vadd.f32 %v1169_v26, %v3217_v9 }
 0x870   :  { %2646 = vtanh.f32 %v1171_v27 }
 0x871   :  { %2648 = vpow2.f32 %v2451_v37 }
 0x876   :  { %v2647_v29 = vpop.eup %2646 }
 0x877   :  { %1175 = vrot.lane.b32.xlu0 %v2647_v29, %s2841_s7  ;;  %v2649_v39 = vpop.eup %2648 }
 0x878   :  { %v1146_v47 = vadd.f32 1.0, %v2649_v39 }
 0x87a   :  { %2650 = vrcp.f32 %v1146_v47  ;;  %v1158_v5 = vand.u32 2147483648, %v1146_v47  ;;  %vm1152_vm15 = vweird.f32 %v1146_v47  ;;  %v1156_v58 = vand.u32 2147483647, %v1146_v47 }
 0x87c   :  { %v1159_v44 = vor.u32 1.1754944e-38, %v1158_v5  ;;  %vm1157_vm2 = vcmp.eq.f32.partialorder %v1156_v58, 8.507059e+37 }
 0x880   :  { %v2651_v41 = vpop.eup %2650 }
 0x881   :  { %v1148_v51 = vmul.f32 %v2651_v41, %v1146_v47  ;;  %vm1153_vm14 = vweird.f32 %v2651_v41 }
 0x882   :  { %vm1154_vm0 = vmor %vm1152_vm15, %vm1153_vm14 }
 0x883   :  { %v1149_v45 = vsub.f32 1.0, %v1148_v51 }
 0x885   :  { %v1150_v49 = vmul.f32 %v2651_v41, %v1149_v45 }
 0x887   :  { %v1151_v38 = vadd.f32 %v2651_v41, %v1150_v49 }
 0x889   :  { %v1155_v53 = vsel %vm1154_vm0, %v2651_v41, %v1151_v38 }
 0x88a   :  { %v1160_v55 = vsel %vm1157_vm2, %v1159_v44, %v1155_v53 }
 0x88b   :  { %v1173_v9 = vsub.f32 1.0, %v1160_v55  ;;  %v1179_v59 = vmul.f32 %v1160_v55, %v3194_v4 }
 0x8ad   :  { %v1227_v3 = vpop.permute.xlu1 %1226 }
 0x8ae   :  { %v1229_v32 = vmul.f32 %v1227_v3, %v1224_v52 }
 0x8b0   :  { %v3229_v61 = vadd.f32 %v1230_v43, %v1229_v32 }
 0x8b2   :  { %1233 = vrot.lane.b32.xlu2 %v3229_v61, %s2841_s7 }
 0x8e9   :  { %v1176_v56 = vpop.permute.xlu0 %1175 }
 0x8ea   :  { %v1178_v13 = vmul.f32 %v1176_v56, %v1173_v9 }
 0x8ec   :  { %v3235_v62 = vadd.f32 %v1179_v59, %v1178_v13 }
 0x8ee   :  { %1237 = vrot.lane.b32.xlu0 %v3235_v62, %s2842_s8 }
 0x90c   :  { %v1234_v0 = vpop.permute.xlu2 %1233 }
 0x960   :  { %v1238_v57 = vpop.permute.xlu0 %1237 }
 0x961   :  { %v1240_v1 = vsel %vm749_vm1, %v1234_v0, %v1238_v57 }
 0x962   :  { %v1241_v2 = vpack.c.bf16 %v1240_v1, %v1240_v1 }
 0x964   :  { %2454 = vmatmul.msk.bf16.vlgmr.msra.gmra.mxu1 %vm909_vm7, %v1241_v2  ;;  %2455 = vmatmul.msk.bf16.vlgmr.msrb.gmra.mxu2 %vm909_vm7, %v1241_v2 }
 0x965   :  { %2456 = vmatmul.msk.bf16.vlgmr.msrb.gmra.mxu3 %vm909_vm7, %v1241_v2  ;;  %1581 = vmatpush.bf16.msra.mxu1 %v3100_v19 }
 0x966   :  { %1594 = vmatpush.bf16.msrb.mxu2 %v3102_v22  ;;  %1607 = vmatpush.bf16.msrb.mxu3 %v3133_v40 }
 0x969   :  { %1582 = vmatpush.bf16.msra.mxu1 %v3105_v7 }
 0x96a   :  { %1595 = vmatpush.bf16.msrb.mxu2 %v3109_v8  ;;  %1608 = vmatpush.bf16.msrb.mxu3 %v3137_v42 }
 0x96d   :  { %1583 = vmatpush.bf16.msra.mxu1 %v3112_v28 }
 0x96e   :  { %1596 = vmatpush.bf16.msrb.mxu2 %v3116_v6  ;;  %1609 = vmatpush.bf16.msrb.mxu3 %v3142_v48 }
 0x971   :  { %1584 = vmatpush.bf16.msra.mxu1 %v3125_v33 }
 0x972   :  { %1597 = vmatpush.bf16.msrb.mxu2 %v3127_v35  ;;  %1610 = vmatpush.bf16.msrb.mxu3 %v3147_v50 }
 0x9e1   :  { %v1254_v46 = vpop.f32.mrf.mxu1 }
 0x9e2   :  { %v1255_v10 = vadd.f32 %v1254_v46, %v3089_v31 }
 0x9e4   :  { %1380 = vrot.lane.b32.xlu0 %v1255_v10, %s2836_s20  ;;  %v1359_v18 = vadd.f32 %v1358_v12, %v1255_v10 }
 0x9e6   :  { %v2460_v20 = vmul.f32 -1.442695, %v1359_v18 }
 0x9e7   :  { %v1267_v15 = vpop.f32.mrf.mxu2 }
 0x9e8   :  { %v3258_v14 = vadd.f32 %v1267_v15, %v3169_v54  ;;  %v1280_v60 = vpop.f32.mrf.mxu3  ;;  %2652 = vpow2.f32 %v2460_v20 }
 0x9e9   :  { %v1281_v16 = vadd.f32 %v1280_v60, %v3179_v63  ;;  %v1256_v36 = vpop.f32.mrf.mxu1 }
 0x9ea   :  { %1285 = vrot.lane.b32.xlu1 %v3258_v14, %s2842_s8 }
 0x9eb   :  { %1329 = vrot.lane.b32.xlu2 %v1281_v16, %s2841_s7 }
 0x9ee   :  { %v2653_v11 = vpop.eup %2652 }
 0x9ef   :  { %v1269_v17 = vpop.f32.mrf.mxu2  ;;  %v1363_v21 = vadd.f32 1.0, %v2653_v11 }
 0x9f0   :  { %v1282_v30 = vpop.f32.mrf.mxu3 }
 0x9f1   :  { %2654 = vrcp.f32 %v1363_v21  ;;  %v1375_v29 = vand.u32 2147483648, %v1363_v21  ;;  %vm1369_vm4 = vweird.f32 %v1363_v21  ;;  %v1373_v52 = vand.u32 2147483647, %v1363_v21 }
 0x9f3   :  { %v1376_v43 = vor.u32 1.1754944e-38, %v1375_v29  ;;  %vm1374_vm6 = vcmp.eq.f32.partialorder %v1373_v52, 8.507059e+37 }
 0x9f7   :  { %v2655_v23 = vpop.eup %2654 }
 0x9f8   :  { %v1365_v24 = vmul.f32 %v2655_v23, %v1363_v21  ;;  %vm1370_vm3 = vweird.f32 %v2655_v23 }
 0x9f9   :  { %vm1371_vm5 = vmor %vm1369_vm4, %vm1370_vm3 }
 0x9fa   :  { %v1366_v25 = vsub.f32 1.0, %v1365_v24 }
 0x9fc   :  { %v1367_v26 = vmul.f32 %v2655_v23, %v1366_v25 }
 0x9fe   :  { %v1368_v27 = vadd.f32 %v2655_v23, %v1367_v26 }
 0xa00   :  { %v1372_v3 = vsel %vm1371_vm5, %v2655_v23, %v1368_v27 }
 0xa01   :  { %v1377_v34 = vsel %vm1374_vm6, %v1376_v43, %v1372_v3 }
 0xa02   :  { %v1390_v60 = vsub.f32 1.0, %v1377_v34  ;;  %v1396_v36 = vmul.f32 %v1377_v34, %v3229_v61 }
 0xa45   :  { %v1330_v59 = vpop.permute.xlu2 %1329 }
 0xa56   :  { %v1381_v32 = vpop.permute.xlu0 %1380 }
 0xa57   :  { %v1383_v37 = vmul.f32 %v1381_v32, %v1377_v34 }
 0xa59   :  { %1385 = vrot.lane.b32.xlu2 %v1383_v37, %s2836_s20 }
 0xa5c   :  { %v1286_v39 = vpop.permute.xlu1 %1285 }
 0xa5d   :  { %v1288_v47 = vadd.f32 %v1286_v39, %v1255_v10 }
 0xa5f   :  { %v2457_v41 = vmul.f32 -1.442695, %v1288_v47 }
 0xa61   :  { %2656 = vpow2.f32 %v2457_v41 }
 0xa67   :  { %v2657_v51 = vpop.eup %2656 }
 0xa68   :  { %v1292_v45 = vadd.f32 1.0, %v2657_v51 }
 0xa6a   :  { %2658 = vrcp.f32 %v1292_v45  ;;  %v1304_v58 = vand.u32 2147483648, %v1292_v45  ;;  %v1302_v44 = vand.u32 2147483647, %v1292_v45  ;;  %vm1298_vm9 = vweird.f32 %v1292_v45 }
 0xa6c   :  { %v1305_v9 = vor.u32 1.1754944e-38, %v1304_v58  ;;  %vm1303_vm11 = vcmp.eq.f32.partialorder %v1302_v44, 8.507059e+37 }
 0xa70   :  { %v2659_v49 = vpop.eup %2658 }
 0xa71   :  { %v1294_v38 = vmul.f32 %v2659_v49, %v1292_v45  ;;  %vm1299_vm8 = vweird.f32 %v2659_v49 }
 0xa72   :  { %vm1300_vm10 = vmor %vm1298_vm9, %vm1299_vm8 }
 0xa73   :  { %v1295_v5 = vsub.f32 1.0, %v1294_v38 }
 0xa75   :  { %v1296_v53 = vmul.f32 %v2659_v49, %v1295_v5 }
 0xa77   :  { %v1297_v55 = vadd.f32 %v2659_v49, %v1296_v53 }
 0xa79   :  { %v1301_v56 = vsel %vm1300_vm10, %v2659_v49, %v1297_v55 }
 0xa7a   :  { %v1306_v13 = vsel %vm1303_vm11, %v1305_v9, %v1301_v56  ;;  %v1524_v56 = vld [vmem:[#allocation2 + $0x8] sm:$0x3] }
 0xa7b   :  { %v1332_v0 = vmul.f32 %v1330_v59, %v1306_v13 }
 0xa7d   :  { %1334 = vrot.lane.b32.xlu1 %v1332_v0, %s2836_s20 }
 0xab3   :  { %v1386_v57 = vpop.permute.xlu2 %1385 }
 0xab4   :  { %v1388_v1 = vadd.f32 %v1386_v57, %v1358_v12  ;;  %v1308_v12 = vadd.f32 %v1286_v39, %v3258_v14 }
 0xab6   :  { %2660 = vtanh.f32 %v1388_v1  ;;  %v2458_v18 = vmul.f32 -1.442695, %v1308_v12 }
 0xabc   :  { %v2661_v2 = vpop.eup %2660 }
 0xabd   :  { %1392 = vrot.lane.b32.xlu1 %v2661_v2, %s2841_s7 }
 0xaef   :  { %v1335_v46 = vpop.permute.xlu1 %1334 }
 0xaf0   :  { %v1337_v10 = vadd.f32 %v1335_v46, %v3258_v14 }
 0xaf2   :  { %2662 = vtanh.f32 %v1337_v10 }
 0xaf3   :  { %2664 = vpow2.f32 %v2458_v18 }
 0xaf8   :  { %v2663_v15 = vpop.eup %2662 }
 0xaf9   :  { %1341 = vrot.lane.b32.xlu0 %v2663_v15, %s2841_s7  ;;  %v2665_v20 = vpop.eup %2664 }
 0xafa   :  { %v1312_v11 = vadd.f32 1.0, %v2665_v20 }
 0xafc   :  { %2666 = vrcp.f32 %v1312_v11  ;;  %v1324_v61 = vand.u32 2147483648, %v1312_v11  ;;  %vm1318_vm13 = vweird.f32 %v1312_v11  ;;  %v1322_v27 = vand.u32 2147483647, %v1312_v11 }
 0xafe   :  { %v1325_v52 = vor.u32 1.1754944e-38, %v1324_v61  ;;  %vm1323_vm15 = vcmp.eq.f32.partialorder %v1322_v27, 8.507059e+37 }
 0xb02   :  { %v2667_v21 = vpop.eup %2666 }
 0xb03   :  { %v1314_v23 = vmul.f32 %v2667_v21, %v1312_v11  ;;  %vm1319_vm12 = vweird.f32 %v2667_v21 }
 0xb04   :  { %vm1320_vm14 = vmor %vm1318_vm13, %vm1319_vm12 }
 0xb05   :  { %v1315_v24 = vsub.f32 1.0, %v1314_v23 }
 0xb07   :  { %v1316_v25 = vmul.f32 %v2667_v21, %v1315_v24 }
 0xb09   :  { %v1317_v26 = vadd.f32 %v2667_v21, %v1316_v25 }
 0xb0b   :  { %v1321_v29 = vsel %vm1320_vm14, %v2667_v21, %v1317_v26 }
 0xb0c   :  { %v1326_v3 = vsel %vm1323_vm15, %v1325_v52, %v1321_v29 }
 0xb0d   :  { %v1339_v14 = vsub.f32 1.0, %v1326_v3  ;;  %v1345_v32 = vmul.f32 %v1326_v3, %v3235_v62 }
 0xb2f   :  { %v1393_v16 = vpop.permute.xlu1 %1392 }
 0xb30   :  { %v1395_v17 = vmul.f32 %v1393_v16, %v1390_v60 }
 0xb32   :  { %v3270_v30 = vadd.f32 %v1396_v36, %v1395_v17 }
 0xb34   :  { %1399 = vrot.lane.b32.xlu2 %v3270_v30, %s2841_s7 }
 0xb6b   :  { %v1342_v43 = vpop.permute.xlu0 %1341 }
 0xb6c   :  { %v1344_v34 = vmul.f32 %v1342_v43, %v1339_v14 }
 0xb6e   :  { %v3276_v37 = vadd.f32 %v1345_v32, %v1344_v34 }
 0xb70   :  { %1403 = vrot.lane.b32.xlu0 %v3276_v37, %s2842_s8 }
 0xb8e   :  { %v1400_v39 = vpop.permute.xlu2 %1399 }
 0xbe2   :  { %v1404_v47 = vpop.permute.xlu0 %1403 }
 0xbe3   :  { %v1406_v41 = vsel %vm749_vm1, %v1400_v39, %v1404_v47 }
 0xbe4   :  { %v1407_v51 = vpack.c.bf16 %v1406_v41, %v1406_v41 }
 0xbe6   :  { %2461 = vmatmul.msk.bf16.vlgmr.msrb.gmra.mxu1 %vm909_vm7, %v1407_v51  ;;  %2462 = vmatmul.msk.bf16.vlgmr.msra.gmra.mxu2 %vm909_vm7, %v1407_v51 }
 0xbe7   :  { %2463 = vmatmul.msk.bf16.vlgmr.msra.gmra.mxu3 %vm909_vm7, %v1407_v51  ;;  %1747 = vmatpush.bf16.msrb.mxu1 %v3100_v19 }
 0xbe8   :  { %1760 = vmatpush.bf16.msra.mxu2 %v3102_v22  ;;  %1773 = vmatpush.bf16.msra.mxu3 %v3133_v40 }
 0xbeb   :  { %1748 = vmatpush.bf16.msrb.mxu1 %v3105_v7 }
 0xbec   :  { %1761 = vmatpush.bf16.msra.mxu2 %v3109_v8  ;;  %1774 = vmatpush.bf16.msra.mxu3 %v3137_v42 }
 0xbef   :  { %1749 = vmatpush.bf16.msrb.mxu1 %v3112_v28 }
 0xbf0   :  { %1762 = vmatpush.bf16.msra.mxu2 %v3116_v6  ;;  %1775 = vmatpush.bf16.msra.mxu3 %v3142_v48 }
 0xbf3   :  { %1750 = vmatpush.bf16.msrb.mxu1 %v3125_v33 }
 0xbf4   :  { %1763 = vmatpush.bf16.msra.mxu2 %v3127_v35  ;;  %1776 = vmatpush.bf16.msra.mxu3 %v3147_v50 }
 0xc63   :  { %v1420_v45 = vpop.f32.mrf.mxu1 }
 0xc64   :  { %v1421_v49 = vadd.f32 %v1420_v45, %v3089_v31 }
 0xc66   :  { %1546 = vrot.lane.b32.xlu0 %v1421_v49, %s2836_s20  ;;  %v1525_v59 = vadd.f32 %v1524_v56, %v1421_v49 }
 0xc68   :  { %v2467_v13 = vmul.f32 -1.442695, %v1525_v59 }
 0xc69   :  { %v1433_v38 = vpop.f32.mrf.mxu2 }
 0xc6a   :  { %v3299_v5 = vadd.f32 %v1433_v38, %v3169_v54  ;;  %v1446_v58 = vpop.f32.mrf.mxu3  ;;  %2668 = vpow2.f32 %v2467_v13 }
 0xc6b   :  { %v1447_v53 = vadd.f32 %v1446_v58, %v3179_v63  ;;  %v1422_v44 = vpop.f32.mrf.mxu1 }
 0xc6c   :  { %1451 = vrot.lane.b32.xlu1 %v3299_v5, %s2842_s8 }
 0xc6d   :  { %1495 = vrot.lane.b32.xlu2 %v1447_v53, %s2841_s7 }
 0xc70   :  { %v2669_v0 = vpop.eup %2668 }
 0xc71   :  { %v1435_v55 = vpop.f32.mrf.mxu2  ;;  %v1529_v57 = vadd.f32 1.0, %v2669_v0 }
 0xc72   :  { %v1448_v9 = vpop.f32.mrf.mxu3 }
 0xc73   :  { %2670 = vrcp.f32 %v1529_v57  ;;  %v1541_v60 = vand.u32 2147483648, %v1529_v57  ;;  %vm1535_vm2 = vweird.f32 %v1529_v57  ;;  %v1539_v16 = vand.u32 2147483647, %v1529_v57 }
 0xc75   :  { %v1542_v17 = vor.u32 1.1754944e-38, %v1541_v60  ;;  %vm1540_vm4 = vcmp.eq.f32.partialorder %v1539_v16, 8.507059e+37 }
 0xc79   :  { %v2671_v1 = vpop.eup %2670 }
 0xc7a   :  { %v1531_v2 = vmul.f32 %v2671_v1, %v1529_v57  ;;  %vm1536_vm0 = vweird.f32 %v2671_v1 }
 0xc7b   :  { %vm1537_vm3 = vmor %vm1535_vm2, %vm1536_vm0 }
 0xc7c   :  { %v1532_v46 = vsub.f32 1.0, %v1531_v2 }
 0xc7e   :  { %v1533_v10 = vmul.f32 %v2671_v1, %v1532_v46 }
 0xc80   :  { %v1534_v15 = vadd.f32 %v2671_v1, %v1533_v10 }
 0xc82   :  { %v1538_v36 = vsel %vm1537_vm3, %v2671_v1, %v1534_v15 }
 0xc83   :  { %v1543_v18 = vsel %vm1540_vm4, %v1542_v17, %v1538_v36 }
 0xc84   :  { %v1556_v53 = vsub.f32 1.0, %v1543_v18  ;;  %v1562_v55 = vmul.f32 %v1543_v18, %v3270_v30 }
 0xcc7   :  { %v1496_v34 = vpop.permute.xlu2 %1495 }
 0xcd8   :  { %v1547_v12 = vpop.permute.xlu0 %1546 }
 0xcd9   :  { %v1549_v20 = vmul.f32 %v1547_v12, %v1543_v18 }
 0xcdb   :  { %1551 = vrot.lane.b32.xlu2 %v1549_v20, %s2836_s20 }
 0xcde   :  { %v1452_v11 = vpop.permute.xlu1 %1451 }
 0xcdf   :  { %v1454_v21 = vadd.f32 %v1452_v11, %v1421_v49 }
 0xce1   :  { %v2464_v23 = vmul.f32 -1.442695, %v1454_v21 }
 0xce3   :  { %2672 = vpow2.f32 %v2464_v23 }
 0xce9   :  { %v2673_v24 = vpop.eup %2672 }
 0xcea   :  { %v1458_v25 = vadd.f32 1.0, %v2673_v24 }
 0xcec   :  { %2674 = vrcp.f32 %v1458_v25  ;;  %v1470_v29 = vand.u32 2147483648, %v1458_v25  ;;  %v1468_v3 = vand.u32 2147483647, %v1458_v25  ;;  %vm1464_vm6 = vweird.f32 %v1458_v25 }
 0xcee   :  { %v1471_v43 = vor.u32 1.1754944e-38, %v1470_v29  ;;  %vm1469_vm9 = vcmp.eq.f32.partialorder %v1468_v3, 8.507059e+37 }
 0xcf2   :  { %v2675_v26 = vpop.eup %2674 }
 0xcf3   :  { %v1460_v61 = vmul.f32 %v2675_v26, %v1458_v25  ;;  %vm1465_vm5 = vweird.f32 %v2675_v26 }
 0xcf4   :  { %vm1466_vm8 = vmor %vm1464_vm6, %vm1465_vm5 }
 0xcf5   :  { %v1461_v27 = vsub.f32 1.0, %v1460_v61 }
 0xcf7   :  { %v1462_v52 = vmul.f32 %v2675_v26, %v1461_v27 }
 0xcf9   :  { %v1463_v14 = vadd.f32 %v2675_v26, %v1462_v52 }
 0xcfb   :  { %v1467_v32 = vsel %vm1466_vm8, %v2675_v26, %v1463_v14 }
 0xcfc   :  { %v1472_v39 = vsel %vm1469_vm9, %v1471_v43, %v1467_v32 }
 0xcfd   :  { %v1498_v47 = vmul.f32 %v1496_v34, %v1472_v39  ;;  %v1690_v34 = vld [vmem:[#allocation2 + $0xa] sm:$0x3] }
 0xcff   :  { %1500 = vrot.lane.b32.xlu1 %v1498_v47, %s2836_s20 }
 0xd35   :  { %v1552_v41 = vpop.permute.xlu2 %1551 }
 0xd36   :  { %v1554_v51 = vadd.f32 %v1552_v41, %v1524_v56  ;;  %v1474_v56 = vadd.f32 %v1452_v11, %v3299_v5 }
 0xd38   :  { %2676 = vtanh.f32 %v1554_v51  ;;  %v2465_v13 = vmul.f32 -1.442695, %v1474_v56 }
 0xd3e   :  { %v2677_v45 = vpop.eup %2676 }
 0xd3f   :  { %1558 = vrot.lane.b32.xlu1 %v2677_v45, %s2841_s7 }
 0xd71   :  { %v1501_v49 = vpop.permute.xlu1 %1500 }
 0xd72   :  { %v1503_v38 = vadd.f32 %v1501_v49, %v3299_v5 }
 0xd74   :  { %2678 = vtanh.f32 %v1503_v38 }
 0xd75   :  { %2680 = vpow2.f32 %v2465_v13 }
 0xd7a   :  { %v2679_v58 = vpop.eup %2678 }
 0xd7b   :  { %1507 = vrot.lane.b32.xlu0 %v2679_v58, %s2841_s7  ;;  %v2681_v0 = vpop.eup %2680 }
 0xd7c   :  { %v1478_v57 = vadd.f32 1.0, %v2681_v0 }
 0xd7e   :  { %2682 = vrcp.f32 %v1478_v57  ;;  %v1490_v30 = vand.u32 2147483648, %v1478_v57  ;;  %vm1484_vm11 = vweird.f32 %v1478_v57  ;;  %v1488_v60 = vand.u32 2147483647, %v1478_v57 }
 0xd80   :  { %v1491_v36 = vor.u32 1.1754944e-38, %v1490_v30  ;;  %vm1489_vm13 = vcmp.eq.f32.partialorder %v1488_v60, 8.507059e+37 }
 0xd84   :  { %v2683_v1 = vpop.eup %2682 }
 0xd85   :  { %v1480_v2 = vmul.f32 %v2683_v1, %v1478_v57  ;;  %vm1485_vm10 = vweird.f32 %v2683_v1 }
 0xd86   :  { %vm1486_vm12 = vmor %vm1484_vm11, %vm1485_vm10 }
 0xd87   :  { %v1481_v46 = vsub.f32 1.0, %v1480_v2 }
 0xd89   :  { %v1482_v10 = vmul.f32 %v2683_v1, %v1481_v46 }
 0xd8b   :  { %v1483_v15 = vadd.f32 %v2683_v1, %v1482_v10 }
 0xd8d   :  { %v1487_v16 = vsel %vm1486_vm12, %v2683_v1, %v1483_v15 }
 0xd8e   :  { %v1492_v17 = vsel %vm1489_vm13, %v1491_v36, %v1487_v16 }
 0xd8f   :  { %v1505_v5 = vsub.f32 1.0, %v1492_v17  ;;  %v1511_v18 = vmul.f32 %v1492_v17, %v3276_v37 }
 0xdb1   :  { %v1559_v44 = vpop.permute.xlu1 %1558 }
 0xdb2   :  { %v1561_v9 = vmul.f32 %v1559_v44, %v1556_v53 }
 0xdb4   :  { %v3311_v59 = vadd.f32 %v1562_v55, %v1561_v9 }
 0xdb6   :  { %1565 = vrot.lane.b32.xlu2 %v3311_v59, %s2841_s7 }
 0xded   :  { %v1508_v12 = vpop.permute.xlu0 %1507 }
 0xdee   :  { %v1510_v20 = vmul.f32 %v1508_v12, %v1505_v5 }
 0xdf0   :  { %v3317_v11 = vadd.f32 %v1511_v18, %v1510_v20 }
 0xdf2   :  { %1569 = vrot.lane.b32.xlu0 %v3317_v11, %s2842_s8 }
 0xe10   :  { %v1566_v21 = vpop.permute.xlu2 %1565 }
 0xe64   :  { %v1570_v23 = vpop.permute.xlu0 %1569 }
 0xe65   :  { %v1572_v24 = vsel %vm749_vm1, %v1566_v21, %v1570_v23 }
 0xe66   :  { %v1573_v25 = vpack.c.bf16 %v1572_v24, %v1572_v24 }
 0xe68   :  { %2468 = vmatmul.msk.bf16.vlgmr.msra.gmra.mxu1 %vm909_vm7, %v1573_v25  ;;  %2469 = vmatmul.msk.bf16.vlgmr.msrb.gmra.mxu2 %vm909_vm7, %v1573_v25 }
 0xe69   :  { %2470 = vmatmul.msk.bf16.vlgmr.msrb.gmra.mxu3 %vm909_vm7, %v1573_v25  ;;  %1913 = vmatpush.bf16.msra.mxu1 %v3100_v19 }
 0xe6a   :  { %1926 = vmatpush.bf16.msrb.mxu2 %v3102_v22  ;;  %1939 = vmatpush.bf16.msrb.mxu3 %v3133_v40 }
 0xe6d   :  { %1914 = vmatpush.bf16.msra.mxu1 %v3105_v7 }
 0xe6e   :  { %1927 = vmatpush.bf16.msrb.mxu2 %v3109_v8  ;;  %1940 = vmatpush.bf16.msrb.mxu3 %v3137_v42 }
 0xe71   :  { %1915 = vmatpush.bf16.msra.mxu1 %v3112_v28 }
 0xe72   :  { %1928 = vmatpush.bf16.msrb.mxu2 %v3116_v6  ;;  %1941 = vmatpush.bf16.msrb.mxu3 %v3142_v48 }
 0xe75   :  { %1916 = vmatpush.bf16.msra.mxu1 %v3125_v33 }
 0xe76   :  { %1929 = vmatpush.bf16.msrb.mxu2 %v3127_v35  ;;  %1942 = vmatpush.bf16.msrb.mxu3 %v3147_v50 }
 0xee5   :  { %v1586_v26 = vpop.f32.mrf.mxu1 }
 0xee6   :  { %v1587_v61 = vadd.f32 %v1586_v26, %v3089_v31 }
 0xee8   :  { %1712 = vrot.lane.b32.xlu0 %v1587_v61, %s2836_s20  ;;  %v1691_v39 = vadd.f32 %v1690_v34, %v1587_v61 }
 0xeea   :  { %v2474_v47 = vmul.f32 -1.442695, %v1691_v39 }
 0xeeb   :  { %v1599_v27 = vpop.f32.mrf.mxu2 }
 0xeec   :  { %v3340_v29 = vadd.f32 %v1599_v27, %v3169_v54  ;;  %v1612_v52 = vpop.f32.mrf.mxu3  ;;  %2684 = vpow2.f32 %v2474_v47 }
 0xeed   :  { %v1613_v3 = vadd.f32 %v1612_v52, %v3179_v63  ;;  %v1588_v14 = vpop.f32.mrf.mxu1 }
 0xeee   :  { %1617 = vrot.lane.b32.xlu1 %v3340_v29, %s2842_s8 }
 0xeef   :  { %1661 = vrot.lane.b32.xlu2 %v1613_v3, %s2841_s7 }
 0xef2   :  { %v2685_v41 = vpop.eup %2684 }
 0xef3   :  { %v1601_v43 = vpop.f32.mrf.mxu2  ;;  %v1695_v51 = vadd.f32 1.0, %v2685_v41 }
 0xef4   :  { %v1614_v32 = vpop.f32.mrf.mxu3 }
 0xef5   :  { %2686 = vrcp.f32 %v1695_v51  ;;  %v1707_v44 = vand.u32 2147483648, %v1695_v51  ;;  %vm1701_vm15 = vweird.f32 %v1695_v51  ;;  %v1705_v55 = vand.u32 2147483647, %v1695_v51 }
 0xef7   :  { %v1708_v56 = vor.u32 1.1754944e-38, %v1707_v44  ;;  %vm1706_vm2 = vcmp.eq.f32.partialorder %v1705_v55, 8.507059e+37 }
 0xefb   :  { %v2687_v45 = vpop.eup %2686 }
 0xefc   :  { %v1697_v49 = vmul.f32 %v2687_v45, %v1695_v51  ;;  %vm1702_vm14 = vweird.f32 %v2687_v45 }
 0xefd   :  { %vm1703_vm0 = vmor %vm1701_vm15, %vm1702_vm14 }
 0xefe   :  { %v1698_v38 = vsub.f32 1.0, %v1697_v49 }
 0xf00   :  { %v1699_v58 = vmul.f32 %v2687_v45, %v1698_v38 }
 0xf02   :  { %v1700_v53 = vadd.f32 %v2687_v45, %v1699_v58 }
 0xf04   :  { %v1704_v9 = vsel %vm1703_vm0, %v2687_v45, %v1700_v53 }
 0xf05   :  { %v1709_v0 = vsel %vm1706_vm2, %v1708_v56, %v1704_v9 }
 0xf06   :  { %v1722_v14 = vsub.f32 1.0, %v1709_v0  ;;  %v1728_v32 = vmul.f32 %v1709_v0, %v3311_v59 }
 0xf49   :  { %v1662_v21 = vpop.permute.xlu2 %1661 }
 0xf5a   :  { %v1713_v13 = vpop.permute.xlu0 %1712 }
 0xf5b   :  { %v1715_v57 = vmul.f32 %v1713_v13, %v1709_v0 }
 0xf5d   :  { %1717 = vrot.lane.b32.xlu2 %v1715_v57, %s2836_s20 }
 0xf60   :  { %v1618_v1 = vpop.permute.xlu1 %1617 }
 0xf61   :  { %v1620_v2 = vadd.f32 %v1618_v1, %v1587_v61 }
 0xf63   :  { %v2471_v46 = vmul.f32 -1.442695, %v1620_v2 }
 0xf65   :  { %2688 = vpow2.f32 %v2471_v46 }
 0xf6b   :  { %v2689_v10 = vpop.eup %2688 }
 0xf6c   :  { %v1624_v15 = vadd.f32 1.0, %v2689_v10 }
 0xf6e   :  { %2690 = vrcp.f32 %v1624_v15  ;;  %v1636_v36 = vand.u32 2147483648, %v1624_v15  ;;  %v1634_v5 = vand.u32 2147483647, %v1624_v15  ;;  %vm1630_vm4 = vweird.f32 %v1624_v15 }
 0xf70   :  { %v1637_v18 = vor.u32 1.1754944e-38, %v1636_v36  ;;  %vm1635_vm6 = vcmp.eq.f32.partialorder %v1634_v5, 8.507059e+37 }
 0xf74   :  { %v2691_v30 = vpop.eup %2690 }
 0xf75   :  { %v1626_v60 = vmul.f32 %v2691_v30, %v1624_v15  ;;  %vm1631_vm3 = vweird.f32 %v2691_v30 }
 0xf76   :  { %vm1632_vm5 = vmor %vm1630_vm4, %vm1631_vm3 }
 0xf77   :  { %v1627_v16 = vsub.f32 1.0, %v1626_v60 }
 0xf79   :  { %v1628_v17 = vmul.f32 %v2691_v30, %v1627_v16 }
 0xf7b   :  { %v1629_v12 = vadd.f32 %v2691_v30, %v1628_v17 }
 0xf7d   :  { %v1633_v20 = vsel %vm1632_vm5, %v2691_v30, %v1629_v12 }
 0xf7e   :  { %v1638_v23 = vsel %vm1635_vm6, %v1637_v18, %v1633_v20 }
 0xf7f   :  { %v1664_v24 = vmul.f32 %v1662_v21, %v1638_v23 }
 0xf81   :  { %1666 = vrot.lane.b32.xlu1 %v1664_v24, %s2836_s20 }
 0xfb7   :  { %v1718_v25 = vpop.permute.xlu2 %1717 }
 0xfb8   :  { %v1720_v26 = vadd.f32 %v1718_v25, %v1690_v34  ;;  %v1640_v34 = vadd.f32 %v1618_v1, %v3340_v29 }
 0xfba   :  { %2692 = vtanh.f32 %v1720_v26  ;;  %v2472_v41 = vmul.f32 -1.442695, %v1640_v34 }
 0xfc0   :  { %v2693_v61 = vpop.eup %2692 }
 0xfc1   :  { %1724 = vrot.lane.b32.xlu1 %v2693_v61, %s2841_s7 }
 0xff3   :  { %v1667_v27 = vpop.permute.xlu1 %1666 }
 0xff4   :  { %v1669_v52 = vadd.f32 %v1667_v27, %v3340_v29 }
 0xff6   :  { %2694 = vtanh.f32 %v1669_v52 }
 0xff7   :  { %2696 = vpow2.f32 %v2472_v41 }
 0xffc   :  { %v2695_v3 = vpop.eup %2694 }
 0xffd   :  { %1673 = vrot.lane.b32.xlu0 %v2695_v3, %s2841_s7  ;;  %v2697_v51 = vpop.eup %2696 }
 0xffe   :  { %v1644_v45 = vadd.f32 1.0, %v2697_v51 }
0x1000   :  { %2698 = vrcp.f32 %v1644_v45  ;;  %v1656_v59 = vand.u32 2147483648, %v1644_v45  ;;  %vm1650_vm9 = vweird.f32 %v1644_v45  ;;  %v1654_v55 = vand.u32 2147483647, %v1644_v45 }
0x1002   :  { %v1657_v56 = vor.u32 1.1754944e-38, %v1656_v59  ;;  %vm1655_vm11 = vcmp.eq.f32.partialorder %v1654_v55, 8.507059e+37 }
0x1006   :  { %v2699_v49 = vpop.eup %2698 }
0x1007   :  { %v1646_v38 = vmul.f32 %v2699_v49, %v1644_v45  ;;  %vm1651_vm8 = vweird.f32 %v2699_v49 }
0x1008   :  { %vm1652_vm10 = vmor %vm1650_vm9, %vm1651_vm8 }
0x1009   :  { %v1647_v58 = vsub.f32 1.0, %v1646_v38 }
0x100b   :  { %v1648_v53 = vmul.f32 %v2699_v49, %v1647_v58 }
0x100d   :  { %v1649_v44 = vadd.f32 %v2699_v49, %v1648_v53 }
0x100f   :  { %v1653_v9 = vsel %vm1652_vm10, %v2699_v49, %v1649_v44 }
0x1010   :  { %v1658_v13 = vsel %vm1655_vm11, %v1657_v56, %v1653_v9 }
0x1011   :  { %v1671_v29 = vsub.f32 1.0, %v1658_v13  ;;  %v1677_v57 = vmul.f32 %v1658_v13, %v3317_v11 }
0x1033   :  { %v1725_v43 = vpop.permute.xlu1 %1724 }
0x1034   :  { %v1727_v39 = vmul.f32 %v1725_v43, %v1722_v14 }
0x1036   :  { %v3352_v47 = vadd.f32 %v1728_v32, %v1727_v39 }
0x1038   :  { %1731 = vrot.lane.b32.xlu2 %v3352_v47, %s2841_s7 }
0x106f   :  { %v1674_v0 = vpop.permute.xlu0 %1673 }
0x1070   :  { %v1676_v1 = vmul.f32 %v1674_v0, %v1671_v29 }
0x1072   :  { %v3358_v2 = vadd.f32 %v1677_v57, %v1676_v1 }
0x1074   :  { %1735 = vrot.lane.b32.xlu0 %v3358_v2, %s2842_s8 }
0x1092   :  { %v1732_v46 = vpop.permute.xlu2 %1731 }
0x10e6   :  { %v1736_v10 = vpop.permute.xlu0 %1735 }
0x10e7   :  { %v1738_v15 = vsel %vm749_vm1, %v1732_v46, %v1736_v10 }
0x10e8   :  { %v1739_v30 = vpack.c.bf16 %v1738_v15, %v1738_v15 }
0x10ea   :  { %2475 = vmatmul.msk.bf16.vlgmr.msrb.gmra.mxu1 %vm909_vm7, %v1739_v30  ;;  %2476 = vmatmul.msk.bf16.vlgmr.msra.gmra.mxu2 %vm909_vm7, %v1739_v30 }
0x10eb   :  { %2477 = vmatmul.msk.bf16.vlgmr.msra.gmra.mxu3 %vm909_vm7, %v1739_v30  ;;  %2079 = vmatpush.bf16.msrb.mxu1 %v3100_v19 }
0x10ec   :  { %2092 = vmatpush.bf16.msra.mxu2 %v3102_v22  ;;  %2105 = vmatpush.bf16.msra.mxu3 %v3133_v40 }
0x10ef   :  { %2080 = vmatpush.bf16.msrb.mxu1 %v3105_v7 }
0x10f0   :  { %2093 = vmatpush.bf16.msra.mxu2 %v3109_v8  ;;  %2106 = vmatpush.bf16.msra.mxu3 %v3137_v42  ;;  %v1856_v42 = vld [vmem:[#allocation2 + $0xc] sm:$0x3] }
0x10f3   :  { %2081 = vmatpush.bf16.msrb.mxu1 %v3112_v28 }
0x10f4   :  { %2094 = vmatpush.bf16.msra.mxu2 %v3116_v6  ;;  %2107 = vmatpush.bf16.msra.mxu3 %v3142_v48 }
0x10f7   :  { %2082 = vmatpush.bf16.msrb.mxu1 %v3125_v33 }
0x10f8   :  { %2095 = vmatpush.bf16.msra.mxu2 %v3127_v35  ;;  %2108 = vmatpush.bf16.msra.mxu3 %v3147_v50 }
0x1167   :  { %v1752_v19 = vpop.f32.mrf.mxu1 }
0x1168   :  { %v1753_v22 = vadd.f32 %v1752_v19, %v3089_v31 }
0x116a   :  { %1878 = vrot.lane.b32.xlu0 %v1753_v22, %s2836_s20  ;;  %v1857_v48 = vadd.f32 %v1856_v42, %v1753_v22 }
0x116c   :  { %v2481_v50 = vmul.f32 -1.442695, %v1857_v48 }
0x116d   :  { %v1765_v7 = vpop.f32.mrf.mxu2 }
0x116e   :  { %v3381_v8 = vadd.f32 %v1765_v7, %v3169_v54  ;;  %v1778_v28 = vpop.f32.mrf.mxu3  ;;  %2700 = vpow2.f32 %v2481_v50 }
0x116f   :  { %v1779_v6 = vadd.f32 %v1778_v28, %v3179_v63  ;;  %v1754_v40 = vpop.f32.mrf.mxu1 }
0x1170   :  { %1783 = vrot.lane.b32.xlu1 %v3381_v8, %s2842_s8 }
0x1171   :  { %1827 = vrot.lane.b32.xlu2 %v1779_v6, %s2841_s7 }
0x1174   :  { %v2701_v60 = vpop.eup %2700 }
0x1175   :  { %v1767_v33 = vpop.f32.mrf.mxu2  ;;  %v1861_v16 = vadd.f32 1.0, %v2701_v60 }
0x1176   :  { %v1780_v35 = vpop.f32.mrf.mxu3 }
0x1177   :  { %2702 = vrcp.f32 %v1861_v16  ;;  %v1873_v20 = vand.u32 2147483648, %v1861_v16  ;;  %vm1867_vm13 = vweird.f32 %v1861_v16  ;;  %v1871_v21 = vand.u32 2147483647, %v1861_v16 }
0x1179   :  { %v1874_v24 = vor.u32 1.1754944e-38, %v1873_v20  ;;  %vm1872_vm15 = vcmp.eq.f32.partialorder %v1871_v21, 8.507059e+37 }
0x117d   :  { %v2703_v36 = vpop.eup %2702 }
0x117e   :  { %v1863_v17 = vmul.f32 %v2703_v36, %v1861_v16  ;;  %vm1868_vm12 = vweird.f32 %v2703_v36 }
0x117f   :  { %vm1869_vm14 = vmor %vm1867_vm13, %vm1868_vm12 }
0x1180   :  { %v1864_v5 = vsub.f32 1.0, %v1863_v17 }
0x1182   :  { %v1865_v12 = vmul.f32 %v2703_v36, %v1864_v5 }
0x1184   :  { %v1866_v18 = vadd.f32 %v2703_v36, %v1865_v12 }
0x1186   :  { %v1870_v23 = vsel %vm1869_vm14, %v2703_v36, %v1866_v18 }
0x1187   :  { %v1875_v26 = vsel %vm1872_vm15, %v1874_v24, %v1870_v23 }
0x1188   :  { %v1888_v57 = vsub.f32 1.0, %v1875_v26  ;;  %v1894_v46 = vmul.f32 %v1875_v26, %v3352_v47 }
0x11cb   :  { %v1828_v53 = vpop.permute.xlu2 %1827 }
0x11dc   :  { %v1879_v25 = vpop.permute.xlu0 %1878 }
0x11dd   :  { %v1881_v61 = vmul.f32 %v1879_v25, %v1875_v26 }
0x11df   :  { %1883 = vrot.lane.b32.xlu2 %v1881_v61, %s2836_s20 }
0x11e2   :  { %v1784_v27 = vpop.permute.xlu1 %1783 }
0x11e3   :  { %v1786_v52 = vadd.f32 %v1784_v27, %v1753_v22  ;;  %v1806_v30 = vadd.f32 %v1784_v27, %v3381_v8 }
0x11e5   :  { %v2478_v3 = vmul.f32 -1.442695, %v1786_v52  ;;  %v2479_v19 = vmul.f32 -1.442695, %v1806_v30 }
0x11e7   :  { %2704 = vpow2.f32 %v2478_v3 }
0x11ed   :  { %v2705_v14 = vpop.eup %2704 }
0x11ee   :  { %v1790_v43 = vadd.f32 1.0, %v2705_v14 }
0x11f0   :  { %2706 = vrcp.f32 %v1790_v43  ;;  %v1802_v41 = vand.u32 2147483648, %v1790_v43  ;;  %v1800_v45 = vand.u32 2147483647, %v1790_v43  ;;  %vm1796_vm2 = vweird.f32 %v1790_v43 }
0x11f2   :  { %v1803_v38 = vor.u32 1.1754944e-38, %v1802_v41  ;;  %vm1801_vm4 = vcmp.eq.f32.partialorder %v1800_v45, 8.507059e+37 }
0x11f6   :  { %v2707_v32 = vpop.eup %2706 }
0x11f7   :  { %v1792_v39 = vmul.f32 %v2707_v32, %v1790_v43  ;;  %vm1797_vm0 = vweird.f32 %v2707_v32  ;;  %v2022_v43 = vld [vmem:[#allocation2 + $0xe] sm:$0x3] }
0x11f8   :  { %vm1798_vm3 = vmor %vm1796_vm2, %vm1797_vm0 }
0x11f9   :  { %v1793_v34 = vsub.f32 1.0, %v1792_v39 }
0x11fb   :  { %v1794_v51 = vmul.f32 %v2707_v32, %v1793_v34 }
0x11fd   :  { %v1795_v49 = vadd.f32 %v2707_v32, %v1794_v51 }
0x11ff   :  { %v1799_v58 = vsel %vm1798_vm3, %v2707_v32, %v1795_v49 }
0x1200   :  { %v1804_v44 = vsel %vm1801_vm4, %v1803_v38, %v1799_v58 }
0x1201   :  { %v1830_v59 = vmul.f32 %v1828_v53, %v1804_v44 }
0x1203   :  { %1832 = vrot.lane.b32.xlu1 %v1830_v59, %s2836_s20 }
0x1239   :  { %v1884_v55 = vpop.permute.xlu2 %1883 }
0x123a   :  { %v1886_v9 = vadd.f32 %v1884_v55, %v1856_v42 }
0x123c   :  { %2708 = vtanh.f32 %v1886_v9 }
0x1242   :  { %v2709_v56 = vpop.eup %2708 }
0x1243   :  { %1890 = vrot.lane.b32.xlu1 %v2709_v56, %s2841_s7 }
0x1275   :  { %v1833_v13 = vpop.permute.xlu1 %1832 }
0x1276   :  { %v1835_v29 = vadd.f32 %v1833_v13, %v3381_v8 }
0x1278   :  { %2710 = vtanh.f32 %v1835_v29 }
0x1279   :  { %2712 = vpow2.f32 %v2479_v19 }
0x127e   :  { %v2711_v0 = vpop.eup %2710 }
0x127f   :  { %1839 = vrot.lane.b32.xlu0 %v2711_v0, %s2841_s7  ;;  %v2713_v22 = vpop.eup %2712 }
0x1280   :  { %v1810_v7 = vadd.f32 1.0, %v2713_v22 }
0x1282   :  { %2714 = vrcp.f32 %v1810_v7  ;;  %v1822_v47 = vand.u32 2147483648, %v1810_v7  ;;  %vm1816_vm6 = vweird.f32 %v1810_v7  ;;  %v1820_v42 = vand.u32 2147483647, %v1810_v7 }
0x1284   :  { %v1823_v50 = vor.u32 1.1754944e-38, %v1822_v47  ;;  %vm1821_vm9 = vcmp.eq.f32.partialorder %v1820_v42, 8.507059e+37 }
0x1288   :  { %v2715_v28 = vpop.eup %2714 }
0x1289   :  { %v1812_v6 = vmul.f32 %v2715_v28, %v1810_v7  ;;  %vm1817_vm5 = vweird.f32 %v2715_v28 }
0x128a   :  { %vm1818_vm8 = vmor %vm1816_vm6, %vm1817_vm5 }
0x128b   :  { %v1813_v40 = vsub.f32 1.0, %v1812_v6 }
0x128d   :  { %v1814_v33 = vmul.f32 %v2715_v28, %v1813_v40 }
0x128f   :  { %v1815_v35 = vadd.f32 %v2715_v28, %v1814_v33 }
0x1291   :  { %v1819_v48 = vsel %vm1818_vm8, %v2715_v28, %v1815_v35  ;;  %vm798_vm8 = vcmask 1040384  }
0x1292   :  { %v1824_v60 = vsel %vm1821_vm9, %v1823_v50, %v1819_v48 }
0x1293   :  { %v1837_v8 = vsub.f32 1.0, %v1824_v60  ;;  %v1843_v36 = vmul.f32 %v1824_v60, %v3358_v2 }
0x12b5   :  { %v1891_v1 = vpop.permute.xlu1 %1890 }
0x12b6   :  { %v1893_v10 = vmul.f32 %v1891_v1, %v1888_v57 }
0x12b8   :  { %v3393_v15 = vadd.f32 %v1894_v46, %v1893_v10 }
0x12ba   :  { %1897 = vrot.lane.b32.xlu2 %v3393_v15, %s2841_s7 }
0x12f1   :  { %v1840_v16 = vpop.permute.xlu0 %1839 }
0x12f2   :  { %v1842_v17 = vmul.f32 %v1840_v16, %v1837_v8 }
0x12f4   :  { %v3399_v5 = vadd.f32 %v1843_v36, %v1842_v17 }
0x12f6   :  { %1901 = vrot.lane.b32.xlu0 %v3399_v5, %s2842_s8 }
0x1314   :  { %v1898_v12 = vpop.permute.xlu2 %1897 }
0x1368   :  { %v1902_v18 = vpop.permute.xlu0 %1901 }
0x1369   :  { %v1904_v20 = vsel %vm749_vm1, %v1898_v12, %v1902_v18 }
0x136a   :  { %v1905_v21 = vpack.c.bf16 %v1904_v20, %v1904_v20 }
0x136c   :  { %2482 = vmatmul.msk.bf16.vlgmr.msra.gmra.mxu1 %vm909_vm7, %v1905_v21  ;;  %2483 = vmatmul.msk.bf16.vlgmr.msrb.gmra.mxu2 %vm909_vm7, %v1905_v21 }
0x136d   :  { %2484 = vmatmul.msk.bf16.vlgmr.msrb.gmra.mxu3 %vm909_vm7, %v1905_v21 }
0x13e9   :  { %v1918_v23 = vpop.f32.mrf.mxu1 }
0x13ea   :  { %v1919_v24 = vadd.f32 %v1918_v23, %v3089_v31 }
0x13ec   :  { %2044 = vrot.lane.b32.xlu0 %v1919_v24, %s2836_s20  ;;  %v2023_v32 = vadd.f32 %v2022_v43, %v1919_v24 }
0x13ee   :  { %v2488_v39 = vmul.f32 -1.442695, %v2023_v32 }
0x13ef   :  { %v1931_v25 = vpop.f32.mrf.mxu2 }
0x13f0   :  { %v3410_v26 = vadd.f32 %v1931_v25, %v3169_v54  ;;  %v1944_v61 = vpop.f32.mrf.mxu3  ;;  %2716 = vpow2.f32 %v2488_v39 }
0x13f1   :  { %v1945_v27 = vadd.f32 %v1944_v61, %v3179_v63  ;;  %v1920_v52 = vpop.f32.mrf.mxu1 }
0x13f2   :  { %1949 = vrot.lane.b32.xlu1 %v3410_v26, %s2842_s8 }
0x13f3   :  { %1993 = vrot.lane.b32.xlu2 %v1945_v27, %s2841_s7 }
0x13f6   :  { %v2717_v34 = vpop.eup %2716 }
0x13f7   :  { %v1933_v3 = vpop.f32.mrf.mxu2  ;;  %v2027_v41 = vadd.f32 1.0, %v2717_v34 }
0x13f8   :  { %v1946_v14 = vpop.f32.mrf.mxu3 }
0x13f9   :  { %2718 = vrcp.f32 %v2027_v41  ;;  %v2039_v53 = vand.u32 2147483648, %v2027_v41  ;;  %vm2033_vm11 = vweird.f32 %v2027_v41  ;;  %v2037_v44 = vand.u32 2147483647, %v2027_v41 }
0x13fb   :  { %v2040_v55 = vor.u32 1.1754944e-38, %v2039_v53  ;;  %vm2038_vm13 = vcmp.eq.f32.partialorder %v2037_v44, 8.507059e+37 }
0x13ff   :  { %v2719_v51 = vpop.eup %2718 }
0x1400   :  { %v2029_v45 = vmul.f32 %v2719_v51, %v2027_v41  ;;  %vm2034_vm10 = vweird.f32 %v2719_v51 }
0x1401   :  { %vm2035_vm12 = vmor %vm2033_vm11, %vm2034_vm10  ;;  %vm1024_vm11 = vcmask 254976  }
0x1402   :  { %v2030_v49 = vsub.f32 1.0, %v2029_v45 }
0x1404   :  { %v2031_v38 = vmul.f32 %v2719_v51, %v2030_v49 }
0x1406   :  { %v2032_v58 = vadd.f32 %v2719_v51, %v2031_v38 }
0x1408   :  { %v2036_v59 = vsel %vm2035_vm12, %v2719_v51, %v2032_v58 }
0x1409   :  { %v2041_v56 = vsel %vm2038_vm13, %v2040_v55, %v2036_v59  ;;  %v2843_v55 = vmov 0  }
0x140a   :  { %v2054_v17 = vsub.f32 1.0, %v2041_v56  ;;  %v2060_v18 = vmul.f32 %v2041_v56, %v3393_v15  ;;  %2589 = vset.pattern.permute.xlu1 %v2843_v55  ;;  %2595 = vset.pattern.permute.xlu0 %v2843_v55 }
0x140b   :  { %2606 = vset.pattern.permute.xlu2 %v2843_v55 }
0x144d   :  { %v1994_v35 = vpop.permute.xlu2 %1993 }
0x145e   :  { %v2045_v9 = vpop.permute.xlu0 %2044 }
0x145f   :  { %v2047_v13 = vmul.f32 %v2045_v9, %v2041_v56  ;;  %v795_v56 = vstv %s794_s18 }
0x1461   :  { %2049 = vrot.lane.b32.xlu2 %v2047_v13, %s2836_s20  ;;  %v797_v13 = vstv %s2390_s2 }
0x1464   :  { %v1950_v29 = vpop.permute.xlu1 %1949 }
0x1465   :  { %v1952_v0 = vadd.f32 %v1950_v29, %v1919_v24  ;;  %v1972_v23 = vadd.f32 %v1950_v29, %v3410_v26  ;;  %v3433_v29 = vsel %vm798_vm8, %v795_v56, %v797_v13 }
0x1466   :  { %vm1679_vm9 = vcmp.gt.s32.totalorder %v3433_v29, 4  ;;  %vm1845_vm10 = vcmp.gt.s32.totalorder %v3433_v29, 5 }
0x1467   :  { %v2485_v57 = vmul.f32 -1.442695, %v1952_v0  ;;  %v2486_v24 = vmul.f32 -1.442695, %v1972_v23 }
0x1469   :  { %2720 = vpow2.f32 %v2485_v57 }
0x146f   :  { %v2721_v1 = vpop.eup %2720 }
0x1470   :  { %v1956_v46 = vadd.f32 1.0, %v2721_v1 }
0x1472   :  { %2722 = vrcp.f32 %v1956_v46  ;;  %v1968_v22 = vand.u32 2147483648, %v1956_v46  ;;  %v1966_v28 = vand.u32 2147483647, %v1956_v46  ;;  %vm1962_vm15 = vweird.f32 %v1956_v46 }
0x1474   :  { %v1969_v40 = vor.u32 1.1754944e-38, %v1968_v22  ;;  %vm1967_vm2 = vcmp.eq.f32.partialorder %v1966_v28, 8.507059e+37 }
0x1478   :  { %v2723_v10 = vpop.eup %2722 }
0x1479   :  { %v1958_v30 = vmul.f32 %v2723_v10, %v1956_v46  ;;  %vm1963_vm14 = vweird.f32 %v2723_v10 }
0x147a   :  { %vm1964_vm0 = vmor %vm1962_vm15, %vm1963_vm14 }
0x147b   :  { %v1959_v19 = vsub.f32 1.0, %v1958_v30  ;;  %v2844_v30 = vmov 0.0  }
0x147d   :  { %v1960_v7 = vmul.f32 %v2723_v10, %v1959_v19 }
0x147f   :  { %v1961_v6 = vadd.f32 %v2723_v10, %v1960_v7 }
0x1481   :  { %v1965_v33 = vsel %vm1964_vm0, %v2723_v10, %v1961_v6  ;;  %v2480_v6 = vsel %vm1845_vm10, 1.0, %v2844_v30  ;;  %vm1347_vm0 = vcmp.gt.s32.totalorder %v3433_v29, 2 }
0x1482   :  { %v1970_v47 = vsel %vm1967_vm2, %v1969_v40, %v1965_v33  ;;  %vm1513_vm2 = vcmp.gt.s32.totalorder %v3433_v29, 3 }
0x1483   :  { %v1996_v42 = vmul.f32 %v1994_v35, %v1970_v47 }
0x1485   :  { %1998 = vrot.lane.b32.xlu1 %v1996_v42, %s2836_s20 }
0x14bb   :  { %v2050_v48 = vpop.permute.xlu2 %2049 }
0x14bc   :  { %v2052_v50 = vadd.f32 %v2050_v48, %v2022_v43 }
0x14be   :  { %2724 = vtanh.f32 %v2052_v50 }
0x14c4   :  { %v2725_v60 = vpop.eup %2724 }
0x14c5   :  { %2056 = vrot.lane.b32.xlu1 %v2725_v60, %s2841_s7 }
0x14f7   :  { %v1999_v8 = vpop.permute.xlu1 %1998 }
0x14f8   :  { %v2001_v16 = vadd.f32 %v1999_v8, %v3410_v26 }
0x14fa   :  { %2726 = vtanh.f32 %v2001_v16 }
0x14fb   :  { %2728 = vpow2.f32 %v2486_v24 }
0x1500   :  { %v2727_v36 = vpop.eup %2726 }
0x1501   :  { %2005 = vrot.lane.b32.xlu0 %v2727_v36, %s2841_s7  ;;  %v2729_v25 = vpop.eup %2728 }
0x1502   :  { %v1976_v61 = vadd.f32 1.0, %v2729_v25 }
0x1504   :  { %2730 = vrcp.f32 %v1976_v61  ;;  %v1988_v32 = vand.u32 2147483648, %v1976_v61  ;;  %vm1982_vm4 = vweird.f32 %v1976_v61  ;;  %v1986_v15 = vand.u32 2147483647, %v1976_v61 }
0x1506   :  { %v1989_v34 = vor.u32 1.1754944e-38, %v1988_v32  ;;  %vm1987_vm6 = vcmp.eq.f32.partialorder %v1986_v15, 8.507059e+37  ;;  %v2466_v32 = vsel %vm1513_vm2, 1.0, %v2844_v30 }
0x150a   :  { %v2731_v27 = vpop.eup %2730 }
0x150b   :  { %v1978_v52 = vmul.f32 %v2731_v27, %v1976_v61  ;;  %vm1983_vm3 = vweird.f32 %v2731_v27 }
0x150c   :  { %vm1984_vm5 = vmor %vm1982_vm4, %vm1983_vm3  ;;  %vm2011_vm3 = vcmp.gt.s32.totalorder %v3433_v29, 6  ;;  %vm2177_vm4 = vcmp.gt.s32.totalorder %v3433_v29, 7 }
0x150d   :  { %v1979_v3 = vsub.f32 1.0, %v1978_v52 }
0x150f   :  { %v1980_v14 = vmul.f32 %v2731_v27, %v1979_v3 }
0x1511   :  { %v1981_v43 = vadd.f32 %v2731_v27, %v1980_v14 }
0x1513   :  { %v1985_v39 = vsel %vm1984_vm5, %v2731_v27, %v1981_v43  ;;  %v2459_v43 = vsel %vm1347_vm0, 1.0, %v2844_v30 }
0x1514   :  { %v1990_v41 = vsel %vm1987_vm6, %v1989_v34, %v1985_v39  ;;  %v2596_v15 = vpack.i.bf16 %v2466_v32, %v2459_v43 }
0x1515   :  { %v2003_v26 = vsub.f32 1.0, %v1990_v41  ;;  %v2009_v45 = vmul.f32 %v1990_v41, %v3399_v5 }
0x1537   :  { %v2057_v12 = vpop.permute.xlu1 %2056 }
0x1538   :  { %v2059_v20 = vmul.f32 %v2057_v12, %v2054_v17 }
0x153a   :  { %v2061_v21 = vadd.f32 %v2060_v18, %v2059_v20 }
0x153c   :  { %2063 = vrot.lane.b32.xlu2 %v2061_v21, %s2841_s7 }
0x1573   :  { %v2006_v51 = vpop.permute.xlu0 %2005 }
0x1574   :  { %v2008_v49 = vmul.f32 %v2006_v51, %v2003_v26 }
0x1576   :  { %v3425_v38 = vadd.f32 %v2009_v45, %v2008_v49 }
0x1578   :  { %2067 = vrot.lane.b32.xlu0 %v3425_v38, %s2842_s8 }
0x1596   :  { %v2064_v58 = vpop.permute.xlu2 %2063 }
0x15ea   :  { %v2068_v53 = vpop.permute.xlu0 %2067 }
0x15eb   :  { %v2070_v44 = vsel %vm749_vm1, %v2064_v58, %v2068_v53  ;;  %vm1015_vm1 = vcmp.gt.s32.totalorder %v3433_v29, 0  ;;  %v2487_v53 = vsel %vm2011_vm3, 1.0, %v2844_v30 }
0x15ec   :  { %v2071_v59 = vpack.c.bf16 %v2070_v44, %v2070_v44  ;;  %v2445_v19 = vsel %vm1015_vm1, 1.0, %v2844_v30  ;;  %v2494_v44 = vsel %vm2177_vm4, 1.0, %v2844_v30 }
0x15ee   :  { %2489 = vmatmul.msk.bf16.vlgmr.msrb.gmra.mxu1 %vm909_vm7, %v2071_v59  ;;  %2490 = vmatmul.msk.bf16.vlgmr.msra.gmra.mxu2 %vm909_vm7, %v2071_v59 }
0x15ef   :  { %2491 = vmatmul.msk.bf16.vlgmr.msra.gmra.mxu3 %vm909_vm7, %v2071_v59  ;;  %vm1181_vm7 = vcmp.gt.s32.totalorder %v3433_v29, 1  ;;  %v2607_v59 = vpack.i.bf16 %v2494_v44, %v2487_v53 }
0x15f0   :  { %v2452_v22 = vsel %vm1181_vm7, 1.0, %v2844_v30 }
0x166b   :  { %v2084_v9 = vpop.f32.mrf.mxu1 }
0x166c   :  { %v2085_v33 = vadd.f32 %v2084_v9, %v3089_v31 }
0x1671   :  { %v2097_v0 = vpop.f32.mrf.mxu2 }
0x1672   :  { %v3436_v57 = vadd.f32 %v2097_v0, %v3169_v54  ;;  %v2110_v1 = vpop.f32.mrf.mxu3  ;;  %v2590_v54 = vpack.i.bf16 %v2452_v22, %v2445_v19 }
0x1673   :  { %v2111_v46 = vadd.f32 %v2110_v1, %v3179_v63  ;;  %v2086_v10 = vpop.f32.mrf.mxu1  ;;  %v2473_v63 = vsel %vm1679_vm9, 1.0, %v2844_v30 }
0x1674   :  { %2115 = vrot.lane.b32.xlu1 %v3436_v57, %s2842_s8  ;;  %v2601_v40 = vpack.i.bf16 %v2480_v6, %v2473_v63 }
0x1675   :  { %2159 = vrot.lane.b32.xlu2 %v2111_v46, %s2841_s7 }
0x1679   :  { %v2099_v7 = vpop.f32.mrf.mxu2 }
0x167a   :  { %v2112_v28 = vpop.f32.mrf.mxu3 }
0x167c   :  { %2591 = vperm.xlu1 %2589, %v2590_v54  }
0x1684   :  { %2602 = vperm.xlu1 %2589, %v2601_v40  }
0x16e6   :  { %v3451_v35 = vpop.permute.xlu1 %2115 }
0x16e7   :  { %v2118_v47 = vadd.f32 %v3451_v35, %v2085_v33  ;;  %v2138_v55 = vadd.f32 %v3451_v35, %v3436_v57 }
0x16e9   :  { %v2492_v42 = vmul.f32 -1.442695, %v2118_v47  ;;  %v2493_v9 = vmul.f32 -1.442695, %v2138_v55 }
0x16eb   :  { %2732 = vpow2.f32 %v2492_v42 }
0x16ee   :  { %v2592_v48 = vpop.permute.xlu1 %2591 }
0x16ef   :  { %v2594_v50 = vunpack.i.h.bf16 %v2592_v48  ;;  %v2593_v60 = vunpack.i.l.bf16 %v2592_v48 }
0x16f1   :  { %v2733_v8 = vpop.eup %2732  ;;  %v1189_v16 = vmul.f32 %v2594_v50, %v3235_v62  ;;  %v1023_v36 = vmul.f32 %v2593_v60, %v3194_v4 }
0x16f2   :  { %v2122_v17 = vadd.f32 1.0, %v2733_v8 }
0x16f3   :  { %1191 = vst.msk [vmem:[#allocation10 + $0x2] sm:$0x3] %vm1024_vm11, %v1189_v16 }
0x16f4   :  { %2734 = vrcp.f32 %v2122_v17  ;;  %1025 = vst.msk [vmem:[#allocation10] sm:$0x3] %vm1024_vm11, %v1023_v36  ;;  %v2134_v62 = vand.u32 2147483648, %v2122_v17  ;;  %v2132_v61 = vand.u32 2147483647, %v2122_v17  ;;  %vm2128_vm13 = vweird.f32 %v2122_v17 }
0x16f6   :  { %v2603_v31 = vpop.permute.xlu1 %2602  ;;  %v2135_v52 = vor.u32 1.1754944e-38, %v2134_v62  ;;  %vm2133_vm15 = vcmp.eq.f32.partialorder %v2132_v61, 8.507059e+37 }
0x16f7   :  { %v2605_v12 = vunpack.i.h.bf16 %v2603_v31  ;;  %v2604_v18 = vunpack.i.l.bf16 %v2603_v31 }
0x16f9   :  { %v1853_v20 = vmul.f32 %v2605_v12, %v3399_v5  ;;  %v1687_v21 = vmul.f32 %v2604_v18, %v3358_v2  ;;  %v2160_v5 = vpop.permute.xlu2 %2159 }
0x16fa   :  { %v2735_v23 = vpop.eup %2734 }
0x16fb   :  { %1855 = vst.msk [vmem:[#allocation10 + $0xa] sm:$0x3] %vm1024_vm11, %v1853_v20  ;;  %v2124_v24 = vmul.f32 %v2735_v23, %v2122_v17  ;;  %vm2129_vm12 = vweird.f32 %v2735_v23 }
0x16fc   :  { %1689 = vst.msk [vmem:[#allocation10 + $0x8] sm:$0x3] %vm1024_vm11, %v1687_v21  ;;  %vm2130_vm14 = vmor %vm2128_vm13, %vm2129_vm12 }
0x16fd   :  { %v2125_v4 = vsub.f32 1.0, %v2124_v24 }
0x16ff   :  { %v2126_v25 = vmul.f32 %v2735_v23, %v2125_v4 }
0x1701   :  { %v2127_v27 = vadd.f32 %v2735_v23, %v2126_v25 }
0x1703   :  { %v2131_v3 = vsel %vm2130_vm14, %v2735_v23, %v2127_v27 }
0x1704   :  { %v2136_v14 = vsel %vm2133_vm15, %v2135_v52, %v2131_v3 }
0x1705   :  { %v2162_v2 = vmul.f32 %v2160_v5, %v2136_v14 }
0x1707   :  { %2164 = vrot.lane.b32.xlu0 %v2162_v2, %s2836_s20  ;;  %s2845_s20 = smov [#allocation10]  }
0x1708   :  { %s2192_s19 = sshll.u32 %s2845_s20, 4  ;;  %s2193_s19 = int_to_ptr.vmem [resolvable:$true] %s2192_s19 }
0x170f   :  { %2597 = vperm.xlu0 %2595, %v2596_v15  }
0x1779   :  { %v2165_v39 = vpop.permute.xlu0 %2164 }
0x177a   :  { %v2167_v34 = vadd.f32 %v2165_v39, %v3436_v57 }
0x177c   :  { %2736 = vtanh.f32 %v2167_v34 }
0x177d   :  { %2738 = vpow2.f32 %v2493_v9 }
0x1781   :  { %v2598_v41 = vpop.permute.xlu0 %2597 }
0x1782   :  { %v2737_v26 = vpop.eup %2736  ;;  %v2600_v51 = vunpack.i.h.bf16 %v2598_v41  ;;  %v2599_v45 = vunpack.i.l.bf16 %v2598_v41 }
0x1783   :  { %2171 = vrot.lane.b32.xlu2 %v2737_v26, %s2841_s7  ;;  %v2739_v56 = vpop.eup %2738 }
0x1784   :  { %v1521_v49 = vmul.f32 %v2600_v51, %v3317_v11  ;;  %v1355_v58 = vmul.f32 %v2599_v45, %v3276_v37  ;;  %v2142_v13 = vadd.f32 1.0, %v2739_v56 }
0x1786   :  { %1523 = vst.msk [vmem:[#allocation10 + $0x6] sm:$0x3] %vm1024_vm11, %v1521_v49  ;;  %2740 = vrcp.f32 %v2142_v13  ;;  %v2154_v46 = vand.u32 2147483648, %v2142_v13  ;;  %vm2148_vm6 = vweird.f32 %v2142_v13  ;;  %v2152_v10 = vand.u32 2147483647, %v2142_v13 }
0x1787   :  { %1357 = vst.msk [vmem:[#allocation10 + $0x4] sm:$0x3] %vm1024_vm11, %v1355_v58 }
0x1788   :  { %v2155_v19 = vor.u32 1.1754944e-38, %v2154_v46  ;;  %vm2153_vm1 = vcmp.eq.f32.partialorder %v2152_v10, 8.507059e+37 }
0x178b   :  { %2608 = vperm.xlu2 %2606, %v2607_v59  }
0x178c   :  { %v2741_v11 = vpop.eup %2740 }
0x178d   :  { %v2144_v37 = vmul.f32 %v2741_v11, %v2142_v13  ;;  %vm2149_vm5 = vweird.f32 %v2741_v11 }
0x178e   :  { %vm2150_vm8 = vmor %vm2148_vm6, %vm2149_vm5 }
0x178f   :  { %v2145_v29 = vsub.f32 1.0, %v2144_v37 }
0x1791   :  { %v2146_v0 = vmul.f32 %v2741_v11, %v2145_v29 }
0x1793   :  { %v2147_v1 = vadd.f32 %v2741_v11, %v2146_v0 }
0x1795   :  { %v2151_v30 = vsel %vm2150_vm8, %v2741_v11, %v2147_v1 }
0x1796   :  { %v2156_v22 = vsel %vm2153_vm1, %v2155_v19, %v2151_v30 }
0x1797   :  { %v2169_v54 = vsub.f32 1.0, %v2156_v22  ;;  %v2175_v28 = vmul.f32 %v2156_v22, %v3425_v38 }
0x17dd   :  { %v2172_v57 = vpop.permute.xlu2 %2171 }
0x17de   :  { %v2174_v7 = vmul.f32 %v2172_v57, %v2169_v54 }
0x17e0   :  { %v2176_v6 = vadd.f32 %v2175_v28, %v2174_v7 }
0x17e5   :  { %v2609_v63 = vpop.permute.xlu2 %2608 }
0x17e6   :  { %v2611_v40 = vunpack.i.h.bf16 %v2609_v63  ;;  %v2610_v33 = vunpack.i.l.bf16 %v2609_v63 }
0x17e8   :  { %v2185_v35 = vmul.f32 %v2611_v40, %v2176_v6  ;;  %v2019_v47 = vmul.f32 %v2610_v33, %v3425_v38 }
0x17ea   :  { %2187 = vst.msk [vmem:[#allocation10 + $0xe] sm:$0x3] %vm1024_vm11, %v2185_v35 }
0x17eb   :  { %2021 = vst.msk [vmem:[#allocation10 + $0xc] sm:$0x3] %vm1024_vm11, %v2019_v47 }
0x17ec   :  { %2200 = dma.vmem_to_hbm [thread:$0]  %s2193_s19, 256, %s2195_s21, [#allocation7], %s2842_s8, %s2842_s8, %s2846_s22  }
0x17ed   :  { %2832 = dma.done.wait [#allocation7], 256  }
0x17ee   :  { %2833 = vsyncadd [#allocation7], 4294967040 }
0x17ef   :  { %2205 = vsyncpa [#allocation6], 1 }
0x17f0   :  { %2206 = vsyncpa [#allocation9], 1 }
0x17f1   :  { %2207 = vsyncpa [#allocation7], 1 }

</bundles_post_ra>
